<compile_context>
chip_gen: v5e
topology: v5e:2x2
jax: 0.10.0
libtpu: 0.0.40
codegen_flags: <defaults>
</compile_context>

<pallas_src>
import functools

import numpy as np
import jax
import jax.numpy as jnp
from jax.experimental import pallas as pl
from jax.experimental.pallas import tpu as pltpu


def _make_fused_attention_kernel(*, BN, BI, H, Dh):
    """Fused kernel: q/kv Linear + per-head attention + scramble + proj Linear."""
    C = H * Dh

    def kernel(xm_ref, wqkv_ref, mask_ref, perm_ref, wproj_ref, bias_ref, o_ref):
        # xm_ref:    (BN+BI, C)    bf16  x rows (0..BN) stacked over memory rows (BN..)
        # wqkv_ref:  (C, 3C)       bf16  [scale * Wq^T | Wkv^T]  (prepared once)
        # mask_ref:  (BN, BI)      f32   0 (same batch) / -1e30 (cross batch)
        # perm_ref:  (H*BN, H*BN)  bf16  0/1 scramble permutation (precomputed)
        # wproj_ref: (C, C)        bf16  proj weight, (in, out)
        # bias_ref:  (1, C)        f32   proj bias
        # o_ref:     (BN, C)       f32   final output (single lane-dense store)

        # --- fused q / kv projection: ONE MXU push, f32 accumulation ---
        proj = jnp.dot(xm_ref[...], wqkv_ref[...],
                       preferred_element_type=jnp.float32)        # (BN+BI, 3C)
        q = proj[:BN, :C]                    # (BN, C); scale already folded into Wq
        k_all = proj[BN:, C:2 * C]           # (BI, C)
        v_all = proj[BN:, 2 * C:3 * C]       # (BI, C)

        mask = mask_ref[...]                 # (BN, BI) precomputed additive mask

        # --- per-head attention over all batches at once (softmax in f32) ---
        head_outs = []
        for h in range(H):
            lo = h * Dh
            q_h = q[:, lo:lo + Dh]           # (BN, Dh)
            k_h = k_all[:, lo:lo + Dh]       # (BI, Dh)
            v_h = v_all[:, lo:lo + Dh]       # (BI, Dh)
            s = jax.lax.dot_general(q_h, k_h, (((1,), (1,)), ((), ())),
                                    preferred_element_type=jnp.float32)  # (BN, BI)
            s = s + mask
            s = s - jnp.max(s, axis=-1, keepdims=True)
            p = jnp.exp(s)
            p = p * pl.reciprocal(jnp.sum(p, axis=-1, keepdims=True), approx=True)
            head_outs.append(jnp.dot(p, v_h, preferred_element_type=jnp.float32))

        # os_mat rows are in (h, b, n) order — the flat element order of the PyTorch
        # (attn @ v).transpose(1, 2) tensor right before .reshape(B, N, C).
        os_mat = jnp.concatenate(head_outs, axis=0).astype(jnp.bfloat16)  # (H*BN, Dh)

        # --- the "scramble" + output projection ---
        # scrambled[r, h*Dh + d] == os_mat[r*H + h, d]  (C == H*Dh).  One permutation
        # matmul groups the rows by destination column block:
        #   perm_os[h*BN + r, :] = os_mat[r*H + h, :]
        # and then  out = sum_h perm_os[h*BN:(h+1)*BN, :] @ Wproj[h*Dh:(h+1)*Dh, :] + b.
        perm_os = jnp.dot(perm_ref[...], os_mat,
                          preferred_element_type=jnp.float32)      # (H*BN, Dh)
        pos_bf = perm_os.astype(jnp.bfloat16)
        wproj = wproj_ref[...]

        acc = jnp.zeros((BN, C), jnp.float32)
        for h in range(H):
            acc = acc + jnp.dot(pos_bf[h * BN:(h + 1) * BN, :],
                                wproj[h * Dh:(h + 1) * Dh, :],
                                preferred_element_type=jnp.float32)  # (BN, C)

        o_ref[...] = acc + bias_ref[...]

    return kernel


def prepare_params(params, scale):
    """One-time parameter prep (hoisted out of the forward): transpose nn.Linear
    weights to (in, out), fold the softmax scale into Wq, concatenate q/kv weights
    into one (C, 3C) operand, cast to bf16 for the MXU; bias -> (1, C) f32."""
    wq, wkv, wproj, bproj = params
    wq_t = jnp.transpose(wq) * scale                       # scale folded in, done once
    wkv_t = jnp.transpose(wkv)
    wqkv = jnp.concatenate([wq_t, wkv_t], axis=1).astype(jnp.bfloat16)   # (C, 3C)
    return (wqkv,
            jnp.transpose(wproj).astype(jnp.bfloat16),                   # (C, C)
            bproj.reshape(1, -1).astype(jnp.float32))                    # (1, C)


def _scramble_perm(BN, H):
    """0/1 permutation P with (P @ os_mat)[h*BN + r, :] == os_mat[r*H + h, :]."""
    rows = np.arange(H * BN)
    perm = np.zeros((H * BN, H * BN), np.float32)
    perm[rows, (rows % BN) * H + rows // BN] = 1.0
    return perm


def _batch_mask(B, N, I):
    """Additive mask: token row b*N+n may only attend to memory rows of batch b."""
    row_b = np.arange(B * N) // N
    col_b = np.arange(B * I) // I
    return np.where(row_b[:, None] == col_b[None, :], 0.0, -1e30).astype(np.float32)


@functools.partial(jax.jit, static_argnames=("dim", "num_heads", "parts", "instances"))
def attention_forward(x, memory, prepared_params, *, dim, num_heads, parts, instances=4):
    """Pallas equivalent of Attention.forward(x, memory, instances)."""
    B, N, C = x.shape
    assert C == dim * parts
    H = num_heads
    Dh = C // H
    BN = B * N
    BI = B * instances

    wqkv, wproj_t, bias2d = prepared_params

    # Row-stack tokens and memory slots into one bf16 operand for the fused projection.
    xm = jnp.concatenate([x.reshape(BN, C), memory.reshape(BI, -1)],
                         axis=0).astype(jnp.bfloat16)                  # (BN+BI, C)

    # Shape-only constants (baked in at trace time; no in-kernel iota/compare work).
    mask = jnp.asarray(_batch_mask(B, N, instances))                   # (BN, BI) f32
    perm = jnp.asarray(_scramble_perm(BN, H), dtype=jnp.bfloat16)      # (H*BN, H*BN)

    out2d = pl.pallas_call(
        _make_fused_attention_kernel(BN=BN, BI=BI, H=H, Dh=Dh),
        out_shape=jax.ShapeDtypeStruct((BN, C), jnp.float32),
        grid=(1,),
        in_specs=[
            pl.BlockSpec((BN + BI, C), lambda i: (0, 0)),
            pl.BlockSpec((C, 3 * C), lambda i: (0, 0)),
            pl.BlockSpec((BN, BI), lambda i: (0, 0)),
            pl.BlockSpec((H * BN, H * BN), lambda i: (0, 0)),
            pl.BlockSpec((C, C), lambda i: (0, 0)),
            pl.BlockSpec((1, C), lambda i: (0, 0)),
        ],
        out_specs=pl.BlockSpec((BN, C), lambda i: (0, 0)),
        compiler_params=pltpu.CompilerParams(dimension_semantics=("arbitrary",)),
    )(xm, wqkv, mask, perm, wproj_t, bias2d)

    # attn_drop / proj_drop are nn.Dropout(0.0) -> identity; nothing to do.
    return out2d.reshape(B, N, C)


def attention_reference(x, memory, params, *, dim, num_heads, parts, instances=4):
    """Pure-JAX line-by-line transcription of the PyTorch forward (for verification)."""
    wq, wkv, wproj, bproj = params
    B, N, C = x.shape
    # NOTE: the module derives scale from dim//num_heads (not the operating head dim
    # C//num_heads); reproduced faithfully here.
    scale = (dim // num_heads) ** -0.5
    Dh = C // num_heads
    q = (x @ wq.T).reshape(B, N, 1, num_heads, Dh).transpose(2, 0, 3, 1, 4)   # (1,B,H,N,Dh)
    mem = memory.reshape(B, instances, -1)
    kv = (mem @ wkv.T).reshape(B, instances, 2, num_heads, Dh).transpose(2, 0, 3, 1, 4)
    k, v = kv[0], kv[1]                                                        # (B,H,I,Dh)
    attn = jnp.einsum("abhnd,bhid->abhni", q, k) * scale                       # (1,B,H,N,I)
    attn = jax.nn.softmax(attn, axis=-1)
    rec = jnp.einsum("abhni,bhid->abhnd", attn, v)                             # (1,B,H,N,Dh)
    rec = jnp.transpose(rec, (0, 2, 1, 3, 4)).reshape(B, N, C)                 # the scramble
    return rec @ wproj.T + bproj


def init_params(key, C):
    """Deterministic synthetic parameters with PyTorch nn.Linear shapes."""
    k1, k2, k3, k4 = jax.random.split(key, 4)
    bound = 1.0 / (C ** 0.5)
    wq = jax.random.uniform(k1, (C, C), jnp.float32, -bound, bound)       # q.weight
    wkv = jax.random.uniform(k2, (2 * C, C), jnp.float32, -bound, bound)  # kv.weight
    wproj = jax.random.uniform(k3, (C, C), jnp.float32, -bound, bound)    # proj.weight
    bproj = jax.random.uniform(k4, (C,), jnp.float32, -bound, bound)      # proj.bias
    return wq, wkv, wproj, bproj


if __name__ == "__main__":
    # Small but structurally faithful configuration (N != H to exercise the scramble):
    dim, num_heads, parts, instances = 64, 8, 4, 4
    C = dim * parts            # 256
    B, N = 2, 16

    key = jax.random.PRNGKey(0)
    kx, km, kp = jax.random.split(key, 3)
    x = jax.random.normal(kx, (B, N, C), dtype=jnp.float32)
    memory = jax.random.normal(km, (B, instances, C), dtype=jnp.float32)
    params = init_params(kp, C)

    scale = (dim // num_heads) ** -0.5     # module uses dim//num_heads, kept faithfully
    prepared = prepare_params(params, scale)   # one-time: transposes, concat, bf16, scale

    out = attention_forward(x, memory, prepared, dim=dim, num_heads=num_heads,
                            parts=parts, instances=instances)
    out = jax.block_until_ready(out)

    ref = attention_reference(x, memory, params, dim=dim, num_heads=num_heads,
                              parts=parts, instances=instances)
    ref = jax.block_until_ready(ref)

    assert out.shape == (B, N, C)
    # bf16 MXU feeds (f32 accumulation) -> slightly looser tolerance than pure f32.
    if not jnp.allclose(out, ref, rtol=2e-2, atol=2e-2):
        max_err = jnp.max(jnp.abs(out - ref))
        raise AssertionError(
            f"Pallas kernel output mismatch vs. reference (max abs err {max_err})")
    print("KERNEL_OK")
</pallas_src>

<mosaic_0001>
module attributes {stable_mosaic.version = 11 : i64} {
  func.func @kernel(%arg0: i32, %arg1: memref<40x256xbf16, #tpu.memory_space<vmem>>, %arg2: memref<256x768xbf16, #tpu.memory_space<vmem>>, %arg3: memref<32x8xf32, #tpu.memory_space<vmem>>, %arg4: memref<256x256xbf16, #tpu.memory_space<vmem>>, %arg5: memref<256x256xbf16, #tpu.memory_space<vmem>>, %arg6: memref<1x256xf32, #tpu.memory_space<vmem>>, %arg7: memref<32x256xf32, #tpu.memory_space<vmem>>) attributes {dimension_semantics = [#tpu.dimension_semantics<arbitrary>], iteration_bounds = array<i64: 1>, scalar_prefetch = 0 : i64, scratch_operands = 0 : i64, tpu.core_type = #tpu.core_type<tc>, window_params = [{pipeline_mode = #tpu.pipeline_mode<synchronous>, transform_indices = @transform_0, window_bounds = array<i64: 40, 256>}, {pipeline_mode = #tpu.pipeline_mode<synchronous>, transform_indices = @transform_1, window_bounds = array<i64: 256, 768>}, {pipeline_mode = #tpu.pipeline_mode<synchronous>, transform_indices = @transform_2, window_bounds = array<i64: 32, 8>}, {pipeline_mode = #tpu.pipeline_mode<synchronous>, transform_indices = @transform_3, window_bounds = array<i64: 256, 256>}, {pipeline_mode = #tpu.pipeline_mode<synchronous>, transform_indices = @transform_4, window_bounds = array<i64: 256, 256>}, {pipeline_mode = #tpu.pipeline_mode<synchronous>, transform_indices = @transform_5, window_bounds = array<i64: 1, 256>}, {pipeline_mode = #tpu.pipeline_mode<synchronous>, transform_indices = @transform_6, window_bounds = array<i64: 32, 256>}]} {
    %c0 = arith.constant 0 : index
    %c0_0 = arith.constant 0 : index
    %0 = vector.load %arg1[%c0, %c0_0] : memref<40x256xbf16, #tpu.memory_space<vmem>>, vector<40x256xbf16>
    %c0_1 = arith.constant 0 : index
    %c0_2 = arith.constant 0 : index
    %1 = vector.load %arg2[%c0_1, %c0_2] : memref<256x768xbf16, #tpu.memory_space<vmem>>, vector<256x768xbf16>
    %cst = arith.constant dense<0.000000e+00> : vector<40x768xf32>
    %2 = tpu.matmul %0, %1, %cst {dimension_numbers = #tpu.dot_dimension_numbers<[1], [0], [0], [1], [0, 0, 1, 1], [], []>} : vector<40x256xbf16>, vector<256x768xbf16>, vector<40x768xf32> -> vector<40x768xf32>
    %3 = vector.extract_strided_slice %2 {offsets = [0, 0], sizes = [32, 256], strides = [1, 1]} : vector<40x768xf32> to vector<32x256xf32>
    %4 = vector.extract_strided_slice %2 {offsets = [32, 256], sizes = [8, 256], strides = [1, 1]} : vector<40x768xf32> to vector<8x256xf32>
    %5 = vector.extract_strided_slice %2 {offsets = [32, 512], sizes = [8, 256], strides = [1, 1]} : vector<40x768xf32> to vector<8x256xf32>
    %c0_3 = arith.constant 0 : index
    %c0_4 = arith.constant 0 : index
    %6 = vector.load %arg3[%c0_3, %c0_4] : memref<32x8xf32, #tpu.memory_space<vmem>>, vector<32x8xf32>
    %7 = vector.extract_strided_slice %3 {offsets = [0, 0], sizes = [32, 32], strides = [1, 1]} : vector<32x256xf32> to vector<32x32xf32>
    %8 = vector.extract_strided_slice %4 {offsets = [0, 0], sizes = [8, 32], strides = [1, 1]} : vector<8x256xf32> to vector<8x32xf32>
    %9 = vector.extract_strided_slice %5 {offsets = [0, 0], sizes = [8, 32], strides = [1, 1]} : vector<8x256xf32> to vector<8x32xf32>
    %cst_5 = arith.constant dense<0.000000e+00> : vector<32x8xf32>
    %10 = tpu.matmul %7, %8, %cst_5 {dimension_numbers = #tpu.dot_dimension_numbers<[1], [1], [0], [0], [0, 0, 1, 0], [], []>} : vector<32x32xf32>, vector<8x32xf32>, vector<32x8xf32> -> vector<32x8xf32>
    %11 = arith.addf %10, %6 : vector<32x8xf32>
    %cst_6 = arith.constant dense<0xFF800000> : vector<32xf32>
    %12 = vector.multi_reduction <maximumf>, %11, %cst_6 [1] : vector<32x8xf32> to vector<32xf32>
    %13 = vector.shape_cast %12 : vector<32xf32> to vector<32x1xf32>
    %14 = vector.broadcast %13 : vector<32x1xf32> to vector<32x8xf32>
    %15 = arith.subf %11, %14 : vector<32x8xf32>
    %16 = math.exp %15 : vector<32x8xf32>
    %cst_7 = arith.constant dense<0.000000e+00> : vector<32xf32>
    %17 = vector.multi_reduction <add>, %16, %cst_7 [1] : vector<32x8xf32> to vector<32xf32>
    %18 = vector.shape_cast %17 : vector<32xf32> to vector<32x1xf32>
    %19 = tpu.reciprocal %18 {approx = true} : vector<32x1xf32> -> vector<32x1xf32>
    %20 = vector.broadcast %19 : vector<32x1xf32> to vector<32x8xf32>
    %21 = arith.mulf %16, %20 : vector<32x8xf32>
    %cst_8 = arith.constant dense<0.000000e+00> : vector<32x32xf32>
    %22 = tpu.matmul %21, %9, %cst_8 {dimension_numbers = #tpu.dot_dimension_numbers<[1], [0], [0], [1], [0, 0, 1, 1], [], []>} : vector<32x8xf32>, vector<8x32xf32>, vector<32x32xf32> -> vector<32x32xf32>
    %23 = vector.extract_strided_slice %3 {offsets = [0, 32], sizes = [32, 32], strides = [1, 1]} : vector<32x256xf32> to vector<32x32xf32>
    %24 = vector.extract_strided_slice %4 {offsets = [0, 32], sizes = [8, 32], strides = [1, 1]} : vector<8x256xf32> to vector<8x32xf32>
    %25 = vector.extract_strided_slice %5 {offsets = [0, 32], sizes = [8, 32], strides = [1, 1]} : vector<8x256xf32> to vector<8x32xf32>
    %cst_9 = arith.constant dense<0.000000e+00> : vector<32x8xf32>
    %26 = tpu.matmul %23, %24, %cst_9 {dimension_numbers = #tpu.dot_dimension_numbers<[1], [1], [0], [0], [0, 0, 1, 0], [], []>} : vector<32x32xf32>, vector<8x32xf32>, vector<32x8xf32> -> vector<32x8xf32>
    %27 = arith.addf %26, %6 : vector<32x8xf32>
    %cst_10 = arith.constant dense<0xFF800000> : vector<32xf32>
    %28 = vector.multi_reduction <maximumf>, %27, %cst_10 [1] : vector<32x8xf32> to vector<32xf32>
    %29 = vector.shape_cast %28 : vector<32xf32> to vector<32x1xf32>
    %30 = vector.broadcast %29 : vector<32x1xf32> to vector<32x8xf32>
    %31 = arith.subf %27, %30 : vector<32x8xf32>
    %32 = math.exp %31 : vector<32x8xf32>
    %cst_11 = arith.constant dense<0.000000e+00> : vector<32xf32>
    %33 = vector.multi_reduction <add>, %32, %cst_11 [1] : vector<32x8xf32> to vector<32xf32>
    %34 = vector.shape_cast %33 : vector<32xf32> to vector<32x1xf32>
    %35 = tpu.reciprocal %34 {approx = true} : vector<32x1xf32> -> vector<32x1xf32>
    %36 = vector.broadcast %35 : vector<32x1xf32> to vector<32x8xf32>
    %37 = arith.mulf %32, %36 : vector<32x8xf32>
    %cst_12 = arith.constant dense<0.000000e+00> : vector<32x32xf32>
    %38 = tpu.matmul %37, %25, %cst_12 {dimension_numbers = #tpu.dot_dimension_numbers<[1], [0], [0], [1], [0, 0, 1, 1], [], []>} : vector<32x8xf32>, vector<8x32xf32>, vector<32x32xf32> -> vector<32x32xf32>
    %39 = vector.extract_strided_slice %3 {offsets = [0, 64], sizes = [32, 32], strides = [1, 1]} : vector<32x256xf32> to vector<32x32xf32>
    %40 = vector.extract_strided_slice %4 {offsets = [0, 64], sizes = [8, 32], strides = [1, 1]} : vector<8x256xf32> to vector<8x32xf32>
    %41 = vector.extract_strided_slice %5 {offsets = [0, 64], sizes = [8, 32], strides = [1, 1]} : vector<8x256xf32> to vector<8x32xf32>
    %cst_13 = arith.constant dense<0.000000e+00> : vector<32x8xf32>
    %42 = tpu.matmul %39, %40, %cst_13 {dimension_numbers = #tpu.dot_dimension_numbers<[1], [1], [0], [0], [0, 0, 1, 0], [], []>} : vector<32x32xf32>, vector<8x32xf32>, vector<32x8xf32> -> vector<32x8xf32>
    %43 = arith.addf %42, %6 : vector<32x8xf32>
    %cst_14 = arith.constant dense<0xFF800000> : vector<32xf32>
    %44 = vector.multi_reduction <maximumf>, %43, %cst_14 [1] : vector<32x8xf32> to vector<32xf32>
    %45 = vector.shape_cast %44 : vector<32xf32> to vector<32x1xf32>
    %46 = vector.broadcast %45 : vector<32x1xf32> to vector<32x8xf32>
    %47 = arith.subf %43, %46 : vector<32x8xf32>
    %48 = math.exp %47 : vector<32x8xf32>
    %cst_15 = arith.constant dense<0.000000e+00> : vector<32xf32>
    %49 = vector.multi_reduction <add>, %48, %cst_15 [1] : vector<32x8xf32> to vector<32xf32>
    %50 = vector.shape_cast %49 : vector<32xf32> to vector<32x1xf32>
    %51 = tpu.reciprocal %50 {approx = true} : vector<32x1xf32> -> vector<32x1xf32>
    %52 = vector.broadcast %51 : vector<32x1xf32> to vector<32x8xf32>
    %53 = arith.mulf %48, %52 : vector<32x8xf32>
    %cst_16 = arith.constant dense<0.000000e+00> : vector<32x32xf32>
    %54 = tpu.matmul %53, %41, %cst_16 {dimension_numbers = #tpu.dot_dimension_numbers<[1], [0], [0], [1], [0, 0, 1, 1], [], []>} : vector<32x8xf32>, vector<8x32xf32>, vector<32x32xf32> -> vector<32x32xf32>
    %55 = vector.extract_strided_slice %3 {offsets = [0, 96], sizes = [32, 32], strides = [1, 1]} : vector<32x256xf32> to vector<32x32xf32>
    %56 = vector.extract_strided_slice %4 {offsets = [0, 96], sizes = [8, 32], strides = [1, 1]} : vector<8x256xf32> to vector<8x32xf32>
    %57 = vector.extract_strided_slice %5 {offsets = [0, 96], sizes = [8, 32], strides = [1, 1]} : vector<8x256xf32> to vector<8x32xf32>
    %cst_17 = arith.constant dense<0.000000e+00> : vector<32x8xf32>
    %58 = tpu.matmul %55, %56, %cst_17 {dimension_numbers = #tpu.dot_dimension_numbers<[1], [1], [0], [0], [0, 0, 1, 0], [], []>} : vector<32x32xf32>, vector<8x32xf32>, vector<32x8xf32> -> vector<32x8xf32>
    %59 = arith.addf %58, %6 : vector<32x8xf32>
    %cst_18 = arith.constant dense<0xFF800000> : vector<32xf32>
    %60 = vector.multi_reduction <maximumf>, %59, %cst_18 [1] : vector<32x8xf32> to vector<32xf32>
    %61 = vector.shape_cast %60 : vector<32xf32> to vector<32x1xf32>
    %62 = vector.broadcast %61 : vector<32x1xf32> to vector<32x8xf32>
    %63 = arith.subf %59, %62 : vector<32x8xf32>
    %64 = math.exp %63 : vector<32x8xf32>
    %cst_19 = arith.constant dense<0.000000e+00> : vector<32xf32>
    %65 = vector.multi_reduction <add>, %64, %cst_19 [1] : vector<32x8xf32> to vector<32xf32>
    %66 = vector.shape_cast %65 : vector<32xf32> to vector<32x1xf32>
    %67 = tpu.reciprocal %66 {approx = true} : vector<32x1xf32> -> vector<32x1xf32>
    %68 = vector.broadcast %67 : vector<32x1xf32> to vector<32x8xf32>
    %69 = arith.mulf %64, %68 : vector<32x8xf32>
    %cst_20 = arith.constant dense<0.000000e+00> : vector<32x32xf32>
    %70 = tpu.matmul %69, %57, %cst_20 {dimension_numbers = #tpu.dot_dimension_numbers<[1], [0], [0], [1], [0, 0, 1, 1], [], []>} : vector<32x8xf32>, vector<8x32xf32>, vector<32x32xf32> -> vector<32x32xf32>
    %71 = vector.extract_strided_slice %3 {offsets = [0, 128], sizes = [32, 32], strides = [1, 1]} : vector<32x256xf32> to vector<32x32xf32>
    %72 = vector.extract_strided_slice %4 {offsets = [0, 128], sizes = [8, 32], strides = [1, 1]} : vector<8x256xf32> to vector<8x32xf32>
    %73 = vector.extract_strided_slice %5 {offsets = [0, 128], sizes = [8, 32], strides = [1, 1]} : vector<8x256xf32> to vector<8x32xf32>
    %cst_21 = arith.constant dense<0.000000e+00> : vector<32x8xf32>
    %74 = tpu.matmul %71, %72, %cst_21 {dimension_numbers = #tpu.dot_dimension_numbers<[1], [1], [0], [0], [0, 0, 1, 0], [], []>} : vector<32x32xf32>, vector<8x32xf32>, vector<32x8xf32> -> vector<32x8xf32>
    %75 = arith.addf %74, %6 : vector<32x8xf32>
    %cst_22 = arith.constant dense<0xFF800000> : vector<32xf32>
    %76 = vector.multi_reduction <maximumf>, %75, %cst_22 [1] : vector<32x8xf32> to vector<32xf32>
    %77 = vector.shape_cast %76 : vector<32xf32> to vector<32x1xf32>
    %78 = vector.broadcast %77 : vector<32x1xf32> to vector<32x8xf32>
    %79 = arith.subf %75, %78 : vector<32x8xf32>
    %80 = math.exp %79 : vector<32x8xf32>
    %cst_23 = arith.constant dense<0.000000e+00> : vector<32xf32>
    %81 = vector.multi_reduction <add>, %80, %cst_23 [1] : vector<32x8xf32> to vector<32xf32>
    %82 = vector.shape_cast %81 : vector<32xf32> to vector<32x1xf32>
    %83 = tpu.reciprocal %82 {approx = true} : vector<32x1xf32> -> vector<32x1xf32>
    %84 = vector.broadcast %83 : vector<32x1xf32> to vector<32x8xf32>
    %85 = arith.mulf %80, %84 : vector<32x8xf32>
    %cst_24 = arith.constant dense<0.000000e+00> : vector<32x32xf32>
    %86 = tpu.matmul %85, %73, %cst_24 {dimension_numbers = #tpu.dot_dimension_numbers<[1], [0], [0], [1], [0, 0, 1, 1], [], []>} : vector<32x8xf32>, vector<8x32xf32>, vector<32x32xf32> -> vector<32x32xf32>
    %87 = vector.extract_strided_slice %3 {offsets = [0, 160], sizes = [32, 32], strides = [1, 1]} : vector<32x256xf32> to vector<32x32xf32>
    %88 = vector.extract_strided_slice %4 {offsets = [0, 160], sizes = [8, 32], strides = [1, 1]} : vector<8x256xf32> to vector<8x32xf32>
    %89 = vector.extract_strided_slice %5 {offsets = [0, 160], sizes = [8, 32], strides = [1, 1]} : vector<8x256xf32> to vector<8x32xf32>
    %cst_25 = arith.constant dense<0.000000e+00> : vector<32x8xf32>
    %90 = tpu.matmul %87, %88, %cst_25 {dimension_numbers = #tpu.dot_dimension_numbers<[1], [1], [0], [0], [0, 0, 1, 0], [], []>} : vector<32x32xf32>, vector<8x32xf32>, vector<32x8xf32> -> vector<32x8xf32>
    %91 = arith.addf %90, %6 : vector<32x8xf32>
    %cst_26 = arith.constant dense<0xFF800000> : vector<32xf32>
    %92 = vector.multi_reduction <maximumf>, %91, %cst_26 [1] : vector<32x8xf32> to vector<32xf32>
    %93 = vector.shape_cast %92 : vector<32xf32> to vector<32x1xf32>
    %94 = vector.broadcast %93 : vector<32x1xf32> to vector<32x8xf32>
    %95 = arith.subf %91, %94 : vector<32x8xf32>
    %96 = math.exp %95 : vector<32x8xf32>
    %cst_27 = arith.constant dense<0.000000e+00> : vector<32xf32>
    %97 = vector.multi_reduction <add>, %96, %cst_27 [1] : vector<32x8xf32> to vector<32xf32>
    %98 = vector.shape_cast %97 : vector<32xf32> to vector<32x1xf32>
    %99 = tpu.reciprocal %98 {approx = true} : vector<32x1xf32> -> vector<32x1xf32>
    %100 = vector.broadcast %99 : vector<32x1xf32> to vector<32x8xf32>
    %101 = arith.mulf %96, %100 : vector<32x8xf32>
    %cst_28 = arith.constant dense<0.000000e+00> : vector<32x32xf32>
    %102 = tpu.matmul %101, %89, %cst_28 {dimension_numbers = #tpu.dot_dimension_numbers<[1], [0], [0], [1], [0, 0, 1, 1], [], []>} : vector<32x8xf32>, vector<8x32xf32>, vector<32x32xf32> -> vector<32x32xf32>
    %103 = vector.extract_strided_slice %3 {offsets = [0, 192], sizes = [32, 32], strides = [1, 1]} : vector<32x256xf32> to vector<32x32xf32>
    %104 = vector.extract_strided_slice %4 {offsets = [0, 192], sizes = [8, 32], strides = [1, 1]} : vector<8x256xf32> to vector<8x32xf32>
    %105 = vector.extract_strided_slice %5 {offsets = [0, 192], sizes = [8, 32], strides = [1, 1]} : vector<8x256xf32> to vector<8x32xf32>
    %cst_29 = arith.constant dense<0.000000e+00> : vector<32x8xf32>
    %106 = tpu.matmul %103, %104, %cst_29 {dimension_numbers = #tpu.dot_dimension_numbers<[1], [1], [0], [0], [0, 0, 1, 0], [], []>} : vector<32x32xf32>, vector<8x32xf32>, vector<32x8xf32> -> vector<32x8xf32>
    %107 = arith.addf %106, %6 : vector<32x8xf32>
    %cst_30 = arith.constant dense<0xFF800000> : vector<32xf32>
    %108 = vector.multi_reduction <maximumf>, %107, %cst_30 [1] : vector<32x8xf32> to vector<32xf32>
    %109 = vector.shape_cast %108 : vector<32xf32> to vector<32x1xf32>
    %110 = vector.broadcast %109 : vector<32x1xf32> to vector<32x8xf32>
    %111 = arith.subf %107, %110 : vector<32x8xf32>
    %112 = math.exp %111 : vector<32x8xf32>
    %cst_31 = arith.constant dense<0.000000e+00> : vector<32xf32>
    %113 = vector.multi_reduction <add>, %112, %cst_31 [1] : vector<32x8xf32> to vector<32xf32>
    %114 = vector.shape_cast %113 : vector<32xf32> to vector<32x1xf32>
    %115 = tpu.reciprocal %114 {approx = true} : vector<32x1xf32> -> vector<32x1xf32>
    %116 = vector.broadcast %115 : vector<32x1xf32> to vector<32x8xf32>
    %117 = arith.mulf %112, %116 : vector<32x8xf32>
    %cst_32 = arith.constant dense<0.000000e+00> : vector<32x32xf32>
    %118 = tpu.matmul %117, %105, %cst_32 {dimension_numbers = #tpu.dot_dimension_numbers<[1], [0], [0], [1], [0, 0, 1, 1], [], []>} : vector<32x8xf32>, vector<8x32xf32>, vector<32x32xf32> -> vector<32x32xf32>
    %119 = vector.extract_strided_slice %3 {offsets = [0, 224], sizes = [32, 32], strides = [1, 1]} : vector<32x256xf32> to vector<32x32xf32>
    %120 = vector.extract_strided_slice %4 {offsets = [0, 224], sizes = [8, 32], strides = [1, 1]} : vector<8x256xf32> to vector<8x32xf32>
    %121 = vector.extract_strided_slice %5 {offsets = [0, 224], sizes = [8, 32], strides = [1, 1]} : vector<8x256xf32> to vector<8x32xf32>
    %cst_33 = arith.constant dense<0.000000e+00> : vector<32x8xf32>
    %122 = tpu.matmul %119, %120, %cst_33 {dimension_numbers = #tpu.dot_dimension_numbers<[1], [1], [0], [0], [0, 0, 1, 0], [], []>} : vector<32x32xf32>, vector<8x32xf32>, vector<32x8xf32> -> vector<32x8xf32>
    %123 = arith.addf %122, %6 : vector<32x8xf32>
    %cst_34 = arith.constant dense<0xFF800000> : vector<32xf32>
    %124 = vector.multi_reduction <maximumf>, %123, %cst_34 [1] : vector<32x8xf32> to vector<32xf32>
    %125 = vector.shape_cast %124 : vector<32xf32> to vector<32x1xf32>
    %126 = vector.broadcast %125 : vector<32x1xf32> to vector<32x8xf32>
    %127 = arith.subf %123, %126 : vector<32x8xf32>
    %128 = math.exp %127 : vector<32x8xf32>
    %cst_35 = arith.constant dense<0.000000e+00> : vector<32xf32>
    %129 = vector.multi_reduction <add>, %128, %cst_35 [1] : vector<32x8xf32> to vector<32xf32>
    %130 = vector.shape_cast %129 : vector<32xf32> to vector<32x1xf32>
    %131 = tpu.reciprocal %130 {approx = true} : vector<32x1xf32> -> vector<32x1xf32>
    %132 = vector.broadcast %131 : vector<32x1xf32> to vector<32x8xf32>
    %133 = arith.mulf %128, %132 : vector<32x8xf32>
    %cst_36 = arith.constant dense<0.000000e+00> : vector<32x32xf32>
    %134 = tpu.matmul %133, %121, %cst_36 {dimension_numbers = #tpu.dot_dimension_numbers<[1], [0], [0], [1], [0, 0, 1, 1], [], []>} : vector<32x8xf32>, vector<8x32xf32>, vector<32x32xf32> -> vector<32x32xf32>
    %135 = tpu.concatenate %22, %38, %54, %70, %86, %102, %118, %134 in 0 : vector<32x32xf32>, vector<32x32xf32>, vector<32x32xf32>, vector<32x32xf32>, vector<32x32xf32>, vector<32x32xf32>, vector<32x32xf32>, vector<32x32xf32> -> vector<256x32xf32>
    %136 = arith.truncf %135 : vector<256x32xf32> to vector<256x32xbf16>
    %c0_37 = arith.constant 0 : index
    %c0_38 = arith.constant 0 : index
    %137 = vector.load %arg4[%c0_37, %c0_38] : memref<256x256xbf16, #tpu.memory_space<vmem>>, vector<256x256xbf16>
    %cst_39 = arith.constant dense<0.000000e+00> : vector<256x32xf32>
    %138 = tpu.matmul %137, %136, %cst_39 {dimension_numbers = #tpu.dot_dimension_numbers<[1], [0], [0], [1], [0, 0, 1, 1], [], []>} : vector<256x256xbf16>, vector<256x32xbf16>, vector<256x32xf32> -> vector<256x32xf32>
    %139 = arith.truncf %138 : vector<256x32xf32> to vector<256x32xbf16>
    %c0_40 = arith.constant 0 : index
    %c0_41 = arith.constant 0 : index
    %140 = vector.load %arg5[%c0_40, %c0_41] : memref<256x256xbf16, #tpu.memory_space<vmem>>, vector<256x256xbf16>
    %cst_42 = arith.constant 0.000000e+00 : f32
    %141 = vector.broadcast %cst_42 : f32 to vector<32x256xf32>
    %142 = vector.extract_strided_slice %139 {offsets = [0, 0], sizes = [32, 32], strides = [1, 1]} : vector<256x32xbf16> to vector<32x32xbf16>
    %143 = vector.extract_strided_slice %140 {offsets = [0, 0], sizes = [32, 256], strides = [1, 1]} : vector<256x256xbf16> to vector<32x256xbf16>
    %cst_43 = arith.constant dense<0.000000e+00> : vector<32x256xf32>
    %144 = tpu.matmul %142, %143, %cst_43 {dimension_numbers = #tpu.dot_dimension_numbers<[1], [0], [0], [1], [0, 0, 1, 1], [], []>} : vector<32x32xbf16>, vector<32x256xbf16>, vector<32x256xf32> -> vector<32x256xf32>
    %145 = arith.addf %141, %144 : vector<32x256xf32>
    %146 = vector.extract_strided_slice %139 {offsets = [32, 0], sizes = [32, 32], strides = [1, 1]} : vector<256x32xbf16> to vector<32x32xbf16>
    %147 = vector.extract_strided_slice %140 {offsets = [32, 0], sizes = [32, 256], strides = [1, 1]} : vector<256x256xbf16> to vector<32x256xbf16>
    %cst_44 = arith.constant dense<0.000000e+00> : vector<32x256xf32>
    %148 = tpu.matmul %146, %147, %cst_44 {dimension_numbers = #tpu.dot_dimension_numbers<[1], [0], [0], [1], [0, 0, 1, 1], [], []>} : vector<32x32xbf16>, vector<32x256xbf16>, vector<32x256xf32> -> vector<32x256xf32>
    %149 = arith.addf %145, %148 : vector<32x256xf32>
    %150 = vector.extract_strided_slice %139 {offsets = [64, 0], sizes = [32, 32], strides = [1, 1]} : vector<256x32xbf16> to vector<32x32xbf16>
    %151 = vector.extract_strided_slice %140 {offsets = [64, 0], sizes = [32, 256], strides = [1, 1]} : vector<256x256xbf16> to vector<32x256xbf16>
    %cst_45 = arith.constant dense<0.000000e+00> : vector<32x256xf32>
    %152 = tpu.matmul %150, %151, %cst_45 {dimension_numbers = #tpu.dot_dimension_numbers<[1], [0], [0], [1], [0, 0, 1, 1], [], []>} : vector<32x32xbf16>, vector<32x256xbf16>, vector<32x256xf32> -> vector<32x256xf32>
    %153 = arith.addf %149, %152 : vector<32x256xf32>
    %154 = vector.extract_strided_slice %139 {offsets = [96, 0], sizes = [32, 32], strides = [1, 1]} : vector<256x32xbf16> to vector<32x32xbf16>
    %155 = vector.extract_strided_slice %140 {offsets = [96, 0], sizes = [32, 256], strides = [1, 1]} : vector<256x256xbf16> to vector<32x256xbf16>
    %cst_46 = arith.constant dense<0.000000e+00> : vector<32x256xf32>
    %156 = tpu.matmul %154, %155, %cst_46 {dimension_numbers = #tpu.dot_dimension_numbers<[1], [0], [0], [1], [0, 0, 1, 1], [], []>} : vector<32x32xbf16>, vector<32x256xbf16>, vector<32x256xf32> -> vector<32x256xf32>
    %157 = arith.addf %153, %156 : vector<32x256xf32>
    %158 = vector.extract_strided_slice %139 {offsets = [128, 0], sizes = [32, 32], strides = [1, 1]} : vector<256x32xbf16> to vector<32x32xbf16>
    %159 = vector.extract_strided_slice %140 {offsets = [128, 0], sizes = [32, 256], strides = [1, 1]} : vector<256x256xbf16> to vector<32x256xbf16>
    %cst_47 = arith.constant dense<0.000000e+00> : vector<32x256xf32>
    %160 = tpu.matmul %158, %159, %cst_47 {dimension_numbers = #tpu.dot_dimension_numbers<[1], [0], [0], [1], [0, 0, 1, 1], [], []>} : vector<32x32xbf16>, vector<32x256xbf16>, vector<32x256xf32> -> vector<32x256xf32>
    %161 = arith.addf %157, %160 : vector<32x256xf32>
    %162 = vector.extract_strided_slice %139 {offsets = [160, 0], sizes = [32, 32], strides = [1, 1]} : vector<256x32xbf16> to vector<32x32xbf16>
    %163 = vector.extract_strided_slice %140 {offsets = [160, 0], sizes = [32, 256], strides = [1, 1]} : vector<256x256xbf16> to vector<32x256xbf16>
    %cst_48 = arith.constant dense<0.000000e+00> : vector<32x256xf32>
    %164 = tpu.matmul %162, %163, %cst_48 {dimension_numbers = #tpu.dot_dimension_numbers<[1], [0], [0], [1], [0, 0, 1, 1], [], []>} : vector<32x32xbf16>, vector<32x256xbf16>, vector<32x256xf32> -> vector<32x256xf32>
    %165 = arith.addf %161, %164 : vector<32x256xf32>
    %166 = vector.extract_strided_slice %139 {offsets = [192, 0], sizes = [32, 32], strides = [1, 1]} : vector<256x32xbf16> to vector<32x32xbf16>
    %167 = vector.extract_strided_slice %140 {offsets = [192, 0], sizes = [32, 256], strides = [1, 1]} : vector<256x256xbf16> to vector<32x256xbf16>
    %cst_49 = arith.constant dense<0.000000e+00> : vector<32x256xf32>
    %168 = tpu.matmul %166, %167, %cst_49 {dimension_numbers = #tpu.dot_dimension_numbers<[1], [0], [0], [1], [0, 0, 1, 1], [], []>} : vector<32x32xbf16>, vector<32x256xbf16>, vector<32x256xf32> -> vector<32x256xf32>
    %169 = arith.addf %165, %168 : vector<32x256xf32>
    %170 = vector.extract_strided_slice %139 {offsets = [224, 0], sizes = [32, 32], strides = [1, 1]} : vector<256x32xbf16> to vector<32x32xbf16>
    %171 = vector.extract_strided_slice %140 {offsets = [224, 0], sizes = [32, 256], strides = [1, 1]} : vector<256x256xbf16> to vector<32x256xbf16>
    %cst_50 = arith.constant dense<0.000000e+00> : vector<32x256xf32>
    %172 = tpu.matmul %170, %171, %cst_50 {dimension_numbers = #tpu.dot_dimension_numbers<[1], [0], [0], [1], [0, 0, 1, 1], [], []>} : vector<32x32xbf16>, vector<32x256xbf16>, vector<32x256xf32> -> vector<32x256xf32>
    %173 = arith.addf %169, %172 : vector<32x256xf32>
    %c0_51 = arith.constant 0 : index
    %c0_52 = arith.constant 0 : index
    %174 = vector.load %arg6[%c0_51, %c0_52] : memref<1x256xf32, #tpu.memory_space<vmem>>, vector<1x256xf32>
    %175 = vector.broadcast %174 : vector<1x256xf32> to vector<32x256xf32>
    %176 = arith.addf %173, %175 : vector<32x256xf32>
    %c0_53 = arith.constant 0 : index
    %c0_54 = arith.constant 0 : index
    %177 = vector.load %arg7[%c0_53, %c0_54] : memref<32x256xf32, #tpu.memory_space<vmem>>, vector<32x256xf32>
    tpu.vector_store %arg7[%c0_53, %c0_54], %176 {strides = array<i32>} : memref<32x256xf32, #tpu.memory_space<vmem>>, vector<32x256xf32>,
    return
  }
  func.func @transform_0(%arg0: i32) -> (i32, i32) {
    %c0_i32 = arith.constant 0 : i32
    %c0_i32_0 = arith.constant 0 : i32
    %c0_i32_1 = arith.constant 0 : i32
    return %c0_i32, %c0_i32_0 : i32, i32
  }
  func.func @transform_1(%arg0: i32) -> (i32, i32) {
    %c0_i32 = arith.constant 0 : i32
    %c0_i32_0 = arith.constant 0 : i32
    %c0_i32_1 = arith.constant 0 : i32
    return %c0_i32, %c0_i32_0 : i32, i32
  }
  func.func @transform_2(%arg0: i32) -> (i32, i32) {
    %c0_i32 = arith.constant 0 : i32
    %c0_i32_0 = arith.constant 0 : i32
    %c0_i32_1 = arith.constant 0 : i32
    return %c0_i32, %c0_i32_0 : i32, i32
  }
  func.func @transform_3(%arg0: i32) -> (i32, i32) {
    %c0_i32 = arith.constant 0 : i32
    %c0_i32_0 = arith.constant 0 : i32
    %c0_i32_1 = arith.constant 0 : i32
    return %c0_i32, %c0_i32_0 : i32, i32
  }
  func.func @transform_4(%arg0: i32) -> (i32, i32) {
    %c0_i32 = arith.constant 0 : i32
    %c0_i32_0 = arith.constant 0 : i32
    %c0_i32_1 = arith.constant 0 : i32
    return %c0_i32, %c0_i32_0 : i32, i32
  }
  func.func @transform_5(%arg0: i32) -> (i32, i32) {
    %c0_i32 = arith.constant 0 : i32
    %c0_i32_0 = arith.constant 0 : i32
    %c0_i32_1 = arith.constant 0 : i32
    return %c0_i32, %c0_i32_0 : i32, i32
  }
  func.func @transform_6(%arg0: i32) -> (i32, i32) {
    %c0_i32 = arith.constant 0 : i32
    %c0_i32_0 = arith.constant 0 : i32
    %c0_i32_1 = arith.constant 0 : i32
    return %c0_i32, %c0_i32_0 : i32, i32
  }
}

</mosaic_0001>

<bundles_post_ra>
// kernel: attention_forward.1
= control target key start
LH: loop header
LB: loop body
LE: loop exit
PB: predicated region body
PF: predicated region fallthrough
CT: control target
= control target key end

     0   :  { %11 = vsyncpa [#allocation3], 0  ;;  %s5067_s0 = inlined_call_operand.vmem [shape: bf16[40,256], index: 0, kind: input, shape index: {}]   ;;  %s5068_s1 = inlined_call_operand.hbm [shape: bf16[256,768], index: 1, kind: input, shape index: {}]   ;;  %s5069_s2 = inlined_call_operand.vmem [shape: f32[32,8], index: 2, kind: input, shape index: {}]   ;;  %s5070_s3 = inlined_call_operand.hbm [shape: bf16[256,256], index: 3, kind: input, shape index: {}]   ;;  %s5071_s4 = inlined_call_operand.hbm [shape: bf16[256,256], index: 4, kind: input, shape index: {}]   ;;  %s5072_s5 = inlined_call_operand.vmem [shape: f32[1,256], index: 5, kind: input, shape index: {}]   ;;  %s5073_s6 = inlined_call_operand.hbm [shape: f32[32,256], index: 6, kind: output, shape index: {}]  }
   0x1   :  { %12 = vsyncpa [#allocation6], 0  ;;  %s35_s23 = sshll.u32 %s5070_s3, 4  ;;  %s36_s23 = int_to_ptr.hbm [resolvable:$true] %s35_s23 }
   0x2   :  { %13 = vsyncpa [#allocation4], 0  ;;  %s4307_s24 = smov [#allocation5]   ;;  %s20_s28 = sshll.u32 %s5068_s1, 4  ;;  %s21_s28 = int_to_ptr.hbm [resolvable:$true] %s20_s28 }
   0x3   :  { %s37_s25 = sshll.u32 %s4307_s24, 4  ;;  %s4308_s29 = smov 128   ;;  %s38_s25 = int_to_ptr.vmem [resolvable:$true] %s37_s25 }
   0x4   :  { %s4309_s30 = smov 8   ;;  %s4310_s7 = smov [#allocation2]  }
   0x5   :  { %43 = dma.hbm_to_vmem [thread:$0]  %s36_s23, 4096, %s38_s25, [#allocation6], %s4308_s29, %s4308_s29, %s4309_s30  }
   0x6   :  { %s22_s8 = sshll.u32 %s4310_s7, 4  ;;  %s4311_s9 = smov 384   ;;  %s23_s8 = int_to_ptr.vmem [resolvable:$true] %s22_s8 }
   0x7   :  { %s4312_s10 = smov 24   ;;  %s48_s12 = sshll.u32 %s5071_s4, 4  ;;  %s49_s12 = int_to_ptr.hbm [resolvable:$true] %s48_s12 }
   0x8   :  { %28 = dma.hbm_to_vmem [thread:$0]  %s21_s28, 12288, %s23_s8, [#allocation3], %s4311_s9, %s4311_s9, %s4312_s10  }
   0x9   :  { %s4313_s13 = smov [#allocation7]  }
   0xa   :  { %s50_s14 = sshll.u32 %s4313_s13, 4  ;;  %s51_s14 = int_to_ptr.vmem [resolvable:$true] %s50_s14 }
   0xb   :  { %56 = dma.hbm_to_vmem [thread:$0]  %s49_s12, 4096, %s51_s14, [#allocation6], %s4308_s29, %s4308_s29, %s4309_s30  }
   0xc   :  { %4301 = dma.done.wait [#allocation3], 12288  }
   0xd   :  { %4302 = vsyncadd [#allocation3], 4294955008 }
   0xe   :  { %4303 = dma.done.wait [#allocation6], 8192  }
   0xf   :  { %4304 = vsyncadd [#allocation6], 4294959104  ;;  %v3326_v0 = vld [vmem:[#allocation2 + $0x150] sm:$0xf]  ;;  %v3949_v1 = vld [vmem:[#allocation2 + $0x164] sm:$0xf0] }
  0x10   :  { %v3518_v2 = vld [vmem:[#allocation2 + $0x2d0] sm:$0xf]  ;;  %v3327_v3 = vor.u32 %v3949_v1, %v3326_v0  ;;  %v3997_v4 = vld [vmem:[#allocation2 + $0x2e4] sm:$0xf0]  ;;  %v3302_v5 = vld [vmem:[#allocation2 + $0x120] sm:$0xf] }
  0x11   :  { %v3943_v6 = vld [vmem:[#allocation2 + $0x134] sm:$0xf0]  ;;  %v3519_v7 = vor.u32 %v3997_v4, %v3518_v2  ;;  %v3494_v8 = vld [vmem:[#allocation2 + $0x2a0] sm:$0xf]  ;;  %v3278_v12 = vld [vmem:[#allocation2 + $0xf0] sm:$0xf] }
  0x12   :  { %v3991_v9 = vld [vmem:[#allocation2 + $0x2b4] sm:$0xf0]  ;;  %680 = vmatpush.bf16.msra.mxu0 %v3327_v3  ;;  %v3303_v10 = vor.u32 %v3943_v6, %v3302_v5  ;;  %v3937_v13 = vld [vmem:[#allocation2 + $0x104] sm:$0xf0]  ;;  %v3470_v14 = vld [vmem:[#allocation2 + $0x270] sm:$0xf] }
  0x13   :  { %702 = vmatpush.bf16.msra.mxu1 %v3519_v7  ;;  %v3495_v11 = vor.u32 %v3991_v9, %v3494_v8  ;;  %v3985_v15 = vld [vmem:[#allocation2 + $0x284] sm:$0xf0]  ;;  %v3279_v16 = vor.u32 %v3937_v13, %v3278_v12  ;;  %v3254_v18 = vld [vmem:[#allocation2 + $0xc0] sm:$0xf]  ;;  %v3931_v19 = vld [vmem:[#allocation2 + $0xd4] sm:$0xf0] }
  0x14   :  { %v3471_v17 = vor.u32 %v3985_v15, %v3470_v14  ;;  %v3446_v20 = vld [vmem:[#allocation2 + $0x240] sm:$0xf]  ;;  %v3979_v21 = vld [vmem:[#allocation2 + $0x254] sm:$0xf0]  ;;  %v3255_v22 = vor.u32 %v3931_v19, %v3254_v18  ;;  %v3230_v24 = vld [vmem:[#allocation2 + $0x90] sm:$0xf] }
  0x15   :  { %v3447_v23 = vor.u32 %v3979_v21, %v3446_v20  ;;  %v3925_v25 = vld [vmem:[#allocation2 + $0xa4] sm:$0xf0]  ;;  %v3422_v26 = vld [vmem:[#allocation2 + $0x210] sm:$0xf]  ;;  %v3206_v30 = vld [vmem:[#allocation2 + $0x60] sm:$0xf] }
  0x16   :  { %681 = vmatpush.bf16.msra.mxu0 %v3303_v10  ;;  %v3973_v27 = vld [vmem:[#allocation2 + $0x224] sm:$0xf0]  ;;  %v3231_v28 = vor.u32 %v3925_v25, %v3230_v24  ;;  %v3919_v31 = vld [vmem:[#allocation2 + $0x74] sm:$0xf0]  ;;  %v3398_v32 = vld [vmem:[#allocation2 + $0x1e0] sm:$0xf] }
  0x17   :  { %703 = vmatpush.bf16.msra.mxu1 %v3495_v11  ;;  %v3423_v29 = vor.u32 %v3973_v27, %v3422_v26  ;;  %v3967_v33 = vld [vmem:[#allocation2 + $0x1f4] sm:$0xf0]  ;;  %v3207_v34 = vor.u32 %v3919_v31, %v3206_v30  ;;  %v3182_v36 = vld [vmem:[#allocation2 + $0x30] sm:$0xf]  ;;  %v3913_v37 = vld [vmem:[#allocation2 + $0x44] sm:$0xf0] }
  0x18   :  { %v3399_v35 = vor.u32 %v3967_v33, %v3398_v32  ;;  %v3374_v38 = vld [vmem:[#allocation2 + $0x1b0] sm:$0xf]  ;;  %v3961_v39 = vld [vmem:[#allocation2 + $0x1c4] sm:$0xf0]  ;;  %v3946_v40 = vld [vmem:[#allocation2 + $0x154] sm:$0xf]  ;;  %v3183_v45 = vor.u32 %v3913_v37, %v3182_v36 }
  0x19   :  { %v3158_v41 = vld [vmem:[#allocation2] sm:$0xf]  ;;  %v3328_v42 = vld [vmem:[#allocation2 + $0x168] sm:$0xf0]  ;;  %v3994_v43 = vld [vmem:[#allocation2 + $0x2d4] sm:$0xf]  ;;  %v3375_v51 = vor.u32 %v3961_v39, %v3374_v38 }
  0x1a   :  { %682 = vmatpush.bf16.msra.mxu0 %v3279_v16  ;;  %v3520_v44 = vld [vmem:[#allocation2 + $0x2e8] sm:$0xf0]  ;;  %v3907_v46 = vld [vmem:[#allocation2 + $0x14] sm:$0xf0]  ;;  %v3350_v47 = vld [vmem:[#allocation2 + $0x180] sm:$0xf]  ;;  %v3331_v49 = vor.u32 %v3946_v40, %v3328_v42 }
  0x1b   :  { %704 = vmatpush.bf16.msra.mxu1 %v3471_v17  ;;  %v3955_v48 = vld [vmem:[#allocation2 + $0x194] sm:$0xf0]  ;;  %v3523_v50 = vor.u32 %v3994_v43, %v3520_v44  ;;  %v3940_v53 = vld [vmem:[#allocation2 + $0x124] sm:$0xf]  ;;  %v3304_v54 = vld [vmem:[#allocation2 + $0x138] sm:$0xf0]  ;;  %v3159_v62 = vor.u32 %v3907_v46, %v3158_v41 }
  0x1c   :  { %v3334_v52 = vld [vmem:[#allocation2 + $0x158] sm:$0xf]  ;;  %v3950_v55 = vld [vmem:[#allocation2 + $0x16c] sm:$0xf0]  ;;  %724 = vmatpush.bf16.msra.mxu2 %v3331_v49  ;;  %v3307_v56 = vor.u32 %v3940_v53, %v3304_v54  ;;  %v3988_v57 = vld [vmem:[#allocation2 + $0x2a4] sm:$0xf]  ;;  %v3351_v2 = vor.u32 %v3955_v48, %v3350_v47 }
  0x1d   :  { %746 = vmatpush.bf16.msra.mxu3 %v3523_v50  ;;  %v3496_v58 = vld [vmem:[#allocation2 + $0x2b8] sm:$0xf0]  ;;  %v3526_v59 = vld [vmem:[#allocation2 + $0x2d8] sm:$0xf]  ;;  %v3998_v60 = vld [vmem:[#allocation2 + $0x2ec] sm:$0xf0]  ;;  %v3335_v4 = vor.u32 %v3950_v55, %v3334_v52 }
  0x1e   :  { %683 = vmatpush.bf16.msra.mxu0 %v3255_v22  ;;  %v3499_v61 = vor.u32 %v3988_v57, %v3496_v58  ;;  %v3142_v63 = vld [vmem:[%s5067_s0] sm:$0xf]  ;;  %v3901_v0 = vld [vmem:[%s5067_s0 + $0x4] sm:$0xf0]  ;;  %v3900_v1 = vld [vmem:[%s5067_s0 + $0x4] sm:$0xf]  ;;  %v3527_v7 = vor.u32 %v3998_v60, %v3526_v59 }
  0x1f   :  { %705 = vmatpush.bf16.msra.mxu1 %v3447_v23  ;;  %v3144_v3 = vld [vmem:[%s5067_s0 + $0x8] sm:$0xf0]  ;;  %v3310_v5 = vld [vmem:[#allocation2 + $0x128] sm:$0xf]  ;;  %v3944_v6 = vld [vmem:[#allocation2 + $0x13c] sm:$0xf0]  ;;  %v4376_v11 = vor.u32 %v3901_v0, %v3142_v63 }
  0x20   :  { %725 = vmatpush.bf16.msra.mxu2 %v3307_v56  ;;  %v3934_v8 = vld [vmem:[#allocation2 + $0xf4] sm:$0xf]  ;;  %v3280_v9 = vld [vmem:[#allocation2 + $0x108] sm:$0xf0]  ;;  %v3502_v12 = vld [vmem:[#allocation2 + $0x2a8] sm:$0xf]  ;;  %v4378_v16 = vor.u32 %v3900_v1, %v3144_v3  ;;  %v3311_v18 = vor.u32 %v3944_v6, %v3310_v5 }
  0x21   :  { %747 = vmatpush.bf16.msra.mxu3 %v3499_v61  ;;  %v3982_v10 = vld [vmem:[#allocation2 + $0x274] sm:$0xf]  ;;  %v3992_v13 = vld [vmem:[#allocation2 + $0x2bc] sm:$0xf0]  ;;  %v3283_v14 = vor.u32 %v3934_v8, %v3280_v9  ;;  %v3472_v15 = vld [vmem:[#allocation2 + $0x288] sm:$0xf0] }
  0x22   :  { %684 = vmatpush.bf16.msra.mxu0 %v3231_v28  ;;  %v3475_v17 = vor.u32 %v3982_v10, %v3472_v15  ;;  %v3503_v19 = vor.u32 %v3992_v13, %v3502_v12  ;;  %v3286_v20 = vld [vmem:[#allocation2 + $0xf8] sm:$0xf]  ;;  %v3938_v21 = vld [vmem:[#allocation2 + $0x10c] sm:$0xf0]  ;;  %v3928_v24 = vld [vmem:[#allocation2 + $0xc4] sm:$0xf] }
  0x23   :  { %706 = vmatpush.bf16.msra.mxu1 %v3423_v29  ;;  %v3478_v22 = vld [vmem:[#allocation2 + $0x278] sm:$0xf]  ;;  %v3986_v23 = vld [vmem:[#allocation2 + $0x28c] sm:$0xf0]  ;;  %v3256_v25 = vld [vmem:[#allocation2 + $0xd8] sm:$0xf0]  ;;  %v3287_v27 = vor.u32 %v3938_v21, %v3286_v20 }
  0x24   :  { %726 = vmatpush.bf16.msra.mxu2 %v3283_v14  ;;  %v3259_v26 = vor.u32 %v3928_v24, %v3256_v25  ;;  %v3976_v28 = vld [vmem:[#allocation2 + $0x244] sm:$0xf]  ;;  %v3448_v29 = vld [vmem:[#allocation2 + $0x258] sm:$0xf0]  ;;  %v3479_v30 = vor.u32 %v3986_v23, %v3478_v22  ;;  %v3262_v31 = vld [vmem:[#allocation2 + $0xc8] sm:$0xf] }
  0x25   :  { %748 = vmatpush.bf16.msra.mxu3 %v3475_v17  ;;  %v3932_v32 = vld [vmem:[#allocation2 + $0xdc] sm:$0xf0]  ;;  %v3454_v33 = vld [vmem:[#allocation2 + $0x248] sm:$0xf]  ;;  %v3922_v36 = vld [vmem:[#allocation2 + $0x94] sm:$0xf] }
  0x26   :  { %685 = vmatpush.bf16.msra.mxu0 %v3207_v34  ;;  %v3451_v34 = vor.u32 %v3976_v28, %v3448_v29  ;;  %v3232_v37 = vld [vmem:[#allocation2 + $0xa8] sm:$0xf0]  ;;  %v3970_v39 = vld [vmem:[#allocation2 + $0x214] sm:$0xf]  ;;  %v3263_v41 = vor.u32 %v3932_v32, %v3262_v31  ;;  %v3238_v42 = vld [vmem:[#allocation2 + $0x98] sm:$0xf] }
  0x27   :  { %707 = vmatpush.bf16.msra.mxu1 %v3399_v35  ;;  %v3980_v35 = vld [vmem:[#allocation2 + $0x25c] sm:$0xf0]  ;;  %v3235_v38 = vor.u32 %v3922_v36, %v3232_v37  ;;  %v3424_v40 = vld [vmem:[#allocation2 + $0x228] sm:$0xf0]  ;;  %v3926_v43 = vld [vmem:[#allocation2 + $0xac] sm:$0xf0] }
  0x28   :  { %727 = vmatpush.bf16.msra.mxu2 %v3259_v26  ;;  %v3427_v44 = vor.u32 %v3970_v39, %v3424_v40  ;;  %v3916_v46 = vld [vmem:[#allocation2 + $0x64] sm:$0xf]  ;;  %v3208_v47 = vld [vmem:[#allocation2 + $0x78] sm:$0xf0]  ;;  %v3430_v49 = vld [vmem:[#allocation2 + $0x218] sm:$0xf]  ;;  %v3239_v58 = vor.u32 %v3926_v43, %v3238_v42 }
  0x29   :  { %749 = vmatpush.bf16.msra.mxu3 %v3451_v34  ;;  %v3964_v48 = vld [vmem:[#allocation2 + $0x1e4] sm:$0xf]  ;;  %v3974_v50 = vld [vmem:[#allocation2 + $0x22c] sm:$0xf0]  ;;  %v3400_v52 = vld [vmem:[#allocation2 + $0x1f8] sm:$0xf0] }
  0x2a   :  { %686 = vmatpush.bf16.msra.mxu0 %v3183_v45  ;;  %v3455_v45 = vor.u32 %v3980_v35, %v3454_v33  ;;  %v3150_v53 = vld [vmem:[%s5067_s0 + $0x10] sm:$0xf]  ;;  %v3903_v54 = vld [vmem:[%s5067_s0 + $0x14] sm:$0xf0]  ;;  %v3902_v55 = vld [vmem:[%s5067_s0 + $0x14] sm:$0xf]  ;;  %v3403_v56 = vor.u32 %v3964_v48, %v3400_v52  ;;  %v3431_v61 = vor.u32 %v3974_v50, %v3430_v49 }
  0x2b   :  { %708 = vmatpush.bf16.msra.mxu1 %v3375_v51  ;;  %v3211_v51 = vor.u32 %v3916_v46, %v3208_v47  ;;  %v3152_v57 = vld [vmem:[%s5067_s0 + $0x18] sm:$0xf0]  ;;  %v3214_v59 = vld [vmem:[#allocation2 + $0x68] sm:$0xf]  ;;  %v3920_v60 = vld [vmem:[#allocation2 + $0x7c] sm:$0xf0]  ;;  %v4394_v1 = vor.u32 %v3903_v54, %v3150_v53 }
  0x2c   :  { %728 = vmatpush.bf16.msra.mxu2 %v3235_v38  ;;  %v3184_v63 = vld [vmem:[#allocation2 + $0x48] sm:$0xf0]  ;;  %v3958_v0 = vld [vmem:[#allocation2 + $0x1b4] sm:$0xf]  ;;  %v3968_v3 = vld [vmem:[#allocation2 + $0x1fc] sm:$0xf0]  ;;  %v4396_v6 = vor.u32 %v3902_v55, %v3152_v57  ;;  %v3215_v8 = vor.u32 %v3920_v60, %v3214_v59 }
  0x2d   :  { %750 = vmatpush.bf16.msra.mxu3 %v3427_v44  ;;  %v3376_v5 = vld [vmem:[#allocation2 + $0x1c8] sm:$0xf0]  ;;  %v3190_v9 = vld [vmem:[#allocation2 + $0x38] sm:$0xf]  ;;  %v3914_v10 = vld [vmem:[#allocation2 + $0x4c] sm:$0xf0] }
  0x2e   :  { %687 = vmatpush.bf16.msra.mxu0 %v3159_v62  ;;  %v3910_v62 = vld [vmem:[#allocation2 + $0x34] sm:$0xf]  ;;  %v3904_v13 = vld [vmem:[#allocation2 + $0x4] sm:$0xf]  ;;  %v3160_v14 = vld [vmem:[#allocation2 + $0x18] sm:$0xf0]  ;;  %v3191_v22 = vor.u32 %v3914_v10, %v3190_v9 }
  0x2f   :  { %709 = vmatpush.bf16.msra.mxu1 %v3351_v2  ;;  %v3406_v2 = vld [vmem:[#allocation2 + $0x1e8] sm:$0xf]  ;;  %v3952_v15 = vld [vmem:[#allocation2 + $0x184] sm:$0xf]  ;;  %v3382_v17 = vld [vmem:[#allocation2 + $0x1b8] sm:$0xf] }
  0x30   :  { %729 = vmatpush.bf16.msra.mxu2 %v3211_v51  ;;  %v3407_v12 = vor.u32 %v3968_v3, %v3406_v2  ;;  %v3352_v20 = vld [vmem:[#allocation2 + $0x198] sm:$0xf0]  ;;  %v3166_v24 = vld [vmem:[#allocation2 + $0x8] sm:$0xf]  ;;  %v3908_v25 = vld [vmem:[#allocation2 + $0x1c] sm:$0xf0] }
  0x31   :  { %688 = vmatmul.bf16.vlgmr.msra.gmra.mxu0 %v4376_v11  ;;  %751 = vmatpush.bf16.msra.mxu3 %v3403_v56  ;;  %v3355_v21 = vor.u32 %v3952_v15, %v3352_v20  ;;  %v3358_v26 = vld [vmem:[#allocation2 + $0x188] sm:$0xf]  ;;  %v76_v28 = vld [vmem:[%s5067_s0 + $0x20] sm:$0xff]  ;;  %v3167_v29 = vor.u32 %v3908_v25, %v3166_v24  ;;  %v3947_v35 = vld [vmem:[#allocation2 + $0x15c] sm:$0xf]  ;;  %s4314_s0 = smov 96  }
  0x32   :  { %768 = vmatpush.bf16.msrb.mxu0 %v3335_v4  ;;  %710 = vmatmul.bf16.vlgmr.msra.gmra.mxu1 %v4378_v16  ;;  %v3187_v4 = vor.u32 %v3910_v62, %v3184_v63  ;;  %v186_v31 = vunpack.c.l.b16 %v76_v28  ;;  %v187_v32 = vunpack.c.h.b16 %v76_v28  ;;  %v3336_v36 = vld [vmem:[#allocation2 + $0x170] sm:$0xf0]  ;;  %v3995_v37 = vld [vmem:[#allocation2 + $0x2dc] sm:$0xf]  ;;  %v3312_v42 = vld [vmem:[#allocation2 + $0x140] sm:$0xf0] }
  0x33   :  { %787 = vmatpush.bf16.msrb.mxu1 %v3527_v7  ;;  %v3379_v7 = vor.u32 %v3958_v0, %v3376_v5  ;;  %v3339_v38 = vor.u32 %v3947_v35, %v3336_v36  ;;  %v3528_v39 = vld [vmem:[#allocation2 + $0x2f0] sm:$0xf0]  ;;  %v3989_v43 = vld [vmem:[#allocation2 + $0x2ac] sm:$0xf]  ;;  %v3935_v46 = vld [vmem:[#allocation2 + $0xfc] sm:$0xf] }
  0x34   :  { %730 = vmatpush.bf16.msra.mxu2 %v3187_v4  ;;  %v4405_v33 = vpack.c.b16 %v186_v31, %v186_v31  ;;  %v4407_v34 = vpack.c.b16 %v187_v32, %v187_v32  ;;  %v3531_v40 = vor.u32 %v3995_v37, %v3528_v39  ;;  %v3288_v47 = vld [vmem:[#allocation2 + $0x110] sm:$0xf0]  ;;  %v3983_v49 = vld [vmem:[#allocation2 + $0x27c] sm:$0xf]  ;;  %v3929_v53 = vld [vmem:[#allocation2 + $0xcc] sm:$0xf] }
  0x35   :  { %752 = vmatpush.bf16.msra.mxu3 %v3379_v7  ;;  %v3480_v50 = vld [vmem:[#allocation2 + $0x290] sm:$0xf0]  ;;  %v3291_v51 = vor.u32 %v3935_v46, %v3288_v47  ;;  %v3264_v54 = vld [vmem:[#allocation2 + $0xe0] sm:$0xf0]  ;;  %v3977_v55 = vld [vmem:[#allocation2 + $0x24c] sm:$0xf] }
  0x36   :  { %769 = vmatpush.bf16.msrb.mxu0 %v3311_v18  ;;  %v3962_v18 = vld [vmem:[#allocation2 + $0x1cc] sm:$0xf0]  ;;  %v3483_v52 = vor.u32 %v3983_v49, %v3480_v50  ;;  %v3456_v56 = vld [vmem:[#allocation2 + $0x260] sm:$0xf0]  ;;  %v3267_v57 = vor.u32 %v3929_v53, %v3264_v54  ;;  %v3240_v59 = vld [vmem:[#allocation2 + $0xb0] sm:$0xf0] }
  0x37   :  { %788 = vmatpush.bf16.msrb.mxu1 %v3503_v19  ;;  %v3163_v19 = vor.u32 %v3904_v13, %v3160_v14  ;;  %v3383_v23 = vor.u32 %v3962_v18, %v3382_v17  ;;  %v3971_v60 = vld [vmem:[#allocation2 + $0x21c] sm:$0xf]  ;;  %v3432_v62 = vld [vmem:[#allocation2 + $0x230] sm:$0xf0]  ;;  %v3342_v63 = vld [vmem:[#allocation2 + $0x160] sm:$0xf] }
  0x38   :  { %v3951_v0 = vld [vmem:[#allocation2 + $0x174] sm:$0xf0]  ;;  %v3534_v3 = vld [vmem:[#allocation2 + $0x2e0] sm:$0xf]  ;;  %v3318_v5 = vld [vmem:[#allocation2 + $0x130] sm:$0xf]  ;;  %v3435_v13 = vor.u32 %v3971_v60, %v3432_v62 }
  0x39   :  { %731 = vmatpush.bf16.msra.mxu2 %v3163_v19  ;;  %753 = vmatpush.bf16.msra.mxu3 %v3355_v21  ;;  %v3343_v2 = vor.u32 %v3951_v0, %v3342_v63  ;;  %v3999_v4 = vld [vmem:[#allocation2 + $0x2f4] sm:$0xf0]  ;;  %v3510_v9 = vld [vmem:[#allocation2 + $0x2b0] sm:$0xf]  ;;  %v3993_v10 = vld [vmem:[#allocation2 + $0x2c4] sm:$0xf0] }
  0x3a   :  { %770 = vmatpush.bf16.msrb.mxu0 %v3287_v27  ;;  %v3956_v27 = vld [vmem:[#allocation2 + $0x19c] sm:$0xf0]  ;;  %v3535_v7 = vor.u32 %v3999_v4, %v3534_v3  ;;  %v3917_v14 = vld [vmem:[#allocation2 + $0x6c] sm:$0xf]  ;;  %v3216_v15 = vld [vmem:[#allocation2 + $0x80] sm:$0xf0]  ;;  %v3511_v20 = vor.u32 %v3993_v10, %v3510_v9 }
  0x3b   :  { %789 = vmatpush.bf16.msrb.mxu1 %v3479_v30  ;;  %v3359_v30 = vor.u32 %v3956_v27, %v3358_v26  ;;  %v3965_v17 = vld [vmem:[#allocation2 + $0x1ec] sm:$0xf]  ;;  %v3408_v19 = vld [vmem:[#allocation2 + $0x200] sm:$0xf0]  ;;  %v3294_v21 = vld [vmem:[#allocation2 + $0x100] sm:$0xf]  ;;  %v3219_v25 = vor.u32 %v3917_v14, %v3216_v15 }
  0x3c   :  { %732 = vmatmul.bf16.vlgmr.msra.gmra.mxu2 %v4376_v11  ;;  %754 = vmatmul.bf16.vlgmr.msra.gmra.mxu3 %v4378_v16  ;;  %v3987_v24 = vld [vmem:[#allocation2 + $0x294] sm:$0xf0]  ;;  %v3411_v26 = vor.u32 %v3965_v17, %v3408_v19  ;;  %v3911_v27 = vld [vmem:[#allocation2 + $0x3c] sm:$0xf]  ;;  %v3192_v28 = vld [vmem:[#allocation2 + $0x50] sm:$0xf0] }
  0x3d   :  { %806 = vmatpush.bf16.msrb.mxu2 %v3339_v38  ;;  %825 = vmatpush.bf16.msrb.mxu3 %v3531_v40  ;;  %v3384_v31 = vld [vmem:[#allocation2 + $0x1d0] sm:$0xf0]  ;;  %v3195_v35 = vor.u32 %v3911_v27, %v3192_v28  ;;  %v3905_v37 = vld [vmem:[#allocation2 + $0xc] sm:$0xf]  ;;  %v3168_v38 = vld [vmem:[#allocation2 + $0x20] sm:$0xf0] }
  0x3e   :  { %771 = vmatpush.bf16.msrb.mxu0 %v3263_v41  ;;  %v3941_v41 = vld [vmem:[#allocation2 + $0x12c] sm:$0xf]  ;;  %v3360_v40 = vld [vmem:[#allocation2 + $0x1a0] sm:$0xf0]  ;;  %v3981_v47 = vld [vmem:[#allocation2 + $0x264] sm:$0xf0] }
  0x3f   :  { %790 = vmatpush.bf16.msrb.mxu1 %v3455_v45  ;;  %v3315_v44 = vor.u32 %v3941_v41, %v3312_v42  ;;  %v3504_v45 = vld [vmem:[#allocation2 + $0x2c0] sm:$0xf0]  ;;  %v3953_v39 = vld [vmem:[#allocation2 + $0x18c] sm:$0xf]  ;;  %v3171_v41 = vor.u32 %v3905_v37, %v3168_v38  ;;  %v3246_v49 = vld [vmem:[#allocation2 + $0xa0] sm:$0xf] }
  0x40   :  { %v3507_v48 = vor.u32 %v3989_v43, %v3504_v45  ;;  %v3363_v42 = vor.u32 %v3953_v39, %v3360_v40  ;;  %v3270_v43 = vld [vmem:[#allocation2 + $0xd0] sm:$0xf]  ;;  %v3927_v50 = vld [vmem:[#allocation2 + $0xb4] sm:$0xf0]  ;;  %v3390_v63 = vld [vmem:[#allocation2 + $0x1c0] sm:$0xf] }
  0x41   :  { %693 = vmatmul.bf16.gmra.mxu0 %v4394_v1  ;;  %807 = vmatpush.bf16.msrb.mxu2 %v3315_v44  ;;  %v3933_v44 = vld [vmem:[#allocation2 + $0xe4] sm:$0xf0]  ;;  %v3462_v45 = vld [vmem:[#allocation2 + $0x250] sm:$0xf]  ;;  %v3975_v53 = vld [vmem:[#allocation2 + $0x234] sm:$0xf0] }
  0x42   :  { %772 = vmatpush.bf16.msrb.mxu0 %v3239_v58  ;;  %715 = vmatmul.bf16.gmra.mxu1 %v4396_v6  ;;  %v3923_v58 = vld [vmem:[#allocation2 + $0x9c] sm:$0xf]  ;;  %v3271_v46 = vor.u32 %v3933_v44, %v3270_v43  ;;  %v3915_v62 = vld [vmem:[#allocation2 + $0x54] sm:$0xf0]  ;;  %v3174_v4 = vld [vmem:[#allocation2 + $0x10] sm:$0xf] }
  0x43   :  { %791 = vmatpush.bf16.msrb.mxu1 %v3431_v61  ;;  %826 = vmatpush.bf16.msrb.mxu3 %v3507_v48  ;;  %v3459_v61 = vor.u32 %v3977_v55, %v3456_v56  ;;  %v3463_v48 = vor.u32 %v3981_v47, %v3462_v45  ;;  %v3222_v55 = vld [vmem:[#allocation2 + $0x70] sm:$0xf]  ;;  %v3921_v56 = vld [vmem:[#allocation2 + $0x84] sm:$0xf0]  ;;  %s4315_s7 = smov 32   ;;  %s4316_s8 = smov 64  }
  0x44   :  { %v3957_v9 = vld [vmem:[#allocation2 + $0x1a4] sm:$0xf0]  ;;  %vm924_vm0 = vcmask 261120   ;;  %vm969_vm1 = vcmask 64512   ;;  %s3126_s18 = sshll.u32 %s5073_s6, 4  ;;  %s4318_s19 = smov 256   ;;  %s3127_s18 = int_to_ptr.hbm [resolvable:$true] %s3126_s18 }
  0x45   :  { %808 = vmatpush.bf16.msrb.mxu2 %v3291_v51  ;;  %v3438_v51 = vld [vmem:[#allocation2 + $0x220] sm:$0xf]  ;;  %s4319_s20 = smov 16  }
  0x46   :  { %773 = vmatpush.bf16.msrb.mxu0 %v3215_v8  ;;  %v3945_v8 = vld [vmem:[#allocation2 + $0x144] sm:$0xf0]  ;;  %v3439_v54 = vor.u32 %v3975_v53, %v3438_v51 }
  0x47   :  { %792 = vmatpush.bf16.msrb.mxu1 %v3407_v12  ;;  %827 = vmatpush.bf16.msrb.mxu3 %v3483_v52  ;;  %v3243_v12 = vor.u32 %v3923_v58, %v3240_v59  ;;  %v3319_v18 = vor.u32 %v3945_v8, %v3318_v5  ;;  %v3247_v52 = vor.u32 %v3927_v50, %v3246_v49  ;;  %v3969_v59 = vld [vmem:[#allocation2 + $0x204] sm:$0xf0] }
  0x48   :  { %v3223_v58 = vor.u32 %v3921_v56, %v3222_v55  ;;  %v3909_v5 = vld [vmem:[#allocation2 + $0x24] sm:$0xf0] }
  0x49   :  { %809 = vmatpush.bf16.msrb.mxu2 %v3267_v57  ;;  %v3414_v57 = vld [vmem:[#allocation2 + $0x1f0] sm:$0xf]  ;;  %v3175_v8 = vor.u32 %v3909_v5, %v3174_v4  ;;  %v3320_v5 = vld [vmem:[#allocation2 + $0x148] sm:$0xf0] }
  0x4a   :  { %774 = vmatpush.bf16.msrb.mxu0 %v3191_v22  ;;  %v3939_v22 = vld [vmem:[#allocation2 + $0x114] sm:$0xf0]  ;;  %v3415_v60 = vor.u32 %v3969_v59, %v3414_v57 }
  0x4b   :  { %793 = vmatpush.bf16.msrb.mxu1 %v3383_v23  ;;  %828 = vmatpush.bf16.msrb.mxu3 %v3459_v61  ;;  %v3486_v23 = vld [vmem:[#allocation2 + $0x280] sm:$0xf] }
  0x4c   :  { %737 = vmatmul.bf16.gmra.mxu2 %v4394_v1  ;;  %759 = vmatmul.bf16.gmra.mxu3 %v4396_v6  ;;  %v3487_v32 = vor.u32 %v3987_v24, %v3486_v23  ;;  %v3198_v61 = vld [vmem:[#allocation2 + $0x40] sm:$0xf] }
  0x4d   :  { %810 = vmatpush.bf16.msrb.mxu2 %v3243_v12  ;;  %v3199_v0 = vor.u32 %v3915_v62, %v3198_v61 }
  0x4e   :  { %775 = vmatpush.bf16.msrb.mxu0 %v3167_v29  ;;  %v3295_v29 = vor.u32 %v3939_v22, %v3294_v21 }
  0x4f   :  { %794 = vmatpush.bf16.msrb.mxu1 %v3359_v30  ;;  %829 = vmatpush.bf16.msrb.mxu3 %v3435_v13  ;;  %v3959_v30 = vld [vmem:[#allocation2 + $0x1bc] sm:$0xf] }
  0x50   :  { %v3387_v36 = vor.u32 %v3959_v30, %v3384_v31 }
  0x51   :  { %698 = vmatmul.bf16.gmra.mxu0 %v4405_v33  ;;  %811 = vmatpush.bf16.msrb.mxu2 %v3219_v25 }
  0x52   :  { %720 = vmatmul.bf16.gmra.mxu1 %v4407_v34  ;;  %844 = vmatpush.bf16.msra.mxu0 %v3343_v2  ;;  %v3963_v2 = vld [vmem:[#allocation2 + $0x1d4] sm:$0xf0] }
  0x53   :  { %863 = vmatpush.bf16.msra.mxu1 %v3535_v7  ;;  %830 = vmatpush.bf16.msrb.mxu3 %v3411_v26  ;;  %v3391_v3 = vor.u32 %v3963_v2, %v3390_v63  ;;  %v3366_v7 = vld [vmem:[#allocation2 + $0x190] sm:$0xf]  ;;  %v3948_v63 = vld [vmem:[#allocation2 + $0x164] sm:$0xf]  ;;  %v3942_v2 = vld [vmem:[#allocation2 + $0x134] sm:$0xf] }
  0x54   :  { %v3367_v10 = vor.u32 %v3957_v9, %v3366_v7  ;;  %v3323_v7 = vor.u32 %v3942_v2, %v3320_v5  ;;  %v3936_v9 = vld [vmem:[#allocation2 + $0x104] sm:$0xf]  ;;  %v3392_v5 = vld [vmem:[#allocation2 + $0x1d8] sm:$0xf0] }
  0x55   :  { %812 = vmatpush.bf16.msrb.mxu2 %v3195_v35 }
  0x56   :  { %845 = vmatpush.bf16.msra.mxu0 %v3319_v18 }
  0x57   :  { %864 = vmatpush.bf16.msra.mxu1 %v3511_v20  ;;  %831 = vmatpush.bf16.msrb.mxu3 %v3387_v36 }
  0x59   :  { %813 = vmatpush.bf16.msrb.mxu2 %v3171_v41 }
  0x5a   :  { %846 = vmatpush.bf16.msra.mxu0 %v3295_v29 }
  0x5b   :  { %865 = vmatpush.bf16.msra.mxu1 %v3487_v32  ;;  %832 = vmatpush.bf16.msrb.mxu3 %v3363_v42 }
  0x5c   :  { %742 = vmatmul.bf16.gmra.mxu2 %v4405_v33  ;;  %764 = vmatmul.bf16.gmra.mxu3 %v4407_v34 }
  0x5e   :  { %847 = vmatpush.bf16.msra.mxu0 %v3271_v46 }
  0x5f   :  { %866 = vmatpush.bf16.msra.mxu1 %v3463_v48 }
  0x61   :  { %776 = vmatmul.bf16.vlgmr.msrb.gmra.mxu0 %v4376_v11 }
  0x62   :  { %795 = vmatmul.bf16.vlgmr.msrb.gmra.mxu1 %v4378_v16  ;;  %848 = vmatpush.bf16.msra.mxu0 %v3247_v52 }
  0x63   :  { %867 = vmatpush.bf16.msra.mxu1 %v3439_v54 }
  0x66   :  { %849 = vmatpush.bf16.msra.mxu0 %v3223_v58 }
  0x67   :  { %868 = vmatpush.bf16.msra.mxu1 %v3415_v60 }
  0x6a   :  { %850 = vmatpush.bf16.msra.mxu0 %v3199_v0  ;;  %v3344_v0 = vld [vmem:[#allocation2 + $0x178] sm:$0xf0] }
  0x6b   :  { %869 = vmatpush.bf16.msra.mxu1 %v3391_v3  ;;  %v3347_v4 = vor.u32 %v3948_v63, %v3344_v0  ;;  %v3966_v63 = vld [vmem:[#allocation2 + $0x1f4] sm:$0xf]  ;;  %v3416_v0 = vld [vmem:[#allocation2 + $0x208] sm:$0xf0] }
  0x6c   :  { %814 = vmatmul.bf16.vlgmr.msrb.gmra.mxu2 %v4376_v11  ;;  %833 = vmatmul.bf16.vlgmr.msrb.gmra.mxu3 %v4378_v16  ;;  %v3419_v2 = vor.u32 %v3966_v63, %v3416_v0 }
  0x6d   :  { %882 = vmatpush.bf16.msra.mxu2 %v3347_v4  ;;  %v3960_v4 = vld [vmem:[#allocation2 + $0x1c4] sm:$0xf] }
  0x6e   :  { %851 = vmatpush.bf16.msra.mxu0 %v3175_v8 }
  0x6f   :  { %870 = vmatpush.bf16.msra.mxu1 %v3367_v10  ;;  %v3296_v10 = vld [vmem:[#allocation2 + $0x118] sm:$0xf0] }
  0x71   :  { %779 = vmatmul.bf16.gmra.mxu0 %v4394_v1  ;;  %883 = vmatpush.bf16.msra.mxu2 %v3323_v7  ;;  %v3395_v7 = vor.u32 %v3960_v4, %v3392_v5 }
  0x72   :  { %798 = vmatmul.bf16.gmra.mxu1 %v4396_v6 }
  0x7c   :  { %817 = vmatmul.bf16.gmra.mxu2 %v4394_v1  ;;  %836 = vmatmul.bf16.gmra.mxu3 %v4396_v6 }
  0x81   :  { %782 = vmatmul.bf16.gmra.mxu0 %v4405_v33 }
  0x82   :  { %801 = vmatmul.bf16.gmra.mxu1 %v4407_v34 }
  0x8c   :  { %820 = vmatmul.bf16.gmra.mxu2 %v4405_v33  ;;  %839 = vmatmul.bf16.gmra.mxu3 %v4407_v34 }
  0x91   :  { %852 = vmatmul.bf16.vlgmr.msra.gmra.mxu0 %v4376_v11 }
  0x92   :  { %871 = vmatmul.bf16.vlgmr.msra.gmra.mxu1 %v4378_v16 }
  0xa1   :  { %855 = vmatmul.bf16.gmra.mxu0 %v4394_v1 }
  0xa2   :  { %874 = vmatmul.bf16.gmra.mxu1 %v4396_v6 }
  0xae   :  { %v689_v12 = vpop.f32.mrf.mxu0 }
  0xaf   :  { %v711_v13 = vpop.f32.mrf.mxu1 }
  0xb0   :  { %v712_v28 = vadd.f32 %v711_v13, %v689_v12  ;;  %v3930_v12 = vld [vmem:[#allocation2 + $0xd4] sm:$0xf] }
  0xb1   :  { %858 = vmatmul.bf16.gmra.mxu0 %v4405_v33 }
  0xb2   :  { %877 = vmatmul.bf16.gmra.mxu1 %v4407_v34 }
  0xb6   :  { %v691_v14 = vpop.f32.mrf.mxu0 }
  0xb7   :  { %v713_v15 = vpop.f32.mrf.mxu1 }
  0xb8   :  { %v4431_v17 = vadd.f32 %v713_v15, %v691_v14  ;;  %v3299_v14 = vor.u32 %v3936_v9, %v3296_v10  ;;  %v3272_v15 = vld [vmem:[#allocation2 + $0xe8] sm:$0xf0] }
  0xb9   :  { %v3368_v9 = vld [vmem:[#allocation2 + $0x1a8] sm:$0xf0] }
  0xba   :  { %1057 = vrot.lane.b32.xlu1 %v4431_v17, %s4314_s0  ;;  %884 = vmatpush.bf16.msra.mxu2 %v3299_v14 }
  0xbe   :  { %v694_v18 = vpop.f32.mrf.mxu0 }
  0xbf   :  { %v716_v19 = vpop.f32.mrf.mxu1  ;;  %v733_v24 = vpop.f32.mrf.mxu2 }
  0xc0   :  { %v4435_v20 = vadd.f32 %v716_v19, %v694_v18  ;;  %v755_v25 = vpop.f32.mrf.mxu3  ;;  %v3275_v18 = vor.u32 %v3930_v12, %v3272_v15  ;;  %v3996_v19 = vld [vmem:[#allocation2 + $0x2e4] sm:$0xf] }
  0xc1   :  { %v4462_v51 = vadd.f32 %v755_v25, %v733_v24  ;;  %v3924_v25 = vld [vmem:[#allocation2 + $0xa4] sm:$0xf] }
  0xc2   :  { %1059 = vrot.lane.b32.xlu1 %v4435_v20, %s4314_s0  ;;  %885 = vmatpush.bf16.msra.mxu2 %v3275_v18 }
  0xc6   :  { %v696_v21 = vpop.f32.mrf.mxu0 }
  0xc7   :  { %v718_v22 = vpop.f32.mrf.mxu1  ;;  %v735_v29 = vpop.f32.mrf.mxu2 }
  0xc8   :  { %v4441_v23 = vadd.f32 %v718_v22, %v696_v21  ;;  %v757_v30 = vpop.f32.mrf.mxu3  ;;  %v3536_v21 = vld [vmem:[#allocation2 + $0x2f8] sm:$0xf0] }
  0xc9   :  { %v4450_v32 = vadd.f32 %v757_v30, %v735_v29  ;;  %v3539_v22 = vor.u32 %v3996_v19, %v3536_v21  ;;  %v3224_v30 = vld [vmem:[#allocation2 + $0x88] sm:$0xf0] }
  0xca   :  { %1061 = vrot.lane.b32.xlu2 %v4441_v23, %s4314_s0  ;;  %1332 = vrot.lane.b32.xlu1 %v4431_v17, %s4315_s7 }
  0xcb   :  { %901 = vmatpush.bf16.msra.mxu3 %v3539_v22 }
  0xce   :  { %v699_v26 = vpop.f32.mrf.mxu0 }
  0xcf   :  { %v721_v27 = vpop.f32.mrf.mxu1  ;;  %v738_v36 = vpop.f32.mrf.mxu2  ;;  %v3248_v26 = vld [vmem:[#allocation2 + $0xb8] sm:$0xf0] }
  0xd0   :  { %v760_v37 = vpop.f32.mrf.mxu3  ;;  %v3918_v27 = vld [vmem:[#allocation2 + $0x74] sm:$0xf]  ;;  %v3251_v29 = vor.u32 %v3924_v25, %v3248_v26 }
  0xd1   :  { %v4466_v54 = vadd.f32 %v760_v37, %v738_v36  ;;  %v3227_v37 = vor.u32 %v3918_v27, %v3224_v30 }
  0xd2   :  { %1334 = vrot.lane.b32.xlu2 %v4435_v20, %s4315_s7  ;;  %1193 = vrot.lane.b32.xlu1 %v712_v28, %s4316_s8 }
  0xd3   :  { %886 = vmatpush.bf16.msra.mxu2 %v3251_v29 }
  0xd6   :  { %v700_v31 = vpop.f32.mrf.mxu0 }
  0xd7   :  { %v722_v35 = vpop.f32.mrf.mxu1  ;;  %v740_v40 = vpop.f32.mrf.mxu2  ;;  %v3990_v31 = vld [vmem:[#allocation2 + $0x2b4] sm:$0xf]  ;;  %887 = vmatpush.bf16.msra.mxu2 %v3227_v37 }
  0xd8   :  { %v762_v41 = vpop.f32.mrf.mxu3  ;;  %v3512_v35 = vld [vmem:[#allocation2 + $0x2c8] sm:$0xf0] }
  0xd9   :  { %v4456_v42 = vadd.f32 %v762_v41, %v740_v40  ;;  %v3515_v36 = vor.u32 %v3990_v31, %v3512_v35  ;;  %v3488_v40 = vld [vmem:[#allocation2 + $0x298] sm:$0xf0] }
  0xda   :  { %1336 = vrot.lane.b32.xlu2 %v4441_v23, %s4315_s7  ;;  %1598 = vrot.lane.b32.xlu1 %v4450_v32, %s4314_s0 }
  0xdb   :  { %902 = vmatpush.bf16.msra.mxu3 %v3515_v36 }
  0xde   :  { %v777_v38 = vpop.f32.mrf.mxu0 }
  0xdf   :  { %v796_v39 = vpop.f32.mrf.mxu1  ;;  %v743_v45 = vpop.f32.mrf.mxu2 }
  0xe0   :  { %v765_v46 = vpop.f32.mrf.mxu3  ;;  %v3984_v39 = vld [vmem:[#allocation2 + $0x284] sm:$0xf]  ;;  %v3200_v45 = vld [vmem:[#allocation2 + $0x58] sm:$0xf0] }
  0xe1   :  { %v3906_v46 = vld [vmem:[#allocation2 + $0x14] sm:$0xf] }
  0xe2   :  { %1602 = vrot.lane.b32.xlu1 %v4456_v42, %s4314_s0 }
  0xe6   :  { %v778_v43 = vpop.f32.mrf.mxu0 }
  0xe7   :  { %v797_v44 = vpop.f32.mrf.mxu1  ;;  %v744_v49 = vpop.f32.mrf.mxu2  ;;  %v3491_v43 = vor.u32 %v3984_v39, %v3488_v40 }
  0xe8   :  { %v766_v50 = vpop.f32.mrf.mxu3  ;;  %v3912_v44 = vld [vmem:[#allocation2 + $0x44] sm:$0xf]  ;;  %v3176_v49 = vld [vmem:[#allocation2 + $0x28] sm:$0xf0] }
  0xe9   :  { %903 = vmatpush.bf16.msra.mxu3 %v3491_v43  ;;  %v3978_v50 = vld [vmem:[#allocation2 + $0x254] sm:$0xf] }
  0xea   :  { %1873 = vrot.lane.b32.xlu1 %v4450_v32, %s4315_s7 }
  0xee   :  { %v780_v47 = vpop.f32.mrf.mxu0 }
  0xef   :  { %v799_v48 = vpop.f32.mrf.mxu1  ;;  %v815_v58 = vpop.f32.mrf.mxu2 }
  0xf0   :  { %v834_v59 = vpop.f32.mrf.mxu3  ;;  %v3203_v48 = vor.u32 %v3912_v44, %v3200_v45  ;;  %v3440_v58 = vld [vmem:[#allocation2 + $0x238] sm:$0xf0] }
  0xf2   :  { %1734 = vrot.lane.b32.xlu1 %v4462_v51, %s4316_s8  ;;  %888 = vmatpush.bf16.msra.mxu2 %v3203_v48  ;;  %v4570_v48 = vld [vmem:[%s5069_s2 + $0x10] sm:$0xff] }
  0xf6   :  { %v781_v52 = vpop.f32.mrf.mxu0 }
  0xf7   :  { %v800_v53 = vpop.f32.mrf.mxu1  ;;  %v816_v62 = vpop.f32.mrf.mxu2  ;;  %v3464_v52 = vld [vmem:[#allocation2 + $0x268] sm:$0xf0] }
  0xf8   :  { %v835_v3 = vpop.f32.mrf.mxu3 }
  0xfa   :  { %1738 = vrot.lane.b32.xlu1 %v4466_v54, %s4316_s8 }
  0xfe   :  { %v783_v55 = vpop.f32.mrf.mxu0 }
  0xff   :  { %v802_v56 = vpop.f32.mrf.mxu1  ;;  %v818_v8 = vpop.f32.mrf.mxu2 }
 0x100   :  { %v803_v57 = vadd.f32 %v802_v56, %v783_v55  ;;  %v837_v13 = vpop.f32.mrf.mxu3  ;;  %v3467_v55 = vor.u32 %v3978_v50, %v3464_v52  ;;  %v3954_v8 = vld [vmem:[#allocation2 + $0x194] sm:$0xf] }
 0x101   :  { %v3371_v10 = vor.u32 %v3954_v8, %v3368_v9 }
 0x102   :  { %1063 = vrot.lane.b32.xlu0 %v803_v57, %s4314_s0  ;;  %3540 = vmatpush.xpose.msk.msrb.mxu0 %vm924_vm0, %v803_v57 }
 0x103   :  { %1338 = vrot.lane.b32.xlu2 %v803_v57, %s4315_s7  ;;  %904 = vmatpush.bf16.msra.mxu3 %v3467_v55 }
 0x105   :  { %3541 = vmatmul.msk.f32.vlgmr.msrb.gmra.mxu0 %vm924_vm0, %v712_v28 }
 0x106   :  { %v785_v60 = vpop.f32.mrf.mxu0 }
 0x107   :  { %v804_v61 = vpop.f32.mrf.mxu1  ;;  %v819_v24 = vpop.f32.mrf.mxu2 }
 0x10a   :  { %1055 = vrot.lane.b32.xlu0 %v712_v28, %s4314_s0 }
 0x10b   :  { %1596 = vrot.lane.b32.xlu2 %v4462_v51, %s4314_s0 }
 0x10d   :  { %3542 = vmatmul.msk.f32.gmra.mxu0 %vm924_vm0, %v4431_v17 }
 0x10e   :  { %v853_v38 = vpop.f32.mrf.mxu0 }
 0x10f   :  { %v872_v41 = vpop.f32.mrf.mxu1 }
 0x110   :  { %v4553_v41 = vld [vmem:[%s5069_s2 + $0x8] sm:$0xff] }
 0x112   :  { %1330 = vrot.lane.b32.xlu0 %v712_v28, %s4315_s7  ;;  %v838_v28 = vpop.f32.mrf.mxu3 }
 0x113   :  { %1199 = vrot.lane.b32.xlu2 %v4441_v23, %s4316_s8 }
 0x115   :  { %3543 = vmatmul.msk.f32.gmra.mxu0 %vm924_vm0, %v4435_v20 }
 0x116   :  { %v854_v56 = vpop.f32.mrf.mxu0 }
 0x117   :  { %v873_v59 = vpop.f32.mrf.mxu1  ;;  %v4582_v56 = vld [vmem:[%s5069_s2 + $0x18] sm:$0xff] }
 0x11a   :  { %1201 = vrot.lane.b32.xlu0 %v803_v57, %s4316_s8  ;;  %v840_v47 = vpop.f32.mrf.mxu3  ;;  %v3972_v57 = vld [vmem:[#allocation2 + $0x224] sm:$0xf] }
 0x11b   :  { %1875 = vrot.lane.b32.xlu2 %v4466_v54, %s4315_s7  ;;  %v3443_v60 = vor.u32 %v3972_v57, %v3440_v58 }
 0x11d   :  { %3544 = vmatmul.msk.f32.gmra.mxu0 %vm924_vm0, %v4441_v23  ;;  %v821_v23 = vpop.f32.mrf.mxu2  ;;  %905 = vmatpush.bf16.msra.mxu3 %v3443_v60 }
 0x11e   :  { %v4493_v53 = vadd.f32 %v840_v47, %v821_v23  ;;  %v856_v3 = vpop.f32.mrf.mxu0 }
 0x120   :  { %1604 = vrot.lane.b32.xlu1 %v4493_v53, %s4314_s0 }
 0x121   :  { %906 = vmatpush.bf16.msra.mxu3 %v3419_v2 }
 0x122   :  { %1195 = vrot.lane.b32.xlu0 %v4431_v17, %s4316_s8  ;;  %v3179_v17 = vor.u32 %v3906_v46, %v3176_v49  ;;  %v842_v62 = vpop.f32.mrf.mxu3 }
 0x123   :  { %1877 = vrot.lane.b32.xlu2 %v4456_v42, %s4315_s7 }
 0x124   :  { %889 = vmatpush.bf16.msra.mxu2 %v3179_v17  ;;  %v1062_v19 = vpop.permute.xlu2 %1061 }
 0x125   :  { %v823_v61 = vpop.f32.mrf.mxu2  ;;  %907 = vmatpush.bf16.msra.mxu3 %v3395_v7 }
 0x126   :  { %v857_v12 = vpop.f32.mrf.mxu0 }
 0x127   :  { %890 = vmatmul.bf16.vlgmr.msra.gmra.mxu2 %v4376_v11 }
 0x129   :  { %908 = vmatpush.bf16.msra.mxu3 %v3371_v10 }
 0x12a   :  { %1197 = vrot.lane.b32.xlu0 %v4435_v20, %s4316_s8  ;;  %v875_v20 = vpop.f32.mrf.mxu1 }
 0x12b   :  { %1740 = vrot.lane.b32.xlu2 %v4456_v42, %s4316_s8 }
 0x12c   :  { %909 = vmatmul.bf16.vlgmr.msra.gmra.mxu3 %v4378_v16  ;;  %v1058_v18 = vpop.permute.xlu1 %1057 }
 0x12e   :  { %v859_v13 = vpop.f32.mrf.mxu0 }
 0x132   :  { %1600 = vrot.lane.b32.xlu0 %v4466_v54, %s4314_s0  ;;  %v876_v11 = vpop.f32.mrf.mxu1 }
 0x133   :  { %1879 = vrot.lane.b32.xlu2 %v4493_v53, %s4315_s7 }
 0x134   :  { %v1060_v16 = vpop.permute.xlu1 %1059 }
 0x136   :  { %v861_v21 = vpop.f32.mrf.mxu0 }
 0x137   :  { %893 = vmatmul.bf16.gmra.mxu2 %v4394_v1  ;;  %v4521_v1 = vpop.permute.xlu2 %1334 }
 0x13a   :  { %1871 = vrot.lane.b32.xlu0 %v4462_v51, %s4315_s7  ;;  %v878_v14 = vpop.f32.mrf.mxu1 }
 0x13b   :  { %v4512_v15 = vadd.f32 %v878_v14, %v859_v13 }
 0x13c   :  { %912 = vmatmul.bf16.gmra.mxu3 %v4396_v6  ;;  %v1333_v24 = vpop.permute.xlu1 %1332 }
 0x13d   :  { %1041 = vmatpush.msrb.mxu1 %v4512_v15 }
 0x13f   :  { %v4524_v25 = vpop.permute.xlu2 %1336 }
 0x142   :  { %1736 = vrot.lane.b32.xlu0 %v4450_v32, %s4316_s8  ;;  %v880_v22 = vpop.f32.mrf.mxu1 }
 0x144   :  { %v1194_v26 = vpop.permute.xlu1 %1193 }
 0x147   :  { %896 = vmatmul.bf16.gmra.mxu2 %v4405_v33 }
 0x14a   :  { %1742 = vrot.lane.b32.xlu0 %v4493_v53, %s4316_s8 }
 0x14c   :  { %915 = vmatmul.bf16.gmra.mxu3 %v4407_v34  ;;  %v4526_v28 = vpop.permute.xlu1 %1598  ;;  %v4538_v34 = vld [vmem:[%s5069_s2] sm:$0xff] }
 0x152   :  { %1149 = vrot.lane.b32.xlu0 %v4512_v15, %s4314_s0 }
 0x154   :  { %v4532_v33 = vpop.permute.xlu1 %1602 }
 0x15c   :  { %v4540_v35 = vpop.permute.xlu1 %1873 }
 0x15d   :  { %v1339_v27 = vpop.permute.xlu2 %1338 }
 0x164   :  { %v1735_v23 = vpop.permute.xlu1 %1734 }
 0x165   :  { %v4528_v29 = vpop.permute.xlu2 %1596 }
 0x16c   :  { %v1739_v50 = vpop.permute.xlu1 %1738 }
 0x16d   :  { %v1200_v30 = vpop.permute.xlu2 %1199 }
 0x174   :  { %v1064_v6 = vpop.permute.xlu0 %1063 }
 0x175   :  { %3549 = vmatpush.xpose.msk.msrb.mxu2 %vm924_vm0, %v1064_v6  ;;  %v4542_v37 = vpop.permute.xlu2 %1875 }
 0x179   :  { %3567 = vmatpush.xpose.msk.msra.mxu2 %vm924_vm0, %v1339_v27 }
 0x17c   :  { %v1056_v31 = vpop.permute.xlu0 %1055 }
 0x17d   :  { %3550 = vmatmul.msk.f32.vlgmr.msrb.gmra.mxu2 %vm924_vm0, %v1056_v31  ;;  %v4558_v46 = vpop.permute.xlu2 %1877 }
 0x182   :  { %v957_v36 = vpop.f32.mrf.mxu0 }
 0x183   :  { %v4545_v38 = vadd.f32 %v957_v36, %v4538_v34 }
 0x184   :  { %v1331_v39 = vpop.permute.xlu0 %1330 }
 0x185   :  { %3551 = vmatmul.msk.f32.gmra.mxu2 %vm924_vm0, %v1058_v18  ;;  %v970_v40 = vsel %vm969_vm1, %v4545_v38, -inf }
 0x186   :  { %971 = vmax.xlane.f32.xlu2 %v970_v40 }
 0x18a   :  { %v960_v43 = vpop.f32.mrf.mxu0 }
 0x18b   :  { %v4556_v44 = vadd.f32 %v960_v43, %v4553_v41 }
 0x18c   :  { %v1202_v45 = vpop.permute.xlu0 %1201 }
 0x18d   :  { %3552 = vmatmul.msk.f32.gmra.mxu2 %vm924_vm0, %v1060_v16  ;;  %3558 = vmatpush.xpose.msk.msra.mxu0 %vm924_vm0, %v1202_v45  ;;  %v973_v47 = vsel %vm969_vm1, %v4556_v44, -inf }
 0x18e   :  { %974 = vmax.xlane.f32.xlu0 %v973_v47 }
 0x190   :  { %3559 = vmatmul.msk.f32.vlgmr.msra.gmra.mxu0 %vm924_vm0, %v1194_v26 }
 0x191   :  { %3576 = vmatpush.xpose.msk.msrb.mxu0 %vm924_vm0, %v4493_v53  ;;  %v1741_v53 = vpop.permute.xlu2 %1740 }
 0x192   :  { %v963_v49 = vpop.f32.mrf.mxu0  ;;  %v1605_v58 = vpop.permute.xlu1 %1604 }
 0x193   :  { %v4573_v52 = vadd.f32 %v963_v49, %v4570_v48  ;;  %3585 = vmatpush.xpose.msk.msrb.mxu2 %vm924_vm0, %v1605_v58 }
 0x194   :  { %v1196_v55 = vpop.permute.xlu0 %1195 }
 0x195   :  { %3553 = vmatmul.msk.f32.gmra.mxu2 %vm924_vm0, %v1062_v19  ;;  %v976_v17 = vsel %vm969_vm1, %v4573_v52, -inf }
 0x196   :  { %977 = vmax.xlane.f32.xlu2 %v976_v17 }
 0x198   :  { %3560 = vmatmul.msk.f32.gmra.mxu0 %vm924_vm0, %v1196_v55 }
 0x199   :  { %v1880_v62 = vpop.permute.xlu2 %1879 }
 0x19a   :  { %v966_v57 = vpop.f32.mrf.mxu0 }
 0x19b   :  { %v4585_v59 = vadd.f32 %v966_v57, %v4582_v56 }
 0x19c   :  { %v1198_v60 = vpop.permute.xlu0 %1197 }
 0x19d   :  { %3568 = vmatmul.msk.f32.vlgmr.msra.gmra.mxu2 %vm924_vm0, %v1331_v39  ;;  %v979_v61 = vsel %vm969_vm1, %v4585_v59, -inf }
 0x19e   :  { %980 = vmax.xlane.f32.xlu1 %v979_v61  ;;  %3603 = vmatpush.xpose.msk.msra.mxu2 %vm924_vm0, %v1880_v62 }
 0x1a0   :  { %3561 = vmatmul.msk.f32.gmra.mxu0 %vm924_vm0, %v1198_v60 }
 0x1a4   :  { %v1601_v63 = vpop.permute.xlu0 %1600 }
 0x1a5   :  { %3569 = vmatmul.msk.f32.gmra.mxu2 %vm924_vm0, %v1333_v24 }
 0x1a8   :  { %3562 = vmatmul.msk.f32.gmra.mxu0 %vm924_vm0, %v1200_v30 }
 0x1aa   :  { %v891_v2 = vpop.f32.mrf.mxu2 }
 0x1ac   :  { %v1872_v0 = vpop.permute.xlu0 %1871 }
 0x1ad   :  { %3570 = vmatmul.msk.f32.gmra.mxu2 %vm924_vm0, %v4521_v1 }
 0x1af   :  { %v910_v20 = vpop.f32.mrf.mxu3 }
 0x1b0   :  { %3577 = vmatmul.msk.f32.vlgmr.msrb.gmra.mxu0 %vm924_vm0, %v4462_v51 }
 0x1b2   :  { %v892_v4 = vpop.f32.mrf.mxu2 }
 0x1b4   :  { %v1737_v3 = vpop.permute.xlu0 %1736 }
 0x1b5   :  { %3571 = vmatmul.msk.f32.gmra.mxu2 %vm924_vm0, %v4524_v25 }
 0x1b7   :  { %v911_v8 = vpop.f32.mrf.mxu3 }
 0x1b8   :  { %3578 = vmatmul.msk.f32.gmra.mxu0 %vm924_vm0, %v4450_v32 }
 0x1ba   :  { %v894_v51 = vpop.f32.mrf.mxu2 }
 0x1bc   :  { %v1743_v5 = vpop.permute.xlu0 %1742 }
 0x1bd   :  { %3586 = vmatmul.msk.f32.vlgmr.msrb.gmra.mxu2 %vm924_vm0, %v4528_v29  ;;  %3594 = vmatpush.xpose.msk.msra.mxu0 %vm924_vm0, %v1743_v5 }
 0x1bf   :  { %v913_v9 = vpop.f32.mrf.mxu3 }
 0x1c0   :  { %3579 = vmatmul.msk.f32.gmra.mxu0 %vm924_vm0, %v4466_v54 }
 0x1c2   :  { %v895_v32 = vpop.f32.mrf.mxu2 }
 0x1c4   :  { %v1150_v7 = vpop.permute.xlu0 %1149 }
 0x1c5   :  { %3587 = vmatmul.msk.f32.gmra.mxu2 %vm924_vm0, %v4526_v28  ;;  %1179 = vmatpush.msrb.mxu3 %v1150_v7 }
 0x1c7   :  { %v914_v54 = vpop.f32.mrf.mxu3 }
 0x1c8   :  { %3580 = vmatmul.msk.f32.gmra.mxu0 %vm924_vm0, %v4456_v42 }
 0x1ca   :  { %v897_v10 = vpop.f32.mrf.mxu2 }
 0x1cd   :  { %3588 = vmatmul.msk.f32.gmra.mxu2 %vm924_vm0, %v1601_v63 }
 0x1cf   :  { %v916_v11 = vpop.f32.mrf.mxu3 }
 0x1d0   :  { %3595 = vmatmul.msk.f32.vlgmr.msra.gmra.mxu0 %vm924_vm0, %v1735_v23  ;;  %v4618_v13 = vadd.f32 %v916_v11, %v897_v10 }
 0x1d2   :  { %v899_v12 = vpop.f32.mrf.mxu2 }
 0x1d5   :  { %3589 = vmatmul.msk.f32.gmra.mxu2 %vm924_vm0, %v4532_v33 }
 0x1d7   :  { %v918_v42 = vpop.f32.mrf.mxu3 }
 0x1d8   :  { %3596 = vmatmul.msk.f32.gmra.mxu0 %vm924_vm0, %v1737_v3 }
 0x1dd   :  { %3604 = vmatmul.msk.f32.vlgmr.msra.gmra.mxu2 %vm924_vm0, %v1872_v0 }
 0x1e0   :  { %3597 = vmatmul.msk.f32.gmra.mxu0 %vm924_vm0, %v1739_v50 }
 0x1e5   :  { %3605 = vmatmul.msk.f32.gmra.mxu2 %vm924_vm0, %v4540_v35 }
 0x1e8   :  { %3598 = vmatmul.msk.f32.gmra.mxu0 %vm924_vm0, %v1741_v53 }
 0x1ed   :  { %3606 = vmatmul.msk.f32.gmra.mxu2 %vm924_vm0, %v4542_v37 }
 0x1f5   :  { %3607 = vmatmul.msk.f32.gmra.mxu2 %vm924_vm0, %v4558_v46 }
 0x1f9   :  { %v972_v14 = vpop.xlane.xlu2 %971 }
 0x1fa   :  { %v982_v18 = vsub.f32 %v4545_v38, %v972_v14 }
 0x1fc   :  { %v986_v19 = vmul.f32 1.442695, %v982_v18 }
 0x1fe   :  { %4077 = vpow2.f32 %v986_v19 }
 0x200   :  { %v1092_v21 = vpop.f32.mrf.mxu2 }
 0x201   :  { %v975_v22 = vpop.xlane.xlu0 %974  ;;  %v4653_v40 = vadd.f32 %v1092_v21, %v4538_v34 }
 0x202   :  { %v983_v16 = vsub.f32 %v4556_v44, %v975_v22 }
 0x203   :  { %v1104_v45 = vsel %vm969_vm1, %v4653_v40, -inf }
 0x204   :  { %v4630_v1 = vpop.eup %4077  ;;  %v988_v24 = vmul.f32 1.442695, %v983_v16 }
 0x205   :  { %v994_v25 = vsel %vm969_vm1, %v4630_v1, 0.0 }
 0x206   :  { %4079 = vpow2.f32 %v988_v24  ;;  %995 = vadd.xlane.f32.xlu1 %v994_v25 }
 0x208   :  { %v1095_v26 = vpop.f32.mrf.mxu2 }
 0x209   :  { %v4635_v27 = vadd.f32 %v1095_v26, %v4553_v41  ;;  %v978_v28 = vpop.xlane.xlu2 %977 }
 0x20a   :  { %v984_v6 = vsub.f32 %v4573_v52, %v978_v28 }
 0x20b   :  { %v1107_v31 = vsel %vm969_vm1, %v4635_v27, -inf }
 0x20c   :  { %v4637_v29 = vpop.eup %4079  ;;  %v990_v36 = vmul.f32 1.442695, %v984_v6 }
 0x20d   :  { %v1230_v33 = vpop.f32.mrf.mxu0  ;;  %v997_v30 = vsel %vm969_vm1, %v4637_v29, 0.0 }
 0x20e   :  { %v4645_v35 = vadd.f32 %v1230_v33, %v4538_v34  ;;  %998 = vadd.xlane.f32.xlu2 %v997_v30  ;;  %1108 = vmax.xlane.f32.xlu1 %v1107_v31  ;;  %4081 = vpow2.f32 %v990_v36 }
 0x210   :  { %v1098_v37 = vpop.f32.mrf.mxu2  ;;  %v1242_v38 = vsel %vm969_vm1, %v4645_v35, -inf }
 0x211   :  { %v4650_v39 = vadd.f32 %v1098_v37, %v4570_v48  ;;  %1243 = vmax.xlane.f32.xlu0 %v1242_v38  ;;  %v981_v57 = vpop.xlane.xlu1 %980 }
 0x212   :  { %v985_v62 = vsub.f32 %v4585_v59, %v981_v57 }
 0x213   :  { %v1110_v23 = vsel %vm969_vm1, %v4650_v39, -inf }
 0x214   :  { %v4659_v46 = vpop.eup %4081  ;;  %v992_v3 = vmul.f32 1.442695, %v985_v62 }
 0x215   :  { %v1233_v43 = vpop.f32.mrf.mxu0  ;;  %v1000_v50 = vsel %vm969_vm1, %v4659_v46, 0.0 }
 0x216   :  { %1111 = vmax.xlane.f32.xlu2 %v1110_v23  ;;  %v4662_v47 = vadd.f32 %v1233_v43, %v4553_v41  ;;  %4083 = vpow2.f32 %v992_v3 }
 0x218   :  { %v1101_v44 = vpop.f32.mrf.mxu2  ;;  %v1245_v17 = vsel %vm969_vm1, %v4662_v47, -inf }
 0x219   :  { %1105 = vmax.xlane.f32.xlu0 %v1104_v45  ;;  %v4685_v4 = vadd.f32 %v1101_v44, %v4582_v56 }
 0x21b   :  { %v1113_v59 = vsel %vm969_vm1, %v4685_v4, -inf }
 0x21c   :  { %v4697_v32 = vpop.eup %4083 }
 0x21d   :  { %v1236_v49 = vpop.f32.mrf.mxu0  ;;  %v1003_v54 = vsel %vm969_vm1, %v4697_v32, 0.0 }
 0x21e   :  { %v4667_v52 = vadd.f32 %v1236_v49, %v4570_v48  ;;  %1001 = vadd.xlane.f32.xlu2 %v1000_v50 }
 0x220   :  { %v1367_v55 = vpop.f32.mrf.mxu2  ;;  %v1248_v53 = vsel %vm969_vm1, %v4667_v52, -inf }
 0x221   :  { %1246 = vmax.xlane.f32.xlu0 %v1245_v17  ;;  %1249 = vmax.xlane.f32.xlu1 %v1248_v53  ;;  %v4674_v58 = vadd.f32 %v1367_v55, %v4538_v34 }
 0x223   :  { %v1379_v0 = vsel %vm969_vm1, %v4674_v58, -inf }
 0x225   :  { %v1239_v60 = vpop.f32.mrf.mxu0 }
 0x226   :  { %v4677_v61 = vadd.f32 %v1239_v60, %v4582_v56 }
 0x228   :  { %v1370_v63 = vpop.f32.mrf.mxu2  ;;  %v1251_v2 = vsel %vm969_vm1, %v4677_v61, -inf }
 0x229   :  { %1380 = vmax.xlane.f32.xlu0 %v1379_v0  ;;  %1252 = vmax.xlane.f32.xlu1 %v1251_v2  ;;  %v4716_v21 = vadd.f32 %v1370_v63, %v4553_v41 }
 0x22b   :  { %v1382_v24 = vsel %vm969_vm1, %v4716_v21, -inf }
 0x22d   :  { %v1499_v5 = vpop.f32.mrf.mxu0 }
 0x22e   :  { %v4688_v20 = vadd.f32 %v1499_v5, %v4538_v34 }
 0x230   :  { %v1373_v51 = vpop.f32.mrf.mxu2  ;;  %v1511_v7 = vsel %vm969_vm1, %v4688_v20, -inf }
 0x231   :  { %1114 = vmax.xlane.f32.xlu1 %v1113_v59  ;;  %1512 = vmax.xlane.f32.xlu2 %v1511_v7  ;;  %v4695_v8 = vadd.f32 %v1373_v51, %v4570_v48 }
 0x233   :  { %v1385_v10 = vsel %vm969_vm1, %v4695_v8, -inf }
 0x235   :  { %v1502_v12 = vpop.f32.mrf.mxu0 }
 0x236   :  { %v4704_v11 = vadd.f32 %v1502_v12, %v4553_v41 }
 0x238   :  { %v1376_v9 = vpop.f32.mrf.mxu2  ;;  %v1514_v19 = vsel %vm969_vm1, %v4704_v11, -inf }
 0x239   :  { %1386 = vmax.xlane.f32.xlu1 %v1385_v10  ;;  %1004 = vadd.xlane.f32.xlu2 %v1003_v54  ;;  %v4707_v42 = vadd.f32 %v1376_v9, %v4582_v56 }
 0x23b   :  { %v1388_v18 = vsel %vm969_vm1, %v4707_v42, -inf }
 0x23d   :  { %1423 = vrot.lane.b32.xlu0 %v4512_v15, %s4315_s7  ;;  %v1505_v22 = vpop.f32.mrf.mxu0 }
 0x23e   :  { %v4721_v25 = vadd.f32 %v1505_v22, %v4570_v48 }
 0x240   :  { %v1633_v14 = vpop.f32.mrf.mxu2  ;;  %v1517_v28 = vsel %vm969_vm1, %v4721_v25, -inf }
 0x241   :  { %1389 = vmax.xlane.f32.xlu1 %v1388_v18  ;;  %1515 = vmax.xlane.f32.xlu2 %v1514_v19  ;;  %v4741_v23 = vadd.f32 %v1633_v14, %v4538_v34 }
 0x243   :  { %v1645_v45 = vsel %vm969_vm1, %v4741_v23, -inf }
 0x245   :  { %v1508_v6 = vpop.f32.mrf.mxu0 }
 0x246   :  { %v4731_v31 = vadd.f32 %v1508_v6, %v4582_v56 }
 0x248   :  { %v1636_v16 = vpop.f32.mrf.mxu2  ;;  %v1520_v37 = vsel %vm969_vm1, %v4731_v31, -inf }
 0x249   :  { %1383 = vmax.xlane.f32.xlu2 %v1382_v24  ;;  %v4749_v50 = vadd.f32 %v1636_v16, %v4553_v41 }
 0x24b   :  { %v1648_v17 = vsel %vm969_vm1, %v4749_v50, -inf }
 0x24d   :  { %v1771_v62 = vpop.f32.mrf.mxu0 }
 0x24e   :  { %v4761_v63 = vadd.f32 %v1771_v62, %v4538_v34 }
 0x250   :  { %v1639_v26 = vpop.f32.mrf.mxu2  ;;  %v1783_v0 = vsel %vm969_vm1, %v4761_v63, -inf }
 0x251   :  { %v4726_v33 = vadd.f32 %v1639_v26, %v4570_v48  ;;  %1518 = vmax.xlane.f32.xlu2 %v1517_v28 }
 0x253   :  { %v1651_v30 = vsel %vm969_vm1, %v4726_v33, -inf }
 0x254   :  { %1652 = vmax.xlane.f32.xlu1 %v1651_v30 }
 0x255   :  { %v1774_v59 = vpop.f32.mrf.mxu0 }
 0x256   :  { %v4771_v7 = vadd.f32 %v1774_v59, %v4553_v41 }
 0x258   :  { %v1642_v36 = vpop.f32.mrf.mxu2  ;;  %v1786_v54 = vsel %vm969_vm1, %v4771_v7, -inf }
 0x259   :  { %v4736_v38 = vadd.f32 %v1642_v36, %v4582_v56  ;;  %1521 = vmax.xlane.f32.xlu2 %v1520_v37 }
 0x25b   :  { %v1654_v43 = vsel %vm969_vm1, %v4736_v38, -inf }
 0x25c   :  { %1655 = vmax.xlane.f32.xlu1 %v1654_v43 }
 0x260   :  { %v1908_v44 = vpop.f32.mrf.mxu2 }
 0x261   :  { %v4746_v49 = vadd.f32 %v1908_v44, %v4538_v34  ;;  %1646 = vmax.xlane.f32.xlu2 %v1645_v45 }
 0x263   :  { %v1920_v55 = vsel %vm969_vm1, %v4746_v49, -inf }
 0x264   :  { %1921 = vmax.xlane.f32.xlu1 %v1920_v55 }
 0x267   :  { %1649 = vmax.xlane.f32.xlu0 %v1648_v17 }
 0x268   :  { %v1911_v53 = vpop.f32.mrf.mxu2 }
 0x269   :  { %v4756_v57 = vadd.f32 %v1911_v53, %v4553_v41 }
 0x26b   :  { %v1923_v60 = vsel %vm969_vm1, %v4756_v57, -inf }
 0x26c   :  { %1924 = vmax.xlane.f32.xlu1 %v1923_v60 }
 0x270   :  { %v1914_v2 = vpop.f32.mrf.mxu2 }
 0x271   :  { %v4766_v3 = vadd.f32 %v1914_v2, %v4570_v48 }
 0x273   :  { %v1926_v51 = vsel %vm969_vm1, %v4766_v3, -inf }
 0x274   :  { %1784 = vmax.xlane.f32.xlu1 %v1783_v0 }
 0x279   :  { %v996_v5 = vpop.xlane.xlu1 %995 }
 0x27a   :  { %4085 = vrcp.f32 %v996_v5 }
 0x27c   :  { %1927 = vmax.xlane.f32.xlu1 %v1926_v51  ;;  %v1917_v51 = vpop.f32.mrf.mxu2 }
 0x280   :  { %v4086_v34 = vpop.eup %4085 }
 0x281   :  { %v1010_v9 = vmul.f32 %v4086_v34, %v4630_v1  ;;  %v999_v10 = vpop.xlane.xlu2 %998  ;;  %v1109_v1 = vpop.xlane.xlu1 %1108 }
 0x282   :  { %4087 = vrcp.f32 %v999_v10  ;;  %v1117_v28 = vsub.f32 %v4635_v27, %v1109_v1 }
 0x283   :  { %3545 = vmatmul.msk.f32.vlgmr.msrb.gmra.mxu1 %vm969_vm1, %v1010_v9 }
 0x284   :  { %v1244_v12 = vpop.xlane.xlu0 %1243  ;;  %1787 = vmax.xlane.f32.xlu1 %v1786_v54  ;;  %v1122_v36 = vmul.f32 1.442695, %v1117_v28 }
 0x285   :  { %v1254_v14 = vsub.f32 %v4645_v35, %v1244_v12 }
 0x287   :  { %v1258_v18 = vmul.f32 1.442695, %v1254_v14 }
 0x288   :  { %v4088_v19 = vpop.eup %4087 }
 0x289   :  { %4089 = vpow2.f32 %v1258_v18  ;;  %v1112_v22 = vpop.xlane.xlu2 %1111  ;;  %v1011_v41 = vmul.f32 %v4088_v19, %v4637_v29 }
 0x28b   :  { %3546 = vmatmul.msk.f32.gmra.mxu1 %vm969_vm1, %v1011_v41  ;;  %v1777_v41 = vpop.f32.mrf.mxu0 }
 0x28c   :  { %v1106_v16 = vpop.xlane.xlu0 %1105 }
 0x28d   :  { %v1116_v24 = vsub.f32 %v4653_v40, %v1106_v16  ;;  %v1118_v40 = vsub.f32 %v4650_v39, %v1112_v22 }
 0x28f   :  { %v4781_v26 = vpop.eup %4089  ;;  %v1120_v6 = vmul.f32 1.442695, %v1116_v24  ;;  %v1124_v53 = vmul.f32 1.442695, %v1118_v40 }
 0x290   :  { %v1266_v35 = vsel %vm969_vm1, %v4781_v26, 0.0 }
 0x291   :  { %4091 = vpow2.f32 %v1120_v6  ;;  %1267 = vadd.xlane.f32.xlu2 %v1266_v35  ;;  %v1002_v30 = vpop.xlane.xlu2 %1001 }
 0x292   :  { %4093 = vrcp.f32 %v1002_v30 }
 0x293   :  { %4095 = vpow2.f32 %v1122_v36 }
 0x294   :  { %v1247_v29 = vpop.xlane.xlu0 %1246  ;;  %v4786_v37 = vpop.xlane.xlu1 %1249 }
 0x295   :  { %v1255_v43 = vsub.f32 %v4662_v47, %v1247_v29 }
 0x297   :  { %v4789_v44 = vpop.eup %4091  ;;  %v1260_v27 = vmul.f32 1.442695, %v1255_v43 }
 0x298   :  { %v4094_v45 = vpop.eup %4093  ;;  %v1128_v55 = vsel %vm969_vm1, %v4789_v44, 0.0 }
 0x299   :  { %4097 = vpow2.f32 %v1260_v27  ;;  %1129 = vadd.xlane.f32.xlu2 %v1128_v55  ;;  %v1012_v17 = vmul.f32 %v4094_v45, %v4659_v46  ;;  %v4796_v62 = vpop.eup %4095  ;;  %v4806_v46 = vadd.f32 %v1917_v51, %v4582_v56  ;;  %v1780_v45 = vpop.f32.mrf.mxu0 }
 0x29a   :  { %4099 = vpow2.f32 %v1124_v53  ;;  %v1131_v5 = vsel %vm969_vm1, %v4796_v62, 0.0 }
 0x29b   :  { %3547 = vmatmul.msk.f32.gmra.mxu1 %vm969_vm1, %v1012_v17  ;;  %v1929_v19 = vsel %vm969_vm1, %v4806_v46, -inf  ;;  %v4841_v17 = vadd.f32 %v1780_v45, %v4582_v56 }
 0x29c   :  { %v1253_v60 = vpop.xlane.xlu1 %1252  ;;  %v1381_v9 = vpop.xlane.xlu0 %1380 }
 0x29d   :  { %v1257_v47 = vsub.f32 %v4677_v61, %v1253_v60  ;;  %v1391_v18 = vsub.f32 %v4674_v58, %v1381_v9 }
 0x29f   :  { %v4799_v0 = vpop.eup %4097  ;;  %v1264_v39 = vmul.f32 1.442695, %v1257_v47  ;;  %v1395_v16 = vmul.f32 1.442695, %v1391_v18 }
 0x2a0   :  { %v1269_v2 = vsel %vm969_vm1, %v4799_v0, 0.0  ;;  %v4808_v61 = vpop.eup %4099 }
 0x2a1   :  { %1270 = vadd.xlane.f32.xlu0 %v1269_v2  ;;  %1132 = vadd.xlane.f32.xlu2 %v1131_v5  ;;  %4101 = vpow2.f32 %v1264_v39  ;;  %v1134_v22 = vsel %vm969_vm1, %v4808_v61, 0.0  ;;  %v1792_v2 = vsel %vm969_vm1, %v4841_v17, -inf }
 0x2a4   :  { %v1115_v59 = vpop.xlane.xlu1 %1114  ;;  %v1513_v34 = vpop.xlane.xlu2 %1512 }
 0x2a5   :  { %v1119_v10 = vsub.f32 %v4685_v4, %v1115_v59  ;;  %v1523_v12 = vsub.f32 %v4688_v20, %v1513_v34  ;;  %v4822_v20 = vadd.f32 %v1777_v41, %v4570_v48 }
 0x2a7   :  { %v1126_v54 = vmul.f32 1.442695, %v1119_v10  ;;  %v4812_v14 = vpop.eup %4101  ;;  %v1527_v4 = vmul.f32 1.442695, %v1523_v12  ;;  %v1789_v6 = vsel %vm969_vm1, %v4822_v20, -inf }
 0x2a8   :  { %v1275_v1 = vsel %vm969_vm1, %v4812_v14, 0.0 }
 0x2a9   :  { %4103 = vpow2.f32 %v1126_v54  ;;  %1930 = vmax.xlane.f32.xlu0 %v1929_v19  ;;  %1135 = vadd.xlane.f32.xlu2 %v1134_v22  ;;  %v1256_v22 = vsub.f32 %v4667_v52, %v4786_v37 }
 0x2aa   :  { %1276 = vadd.xlane.f32.xlu1 %v1275_v1 }
 0x2ac   :  { %v1005_v58 = vpop.xlane.xlu2 %1004  ;;  %v1387_v43 = vpop.xlane.xlu1 %1386 }
 0x2ad   :  { %4105 = vrcp.f32 %v1005_v58  ;;  %v1393_v60 = vsub.f32 %v4695_v8, %v1387_v43  ;;  %v1262_v58 = vmul.f32 1.442695, %v1256_v22 }
 0x2ae   :  { %4107 = vpow2.f32 %v1527_v4 }
 0x2af   :  { %v4824_v24 = vpop.eup %4103  ;;  %v1424_v28 = vpop.permute.xlu0 %1423  ;;  %4109 = vpow2.f32 %v1395_v16  ;;  %v1399_v5 = vmul.f32 1.442695, %v1393_v60 }
 0x2b0   :  { %1453 = vmatpush.msra.mxu3 %v1424_v28  ;;  %v1137_v35 = vsel %vm969_vm1, %v4824_v24, 0.0 }
 0x2b1   :  { %1790 = vmax.xlane.f32.xlu0 %v1789_v6 }
 0x2b2   :  { %1138 = vadd.xlane.f32.xlu1 %v1137_v35 }
 0x2b3   :  { %v4106_v30 = vpop.eup %4105 }
 0x2b4   :  { %v1516_v48 = vpop.xlane.xlu2 %1515  ;;  %v1013_v36 = vmul.f32 %v4106_v30, %v4697_v32  ;;  %v4831_v29 = vpop.eup %4107 }
 0x2b5   :  { %v4833_v40 = vpop.eup %4109  ;;  %v1535_v27 = vsel %vm969_vm1, %v4831_v29, 0.0  ;;  %v1390_v47 = vpop.xlane.xlu1 %1389 }
 0x2b6   :  { %3548 = vmatmul.msk.f32.gmra.mxu1 %vm969_vm1, %v1013_v36  ;;  %v1403_v55 = vsel %vm969_vm1, %v4833_v40, 0.0  ;;  %v1394_v56 = vsub.f32 %v4707_v42, %v1390_v47 }
 0x2b8   :  { %v1401_v34 = vmul.f32 1.442695, %v1394_v56 }
 0x2b9   :  { %1536 = vadd.xlane.f32.xlu0 %v1535_v27 }
 0x2ba   :  { %1404 = vadd.xlane.f32.xlu1 %v1403_v55 }
 0x2bc   :  { %v1384_v32 = vpop.xlane.xlu2 %1383 }
 0x2bd   :  { %v1392_v53 = vsub.f32 %v4716_v21, %v1384_v32 }
 0x2bf   :  { %v1397_v39 = vmul.f32 1.442695, %v1392_v53 }
 0x2c1   :  { %4111 = vpow2.f32 %v1397_v39  ;;  %1286 = vrot.lane.b32.xlu2 %v4512_v15, %s4316_s8  ;;  %1793 = vmax.xlane.f32.xlu0 %v1792_v2 }
 0x2c2   :  { %4113 = vpow2.f32 %v1399_v5 }
 0x2c3   :  { %4115 = vpow2.f32 %v1401_v34 }
 0x2c4   :  { %v1519_v51 = vpop.xlane.xlu2 %1518 }
 0x2c5   :  { %v1525_v28 = vsub.f32 %v4721_v25, %v1519_v51 }
 0x2c7   :  { %v4849_v59 = vpop.eup %4111  ;;  %v1653_v21 = vpop.xlane.xlu1 %1652  ;;  %v1531_v37 = vmul.f32 1.442695, %v1525_v28 }
 0x2c8   :  { %v1406_v8 = vsel %vm969_vm1, %v4849_v59, 0.0  ;;  %v4854_v10 = vpop.eup %4113 }
 0x2c9   :  { %1407 = vadd.xlane.f32.xlu1 %v1406_v8  ;;  %v1409_v15 = vsel %vm969_vm1, %v4854_v10, 0.0  ;;  %v4860_v18 = vpop.eup %4115 }
 0x2ca   :  { %v1412_v41 = vsel %vm969_vm1, %v4860_v18, 0.0 }
 0x2cc   :  { %v1522_v9 = vpop.xlane.xlu2 %1521 }
 0x2cf   :  { %v4856_v54 = vpop.xlane.xlu1 %1655 }
 0x2d1   :  { %1410 = vadd.xlane.f32.xlu1 %v1409_v15 }
 0x2d4   :  { %v1647_v12 = vpop.xlane.xlu2 %1646 }
 0x2d5   :  { %v1657_v42 = vsub.f32 %v4741_v23, %v1647_v12  ;;  %v1524_v23 = vsub.f32 %v4704_v11, %v1516_v48  ;;  %v1659_v11 = vsub.f32 %v4726_v33, %v1653_v21 }
 0x2d7   :  { %v1661_v19 = vmul.f32 1.442695, %v1657_v42  ;;  %v1922_v1 = vpop.xlane.xlu1 %1921  ;;  %v1529_v36 = vmul.f32 1.442695, %v1524_v23  ;;  %v1665_v32 = vmul.f32 1.442695, %v1659_v11 }
 0x2d8   :  { %v1932_v56 = vsub.f32 %v4746_v49, %v1922_v1 }
 0x2d9   :  { %4117 = vpow2.f32 %v1661_v19  ;;  %1413 = vadd.xlane.f32.xlu1 %v1412_v41 }
 0x2da   :  { %v1650_v4 = vpop.xlane.xlu0 %1649 }
 0x2db   :  { %v1658_v16 = vsub.f32 %v4749_v50, %v1650_v4  ;;  %v1526_v50 = vsub.f32 %v4731_v31, %v1522_v9 }
 0x2dd   :  { %v1663_v6 = vmul.f32 1.442695, %v1658_v16  ;;  %v1533_v48 = vmul.f32 1.442695, %v1526_v50  ;;  %v1660_v16 = vsub.f32 %v4736_v38, %v4856_v54 }
 0x2df   :  { %v4869_v35 = vpop.eup %4117  ;;  %4119 = vpow2.f32 %v1663_v6  ;;  %v1925_v30 = vpop.xlane.xlu1 %1924 }
 0x2e0   :  { %4121 = vpow2.f32 %v1262_v58  ;;  %v1669_v52 = vsel %vm969_vm1, %v4869_v35, 0.0  ;;  %v1933_v34 = vsub.f32 %v4756_v57, %v1925_v30 }
 0x2e1   :  { %1670 = vadd.xlane.f32.xlu1 %v1669_v52  ;;  %4123 = vpow2.f32 %v1531_v37  ;;  %v1667_v37 = vmul.f32 1.442695, %v1660_v16 }
 0x2e2   :  { %4125 = vpow2.f32 %v1529_v36  ;;  %v1938_v15 = vmul.f32 1.442695, %v1933_v34 }
 0x2e3   :  { %4127 = vpow2.f32 %v1533_v48 }
 0x2e4   :  { %4129 = vpow2.f32 %v1665_v32 }
 0x2e5   :  { %v4874_v43 = vpop.eup %4119 }
 0x2e6   :  { %v4877_v25 = vpop.eup %4121  ;;  %v1672_v27 = vsel %vm969_vm1, %v4874_v43, 0.0 }
 0x2e7   :  { %1673 = vadd.xlane.f32.xlu0 %v1672_v27  ;;  %v1272_v45 = vsel %vm969_vm1, %v4877_v25, 0.0  ;;  %v4884_v55 = vpop.eup %4123  ;;  %v1785_v53 = vpop.xlane.xlu1 %1784 }
 0x2e8   :  { %v4886_v31 = vpop.eup %4125  ;;  %v1541_v60 = vsel %vm969_vm1, %v4884_v55, 0.0  ;;  %v1795_v47 = vsub.f32 %v4761_v63, %v1785_v53  ;;  %v1936_v63 = vmul.f32 1.442695, %v1932_v56 }
 0x2e9   :  { %v1538_v33 = vsel %vm969_vm1, %v4886_v31, 0.0  ;;  %v4893_v39 = vpop.eup %4127 }
 0x2ea   :  { %1273 = vadd.xlane.f32.xlu2 %v1272_v45  ;;  %v1799_v2 = vmul.f32 1.442695, %v1795_v47  ;;  %v4895_v5 = vpop.eup %4129  ;;  %v1544_v51 = vsel %vm969_vm1, %v4893_v39, 0.0 }
 0x2eb   :  { %v1675_v21 = vsel %vm969_vm1, %v4895_v5, 0.0 }
 0x2ec   :  { %4131 = vpow2.f32 %v1799_v2 }
 0x2ed   :  { %4133 = vpow2.f32 %v1936_v63 }
 0x2ee   :  { %4135 = vpow2.f32 %v1938_v15 }
 0x2ef   :  { %1542 = vadd.xlane.f32.xlu0 %v1541_v60  ;;  %v1928_v12 = vpop.xlane.xlu1 %1927 }
 0x2f0   :  { %v1934_v19 = vsub.f32 %v4766_v3, %v1928_v12 }
 0x2f2   :  { %1539 = vadd.xlane.f32.xlu2 %v1538_v33  ;;  %v4904_v8 = vpop.eup %4131  ;;  %v1940_v57 = vmul.f32 1.442695, %v1934_v19 }
 0x2f3   :  { %v1807_v9 = vsel %vm969_vm1, %v4904_v8, 0.0  ;;  %v4909_v42 = vpop.eup %4133 }
 0x2f4   :  { %v1944_v22 = vsel %vm969_vm1, %v4909_v42, 0.0  ;;  %v4916_v1 = vpop.eup %4135 }
 0x2f5   :  { %v1947_v4 = vsel %vm969_vm1, %v4916_v1, 0.0 }
 0x2f7   :  { %1545 = vadd.xlane.f32.xlu0 %v1544_v51  ;;  %v1788_v23 = vpop.xlane.xlu1 %1787 }
 0x2f8   :  { %v1796_v53 = vsub.f32 %v4771_v7, %v1788_v23 }
 0x2fa   :  { %1676 = vadd.xlane.f32.xlu2 %v1675_v21  ;;  %1690 = vrot.lane.b32.xlu1 %v4618_v13, %s4314_s0  ;;  %v1801_v56 = vmul.f32 1.442695, %v1796_v53 }
 0x302   :  { %1808 = vadd.xlane.f32.xlu2 %v1807_v9 }
 0x304   :  { %v1268_v49 = vpop.xlane.xlu2 %1267 }
 0x30a   :  { %1945 = vadd.xlane.f32.xlu2 %v1944_v22 }
 0x30b   :  { %1964 = vrot.lane.b32.xlu0 %v4618_v13, %s4315_s7 }
 0x30c   :  { %v1130_v41 = vpop.xlane.xlu2 %1129 }
 0x30d   :  { %4137 = vrcp.f32 %v1130_v41 }
 0x30e   :  { %4139 = vpow2.f32 %v1940_v57 }
 0x312   :  { %1948 = vadd.xlane.f32.xlu2 %v1947_v4 }
 0x313   :  { %v4138_v3 = vpop.eup %4137 }
 0x314   :  { %v1144_v58 = vmul.f32 %v4138_v3, %v4789_v44  ;;  %v1271_v28 = vpop.xlane.xlu0 %1270  ;;  %v1133_v6 = vpop.xlane.xlu2 %1132 }
 0x315   :  { %v4923_v52 = vpop.eup %4139  ;;  %4141 = vrcp.f32 %v1133_v6 }
 0x316   :  { %3554 = vmatmul.msk.f32.vlgmr.msrb.gmra.mxu3 %vm969_vm1, %v1144_v58  ;;  %v1950_v30 = vsel %vm969_vm1, %v4923_v52, 0.0  ;;  %4143 = vpow2.f32 %v1667_v37 }
 0x317   :  { %4145 = vrcp.f32 %v1268_v49 }
 0x31a   :  { %1951 = vadd.xlane.f32.xlu2 %v1950_v30 }
 0x31b   :  { %v4142_v38 = vpop.eup %4141 }
 0x31c   :  { %v1931_v54 = vpop.xlane.xlu0 %1930  ;;  %v1136_v36 = vpop.xlane.xlu2 %1135  ;;  %v1145_v27 = vmul.f32 %v4142_v38, %v4796_v62 }
 0x31d   :  { %v1935_v44 = vsub.f32 %v4806_v46, %v1931_v54  ;;  %v4929_v50 = vpop.xlane.xlu1 %1276  ;;  %4147 = vrcp.f32 %v1136_v36  ;;  %v4933_v48 = vpop.eup %4143 }
 0x31e   :  { %3555 = vmatmul.msk.f32.gmra.mxu3 %vm969_vm1, %v1145_v27  ;;  %v4146_v45 = vpop.eup %4145  ;;  %v1678_v60 = vsel %vm969_vm1, %v4933_v48, 0.0 }
 0x31f   :  { %v1942_v11 = vmul.f32 1.442695, %v1935_v44  ;;  %v1282_v46 = vmul.f32 %v4146_v45, %v4781_v26 }
 0x321   :  { %4149 = vpow2.f32 %v1942_v11 }
 0x322   :  { %4151 = vrcp.f32 %v1271_v28 }
 0x323   :  { %v4148_v32 = vpop.eup %4147 }
 0x324   :  { %v1791_v47 = vpop.xlane.xlu0 %1790  ;;  %1679 = vadd.xlane.f32.xlu1 %v1678_v60  ;;  %v1287_v33 = vpop.permute.xlu2 %1286  ;;  %v1146_v62 = vmul.f32 %v4148_v32, %v4808_v61 }
 0x325   :  { %v1797_v2 = vsub.f32 %v4822_v20, %v1791_v47  ;;  %v1139_v51 = vpop.xlane.xlu1 %1138  ;;  %1316 = vmatpush.msra.mxu1 %v1287_v33 }
 0x326   :  { %4153 = vrcp.f32 %v1139_v51  ;;  %3563 = vmatmul.msk.f32.vlgmr.msra.gmra.mxu1 %vm969_vm1, %v1282_v46  ;;  %3556 = vmatmul.msk.f32.gmra.mxu3 %vm969_vm1, %v1146_v62 }
 0x327   :  { %v1803_v7 = vmul.f32 1.442695, %v1797_v2  ;;  %1582 = vmatpush.msrb.mxu1 %v4618_v13  ;;  %v4944_v21 = vpop.eup %4149 }
 0x328   :  { %v4152_v26 = vpop.eup %4151  ;;  %v1953_v61 = vsel %vm969_vm1, %v4944_v21, 0.0 }
 0x329   :  { %4155 = vpow2.f32 %v1803_v7  ;;  %v1283_v34 = vmul.f32 %v4152_v26, %v4799_v0 }
 0x32a   :  { %4157 = vpow2.f32 %v1801_v56 }
 0x32c   :  { %v4154_v20 = vpop.eup %4153  ;;  %v1537_v63 = vpop.xlane.xlu0 %1536  ;;  %1954 = vadd.xlane.f32.xlu1 %v1953_v61 }
 0x32d   :  { %v1405_v9 = vpop.xlane.xlu1 %1404  ;;  %v1147_v15 = vmul.f32 %v4154_v20, %v4824_v24 }
 0x32e   :  { %4159 = vrcp.f32 %v1405_v9  ;;  %3564 = vmatmul.msk.f32.gmra.mxu1 %vm969_vm1, %v1283_v34 }
 0x32f   :  { %3557 = vmatmul.msk.f32.gmra.mxu3 %vm969_vm1, %v1147_v15  ;;  %v4952_v49 = vpop.eup %4155 }
 0x330   :  { %v4954_v12 = vpop.eup %4157  ;;  %v1813_v19 = vsel %vm969_vm1, %v4952_v49, 0.0 }
 0x331   :  { %v1810_v24 = vsel %vm969_vm1, %v4954_v12, 0.0 }
 0x332   :  { %1827 = vrot.lane.b32.xlu2 %v4618_v13, %s4316_s8 }
 0x334   :  { %v4160_v22 = vpop.eup %4159  ;;  %v1794_v0 = vpop.xlane.xlu0 %1793  ;;  %1814 = vadd.xlane.f32.xlu1 %v1813_v19 }
 0x335   :  { %v1419_v57 = vmul.f32 %v4160_v22, %v4833_v40  ;;  %v1798_v41 = vsub.f32 %v4841_v17, %v1794_v0  ;;  %1811 = vadd.xlane.f32.xlu0 %v1810_v24 }
 0x337   :  { %v1805_v4 = vmul.f32 1.442695, %v1798_v41  ;;  %3572 = vmatmul.msk.f32.vlgmr.msra.gmra.mxu3 %vm969_vm1, %v1419_v57 }
 0x339   :  { %4161 = vpow2.f32 %v1805_v4 }
 0x33c   :  { %v1408_v16 = vpop.xlane.xlu1 %1407 }
 0x33d   :  { %4163 = vrcp.f32 %v1408_v16 }
 0x33f   :  { %v4965_v13 = vpop.eup %4161 }
 0x340   :  { %v1816_v3 = vsel %vm969_vm1, %v4965_v13, 0.0 }
 0x341   :  { %1817 = vadd.xlane.f32.xlu1 %v1816_v3  ;;  %v1043_v3 = vpop.f32.mrf.mxu1 }
 0x343   :  { %v4164_v58 = vpop.eup %4163 }
 0x344   :  { %v1411_v28 = vpop.xlane.xlu1 %1410  ;;  %v1420_v6 = vmul.f32 %v4164_v58, %v4849_v59 }
 0x345   :  { %4165 = vrcp.f32 %v1411_v28 }
 0x346   :  { %3573 = vmatmul.msk.f32.gmra.mxu3 %vm969_vm1, %v1420_v6 }
 0x34b   :  { %v4166_v40 = vpop.eup %4165 }
 0x34c   :  { %v1414_v17 = vpop.xlane.xlu1 %1413  ;;  %v1421_v23 = vmul.f32 %v4166_v40, %v4854_v10 }
 0x34d   :  { %4167 = vrcp.f32 %v1414_v17 }
 0x34e   :  { %3574 = vmatmul.msk.f32.gmra.mxu3 %vm969_vm1, %v1421_v23 }
 0x353   :  { %v4168_v37 = vpop.eup %4167 }
 0x354   :  { %v1422_v30 = vmul.f32 %v4168_v37, %v4860_v18  ;;  %v1671_v54 = vpop.xlane.xlu1 %1670 }
 0x356   :  { %3575 = vmatmul.msk.f32.gmra.mxu3 %vm969_vm1, %v1422_v30 }
 0x35a   :  { %v1674_v36 = vpop.xlane.xlu0 %1673 }
 0x35d   :  { %v1274_v38 = vpop.xlane.xlu2 %1273 }
 0x35e   :  { %4169 = vrcp.f32 %v1274_v38 }
 0x35f   :  { %4171 = vrcp.f32 %v1671_v54 }
 0x360   :  { %4173 = vrcp.f32 %v4929_v50 }
 0x361   :  { %4175 = vrcp.f32 %v1674_v36 }
 0x362   :  { %v1543_v45 = vpop.xlane.xlu0 %1542  ;;  %4177 = vrcp.f32 %v1537_v63 }
 0x364   :  { %v4170_v59 = vpop.eup %4169 }
 0x365   :  { %v1540_v44 = vpop.xlane.xlu2 %1539  ;;  %v1284_v27 = vmul.f32 %v4170_v59, %v4877_v25  ;;  %v4172_v10 = vpop.eup %4171 }
 0x366   :  { %v4174_v11 = vpop.eup %4173  ;;  %v1685_v18 = vmul.f32 %v4172_v10, %v4869_v35 }
 0x367   :  { %3565 = vmatmul.msk.f32.gmra.mxu1 %vm969_vm1, %v1284_v27  ;;  %v1285_v60 = vmul.f32 %v4174_v11, %v4812_v14  ;;  %v4176_v50 = vpop.eup %4175 }
 0x368   :  { %v4178_v25 = vpop.eup %4177  ;;  %v1686_v46 = vmul.f32 %v4176_v50, %v4874_v43 }
 0x369   :  { %v1551_v47 = vmul.f32 %v4178_v25, %v4831_v29 }
 0x36a   :  { %v1546_v33 = vpop.xlane.xlu0 %1545 }
 0x36c   :  { %v1691_v32 = vpop.permute.xlu1 %1690 }
 0x36d   :  { %1720 = vmatpush.msrb.mxu3 %v1691_v32  ;;  %v1677_v53 = vpop.xlane.xlu2 %1676 }
 0x36e   :  { %3590 = vmatmul.msk.f32.vlgmr.msrb.gmra.mxu3 %vm969_vm1, %v1685_v18  ;;  %4179 = vrcp.f32 %v1677_v53 }
 0x36f   :  { %3566 = vmatmul.msk.f32.gmra.mxu1 %vm969_vm1, %v1285_v60  ;;  %4181 = vrcp.f32 %v1540_v44 }
 0x370   :  { %4183 = vrcp.f32 %v1543_v45 }
 0x371   :  { %4185 = vrcp.f32 %v1546_v33 }
 0x374   :  { %v4180_v35 = vpop.eup %4179 }
 0x375   :  { %v1809_v62 = vpop.xlane.xlu2 %1808  ;;  %v4182_v14 = vpop.eup %4181  ;;  %v1687_v2 = vmul.f32 %v4180_v35, %v4895_v5 }
 0x376   :  { %3591 = vmatmul.msk.f32.gmra.mxu3 %vm969_vm1, %v1686_v46  ;;  %v1552_v7 = vmul.f32 %v4182_v14, %v4886_v31  ;;  %v4184_v29 = vpop.eup %4183  ;;  %4187 = vrcp.f32 %v1809_v62 }
 0x377   :  { %3581 = vmatmul.msk.f32.vlgmr.msrb.gmra.mxu1 %vm969_vm1, %v1551_v47  ;;  %v1553_v26 = vmul.f32 %v4184_v29, %v4884_v55  ;;  %v4186_v61 = vpop.eup %4185 }
 0x378   :  { %v1554_v5 = vmul.f32 %v4186_v61, %v4893_v39  ;;  %v3614_v61 = vld [vmem:[#allocation5] sm:$0xf] }
 0x37c   :  { %v4188_v31 = vpop.eup %4187 }
 0x37d   :  { %v1965_v51 = vpop.permute.xlu0 %1964  ;;  %v1946_v56 = vpop.xlane.xlu2 %1945  ;;  %v1823_v63 = vmul.f32 %v4188_v31, %v4904_v8 }
 0x37e   :  { %3592 = vmatmul.msk.f32.gmra.mxu3 %vm969_vm1, %v1687_v2 }
 0x37f   :  { %1994 = vmatpush.msra.mxu3 %v1965_v51  ;;  %3582 = vmatmul.msk.f32.gmra.mxu1 %vm969_vm1, %v1552_v7 }
 0x385   :  { %v1949_v43 = vpop.xlane.xlu2 %1948 }
 0x387   :  { %3583 = vmatmul.msk.f32.gmra.mxu1 %vm969_vm1, %v1553_v26 }
 0x38d   :  { %v1952_v20 = vpop.xlane.xlu2 %1951 }
 0x38f   :  { %3584 = vmatmul.msk.f32.gmra.mxu1 %vm969_vm1, %v1554_v5 }
 0x395   :  { %v1828_v34 = vpop.permute.xlu2 %1827 }
 0x396   :  { %1857 = vmatpush.msra.mxu1 %v1828_v34 }
 0x397   :  { %v1680_v9 = vpop.xlane.xlu1 %1679  ;;  %3599 = vmatmul.msk.f32.vlgmr.msra.gmra.mxu1 %vm969_vm1, %v1823_v63 }
 0x398   :  { %4189 = vrcp.f32 %v1680_v9  ;;  %v3622_v9 = vld [vmem:[#allocation5 + $0x10] sm:$0xf] }
 0x399   :  { %v1181_v15 = vpop.f32.mrf.mxu3  ;;  %4191 = vrcp.f32 %v1946_v56 }
 0x39a   :  { %4193 = vrcp.f32 %v1949_v43 }
 0x39e   :  { %v4190_v55 = vpop.eup %4189 }
 0x39f   :  { %v1688_v19 = vmul.f32 %v4190_v55, %v4933_v48  ;;  %v1955_v22 = vpop.xlane.xlu1 %1954  ;;  %v4192_v0 = vpop.eup %4191 }
 0x3a0   :  { %v1960_v24 = vmul.f32 %v4192_v0, %v4909_v42  ;;  %v4194_v57 = vpop.eup %4193 }
 0x3a1   :  { %3593 = vmatmul.msk.f32.gmra.mxu3 %vm969_vm1, %v1688_v19  ;;  %v1184_v39 = vpop.f32.mrf.mxu3  ;;  %v1961_v48 = vmul.f32 %v4194_v57, %v4916_v1  ;;  %v1046_v1 = vpop.f32.mrf.mxu1  ;;  %v4005_v57 = vld [vmem:[#allocation5 + $0x24] sm:$0xf0] }
 0x3a2   :  { %v2010_v60 = vpack.c.bf16 %v1184_v39, %v1181_v15  ;;  %v2008_v25 = vpack.c.bf16 %v1046_v1, %v1043_v3  ;;  %v4003_v15 = vld [vmem:[#allocation5 + $0x14] sm:$0xf0]  ;;  %v3616_v3 = vld [vmem:[#allocation5 + $0x8] sm:$0xf0] }
 0x3a7   :  { %v1815_v41 = vpop.xlane.xlu1 %1814 }
 0x3a8   :  { %v1812_v8 = vpop.xlane.xlu0 %1811 }
 0x3a9   :  { %4195 = vrcp.f32 %v1812_v8  ;;  %3608 = vmatmul.msk.f32.vlgmr.msra.gmra.mxu3 %vm969_vm1, %v1960_v24  ;;  %v1187_v4 = vpop.f32.mrf.mxu3  ;;  %v1049_v36 = vpop.f32.mrf.mxu1  ;;  %v3630_v8 = vld [vmem:[#allocation5 + $0x20] sm:$0xf] }
 0x3aa   :  { %4197 = vrcp.f32 %v1952_v20  ;;  %v4001_v20 = vld [vmem:[#allocation5 + $0x4] sm:$0xf0] }
 0x3ab   :  { %4199 = vrcp.f32 %v1815_v41  ;;  %v3615_v5 = vor.u32 %v4001_v20, %v3614_v61  ;;  %v4016_v61 = vld [vmem:[#allocation5 + $0x84] sm:$0xf]  ;;  %v3680_v20 = vld [vmem:[#allocation5 + $0x88] sm:$0xf0] }
 0x3ac   :  { %4201 = vrcp.f32 %v1955_v22  ;;  %v3623_v22 = vor.u32 %v4003_v15, %v3622_v9 }
 0x3af   :  { %v4196_v16 = vpop.eup %4195 }
 0x3b0   :  { %v1824_v58 = vmul.f32 %v4196_v16, %v4954_v12  ;;  %v4198_v42 = vpop.eup %4197 }
 0x3b1   :  { %3609 = vmatmul.msk.f32.gmra.mxu3 %vm969_vm1, %v1961_v48  ;;  %v4200_v6 = vpop.eup %4199  ;;  %v1962_v17 = vmul.f32 %v4198_v42, %v4923_v52  ;;  %v1052_v59 = vpop.f32.mrf.mxu1  ;;  %v4000_v48 = vld [vmem:[#allocation5 + $0x4] sm:$0xf] }
 0x3b2   :  { %3600 = vmatmul.msk.f32.gmra.mxu1 %vm969_vm1, %v1824_v58  ;;  %v1190_v40 = vpop.f32.mrf.mxu3  ;;  %v1825_v23 = vmul.f32 %v4200_v6, %v4952_v49  ;;  %v4202_v12 = vpop.eup %4201  ;;  %v2009_v50 = vpack.c.bf16 %v1052_v59, %v1049_v36  ;;  %v3619_v42 = vor.u32 %v4000_v48, %v3616_v3  ;;  %v4007_v6 = vld [vmem:[#allocation5 + $0x34] sm:$0xf0]  ;;  %v4018_v3 = vld [vmem:[#allocation5 + $0x94] sm:$0xf] }
 0x3b3   :  { %v1963_v30 = vmul.f32 %v4202_v12, %v4944_v21  ;;  %v2011_v53 = vpack.c.bf16 %v1190_v40, %v1187_v4  ;;  %v3631_v4 = vor.u32 %v4005_v57, %v3630_v8  ;;  %v3646_v12 = vld [vmem:[#allocation5 + $0x40] sm:$0xf]  ;;  %v4011_v59 = vld [vmem:[#allocation5 + $0x54] sm:$0xf0]  ;;  %v3752_v8 = vld [vmem:[#allocation7 + $0x38] sm:$0xf0] }
 0x3b4   :  { %v1818_v28 = vpop.xlane.xlu1 %1817  ;;  %v3686_v57 = vld [vmem:[#allocation5 + $0x90] sm:$0xf] }
 0x3b5   :  { %4203 = vrcp.f32 %v1818_v28  ;;  %v3638_v28 = vld [vmem:[#allocation5 + $0x30] sm:$0xf] }
 0x3b6   :  { %v3639_v40 = vor.u32 %v4007_v6, %v3638_v28  ;;  %v4037_v28 = vld [vmem:[#allocation7 + $0x24] sm:$0xf0]  ;;  %v4036_v6 = vld [vmem:[#allocation7 + $0x24] sm:$0xf] }
 0x3b9   :  { %3610 = vmatmul.msk.f32.gmra.mxu3 %vm969_vm1, %v1962_v17  ;;  %v1318_v44 = vpop.f32.mrf.mxu1  ;;  %v4002_v17 = vld [vmem:[#allocation5 + $0x14] sm:$0xf] }
 0x3ba   :  { %3601 = vmatmul.msk.f32.gmra.mxu1 %vm969_vm1, %v1825_v23  ;;  %v1455_v54 = vpop.f32.mrf.mxu3  ;;  %v3624_v23 = vld [vmem:[#allocation5 + $0x18] sm:$0xf0] }
 0x3bb   :  { %v4204_v37 = vpop.eup %4203  ;;  %v3627_v1 = vor.u32 %v4002_v17, %v3624_v23 }
 0x3bc   :  { %v1826_v38 = vmul.f32 %v4204_v37, %v4965_v13  ;;  %v4009_v37 = vld [vmem:[#allocation5 + $0x44] sm:$0xf0] }
 0x3c1   :  { %3611 = vmatmul.msk.f32.gmra.mxu3 %vm969_vm1, %v1963_v30  ;;  %v1321_v11 = vpop.f32.mrf.mxu1  ;;  %v3647_v30 = vor.u32 %v4009_v37, %v3646_v12 }
 0x3c2   :  { %3602 = vmatmul.msk.f32.gmra.mxu1 %vm969_vm1, %v1826_v38  ;;  %v2012_v13 = vpack.c.bf16 %v1321_v11, %v1318_v44  ;;  %v4004_v38 = vld [vmem:[#allocation5 + $0x24] sm:$0xf]  ;;  %v4006_v44 = vld [vmem:[#allocation5 + $0x34] sm:$0xf] }
 0x3c3   :  { %v4008_v11 = vld [vmem:[#allocation5 + $0x44] sm:$0xf] }
 0x3c9   :  { %v1458_v52 = vpop.f32.mrf.mxu3 }
 0x3ca   :  { %v2014_v45 = vpack.c.bf16 %v1458_v52, %v1455_v54  ;;  %v3632_v54 = vld [vmem:[#allocation5 + $0x28] sm:$0xf0]  ;;  %v3654_v52 = vld [vmem:[#allocation5 + $0x50] sm:$0xf] }
 0x3cb   :  { %v3635_v36 = vor.u32 %v4004_v38, %v3632_v54 }
 0x3d1   :  { %v1461_v49 = vpop.f32.mrf.mxu3 }
 0x3d9   :  { %v1464_v27 = vpop.f32.mrf.mxu3 }
 0x3da   :  { %v2015_v10 = vpack.c.bf16 %v1464_v27, %v1461_v49  ;;  %v3655_v49 = vor.u32 %v4011_v59, %v3654_v52  ;;  %v3640_v27 = vld [vmem:[#allocation5 + $0x38] sm:$0xf0] }
 0x3dc   :  { %2216 = vmatpush.bf16.msrb.mxu0 %v2015_v10  ;;  %v3643_v10 = vor.u32 %v4006_v44, %v3640_v27  ;;  %v3694_v44 = vld [vmem:[#allocation5 + $0xa0] sm:$0xf]  ;;  %v4021_v27 = vld [vmem:[#allocation5 + $0xa4] sm:$0xf0] }
 0x3e0   :  { %2217 = vmatpush.bf16.msrb.mxu0 %v2014_v45  ;;  %v3648_v45 = vld [vmem:[#allocation5 + $0x48] sm:$0xf0] }
 0x3e4   :  { %v1324_v18 = vpop.f32.mrf.mxu1 }
 0x3ec   :  { %v1327_v21 = vpop.f32.mrf.mxu1 }
 0x3ed   :  { %v2013_v32 = vpack.c.bf16 %v1327_v21, %v1324_v18  ;;  %v3651_v18 = vor.u32 %v4008_v11, %v3648_v45  ;;  %v4010_v21 = vld [vmem:[#allocation5 + $0x54] sm:$0xf] }
 0x3ef   :  { %2218 = vmatpush.bf16.msrb.mxu0 %v2013_v32  ;;  %v3656_v32 = vld [vmem:[#allocation5 + $0x58] sm:$0xf0] }
 0x3f1   :  { %v1722_v47 = vpop.f32.mrf.mxu3 }
 0x3f3   :  { %2219 = vmatpush.bf16.msrb.mxu0 %v2012_v13  ;;  %v3659_v13 = vor.u32 %v4010_v21, %v3656_v32  ;;  %v3696_v21 = vld [vmem:[#allocation5 + $0xa8] sm:$0xf0] }
 0x3f4   :  { %v1584_v46 = vpop.f32.mrf.mxu1 }
 0x3f7   :  { %2220 = vmatpush.bf16.msrb.mxu0 %v2011_v53  ;;  %v3662_v53 = vld [vmem:[#allocation5 + $0x60] sm:$0xf] }
 0x3f9   :  { %v1725_v62 = vpop.f32.mrf.mxu3 }
 0x3fa   :  { %v2018_v41 = vpack.c.bf16 %v1725_v62, %v1722_v47  ;;  %v3670_v62 = vld [vmem:[#allocation5 + $0x70] sm:$0xf] }
 0x3fb   :  { %2221 = vmatpush.bf16.msrb.mxu0 %v2010_v60  ;;  %v4013_v60 = vld [vmem:[#allocation5 + $0x64] sm:$0xf0] }
 0x3fc   :  { %v1587_v33 = vpop.f32.mrf.mxu1 }
 0x3fd   :  { %v2016_v58 = vpack.c.bf16 %v1587_v33, %v1584_v46  ;;  %v3664_v46 = vld [vmem:[#allocation5 + $0x68] sm:$0xf0] }
 0x3ff   :  { %2222 = vmatpush.bf16.msrb.mxu0 %v2009_v50  ;;  %v3663_v50 = vor.u32 %v4013_v60, %v3662_v53 }
 0x401   :  { %v1728_v14 = vpop.f32.mrf.mxu3 }
 0x403   :  { %2223 = vmatpush.bf16.msrb.mxu0 %v2008_v25  ;;  %v4012_v25 = vld [vmem:[#allocation5 + $0x64] sm:$0xf] }
 0x404   :  { %v1590_v35 = vpop.f32.mrf.mxu1  ;;  %v3667_v47 = vor.u32 %v4012_v25, %v3664_v46  ;;  %v3770_v25 = vld [vmem:[#allocation7 + $0x10] sm:$0xf]  ;;  %v4035_v46 = vld [vmem:[#allocation7 + $0x14] sm:$0xf0] }
 0x406   :  { %2224 = vmatmul.bf16.vlgmr.msrb.gmra.mxu0 %v3615_v5 }
 0x40c   :  { %v1593_v2 = vpop.f32.mrf.mxu1 }
 0x40d   :  { %v2017_v16 = vpack.c.bf16 %v1593_v2, %v1590_v35  ;;  %v4015_v35 = vld [vmem:[#allocation5 + $0x74] sm:$0xf0]  ;;  %v4014_v2 = vld [vmem:[#allocation5 + $0x74] sm:$0xf] }
 0x414   :  { %v1859_v7 = vpop.f32.mrf.mxu1 }
 0x416   :  { %2229 = vmatmul.bf16.gmra.mxu0 %v3623_v22  ;;  %v4038_v22 = vld [vmem:[#allocation7 + $0x34] sm:$0xf] }
 0x424   :  { %v1731_v51 = vpop.f32.mrf.mxu3 }
 0x425   :  { %v2019_v24 = vpack.c.bf16 %v1731_v51, %v1728_v14  ;;  %v3671_v14 = vor.u32 %v4015_v35, %v3670_v62  ;;  %v3672_v51 = vld [vmem:[#allocation5 + $0x78] sm:$0xf0]  ;;  %v3762_v35 = vld [vmem:[#allocation7] sm:$0xf] }
 0x426   :  { %2234 = vmatmul.bf16.gmra.mxu0 %v3631_v4  ;;  %v3755_v4 = vor.u32 %v4038_v22, %v3752_v8  ;;  %v3772_v62 = vld [vmem:[#allocation7 + $0x18] sm:$0xf0] }
 0x428   :  { %2519 = vmatpush.bf16.msrb.mxu3 %v3755_v4 }
 0x42c   :  { %v1996_v56 = vpop.f32.mrf.mxu3 }
 0x42f   :  { %v1862_v43 = vpop.f32.mrf.mxu1 }
 0x430   :  { %v2020_v0 = vpack.c.bf16 %v1862_v43, %v1859_v7  ;;  %v4017_v43 = vld [vmem:[#allocation5 + $0x84] sm:$0xf0] }
 0x434   :  { %v1999_v29 = vpop.f32.mrf.mxu3 }
 0x435   :  { %v2022_v55 = vpack.c.bf16 %v1999_v29, %v1996_v56  ;;  %v3675_v56 = vor.u32 %v4014_v2, %v3672_v51  ;;  %v3678_v29 = vld [vmem:[#allocation5 + $0x80] sm:$0xf]  ;;  %v4032_v51 = vld [vmem:[#allocation7 + $0x4] sm:$0xf] }
 0x436   :  { %2239 = vmatmul.bf16.gmra.mxu0 %v3639_v40 }
 0x437   :  { %v1865_v31 = vpop.f32.mrf.mxu1 }
 0x43c   :  { %v2002_v26 = vpop.f32.mrf.mxu3 }
 0x43f   :  { %v1868_v19 = vpop.f32.mrf.mxu1 }
 0x440   :  { %v2021_v39 = vpack.c.bf16 %v1868_v19, %v1865_v31  ;;  %v3683_v31 = vor.u32 %v4016_v61, %v3680_v20  ;;  %v4039_v19 = vld [vmem:[#allocation7 + $0x34] sm:$0xf0] }
 0x444   :  { %v2005_v63 = vpop.f32.mrf.mxu3 }
 0x445   :  { %v2023_v34 = vpack.c.bf16 %v2005_v63, %v2002_v26  ;;  %v3679_v26 = vor.u32 %v4017_v43, %v3678_v29 }
 0x446   :  { %2244 = vmatmul.bf16.gmra.mxu0 %v3647_v30 }
 0x447   :  { %2305 = vmatpush.bf16.msrb.mxu1 %v2023_v34 }
 0x44b   :  { %2306 = vmatpush.bf16.msrb.mxu1 %v2022_v55  ;;  %v3750_v55 = vld [vmem:[#allocation7 + $0x30] sm:$0xf] }
 0x44f   :  { %2307 = vmatpush.bf16.msrb.mxu1 %v2021_v39 }
 0x453   :  { %2308 = vmatpush.bf16.msrb.mxu1 %v2020_v0 }
 0x456   :  { %2249 = vmatmul.bf16.gmra.mxu0 %v3655_v49 }
 0x457   :  { %2309 = vmatpush.bf16.msrb.mxu1 %v2019_v24  ;;  %v3751_v24 = vor.u32 %v4039_v19, %v3750_v55  ;;  %v3704_v55 = vld [vmem:[#allocation5 + $0xb8] sm:$0xf0] }
 0x459   :  { %2500 = vmatpush.bf16.msrb.mxu2 %v3751_v24 }
 0x45b   :  { %2310 = vmatpush.bf16.msrb.mxu1 %v2018_v41  ;;  %v4019_v41 = vld [vmem:[#allocation5 + $0x94] sm:$0xf0] }
 0x45f   :  { %2311 = vmatpush.bf16.msrb.mxu1 %v2017_v16  ;;  %v3687_v16 = vor.u32 %v4019_v41, %v3686_v57 }
 0x463   :  { %2312 = vmatpush.bf16.msrb.mxu1 %v2016_v58  ;;  %v3688_v58 = vld [vmem:[#allocation5 + $0x98] sm:$0xf0] }
 0x464   :  { %v3691_v30 = vor.u32 %v4018_v3, %v3688_v58  ;;  %v3710_v3 = vld [vmem:[#allocation5 + $0xc0] sm:$0xf]  ;;  %v4025_v58 = vld [vmem:[#allocation5 + $0xc4] sm:$0xf0] }
 0x466   :  { %2313 = vmatmul.bf16.vlgmr.msrb.gmra.mxu1 %v3619_v42  ;;  %2254 = vmatmul.bf16.gmra.mxu0 %v3663_v50  ;;  %v3742_v42 = vld [vmem:[#allocation7 + $0x20] sm:$0xf] }
 0x467   :  { %v3743_v23 = vor.u32 %v4037_v28, %v3742_v42  ;;  %v3711_v42 = vor.u32 %v4025_v58, %v3710_v3  ;;  %v4031_v3 = vld [vmem:[#allocation5 + $0xf4] sm:$0xf0] }
 0x469   :  { %2501 = vmatpush.bf16.msrb.mxu2 %v3743_v23 }
 0x476   :  { %2318 = vmatmul.bf16.gmra.mxu1 %v3627_v1  ;;  %2259 = vmatmul.bf16.gmra.mxu0 %v3671_v14  ;;  %v3744_v1 = vld [vmem:[#allocation7 + $0x28] sm:$0xf0]  ;;  %v4033_v14 = vld [vmem:[#allocation7 + $0x4] sm:$0xf0] }
 0x477   :  { %v3747_v12 = vor.u32 %v4036_v6, %v3744_v1  ;;  %v4024_v6 = vld [vmem:[#allocation5 + $0xc4] sm:$0xf] }
 0x479   :  { %2520 = vmatpush.bf16.msrb.mxu3 %v3747_v12 }
 0x483   :  { %v2225_v33 = vpop.f32.mrf.mxu0 }
 0x486   :  { %2323 = vmatmul.bf16.gmra.mxu1 %v3635_v36  ;;  %2264 = vmatmul.bf16.gmra.mxu0 %v3679_v26 }
 0x48b   :  { %v2227_v7 = vpop.f32.mrf.mxu0 }
 0x493   :  { %v2230_v5 = vpop.f32.mrf.mxu0 }
 0x496   :  { %2328 = vmatmul.bf16.gmra.mxu1 %v3643_v10  ;;  %2269 = vmatmul.bf16.gmra.mxu0 %v3687_v16  ;;  %v3695_v10 = vor.u32 %v4021_v27, %v3694_v44  ;;  %v3782_v44 = vld [vmem:[#allocation7 + $0x40] sm:$0xf]  ;;  %v4041_v27 = vld [vmem:[#allocation7 + $0x44] sm:$0xf0] }
 0x49b   :  { %v2232_v9 = vpop.f32.mrf.mxu0 }
 0x4a3   :  { %v2235_v36 = vpop.f32.mrf.mxu0 }
 0x4a6   :  { %2333 = vmatmul.bf16.gmra.mxu1 %v3651_v18  ;;  %2274 = vmatmul.bf16.gmra.mxu0 %v3695_v10  ;;  %v4020_v18 = vld [vmem:[#allocation5 + $0xa4] sm:$0xf] }
 0x4a7   :  { %v3699_v60 = vor.u32 %v4020_v18, %v3696_v21  ;;  %v3783_v18 = vor.u32 %v4041_v27, %v3782_v44 }
 0x4ab   :  { %v2237_v45 = vpop.f32.mrf.mxu0 }
 0x4b3   :  { %v2240_v43 = vpop.f32.mrf.mxu0 }
 0x4b6   :  { %2338 = vmatmul.bf16.gmra.mxu1 %v3659_v13 }
 0x4c6   :  { %2343 = vmatmul.bf16.gmra.mxu1 %v3667_v47  ;;  %v4034_v47 = vld [vmem:[#allocation7 + $0x14] sm:$0xf] }
 0x4c7   :  { %v3775_v2 = vor.u32 %v4034_v47, %v3772_v62  ;;  %v3720_v47 = vld [vmem:[#allocation5 + $0xd8] sm:$0xf0] }
 0x4c9   :  { %2593 = vmatpush.bf16.msra.mxu3 %v3775_v2 }
 0x4d6   :  { %2348 = vmatmul.bf16.gmra.mxu1 %v3675_v56  ;;  %v3764_v56 = vld [vmem:[#allocation7 + $0x8] sm:$0xf0] }
 0x4d7   :  { %v3767_v26 = vor.u32 %v4032_v51, %v3764_v56  ;;  %v3726_v51 = vld [vmem:[#allocation5 + $0xe0] sm:$0xf]  ;;  %v4029_v56 = vld [vmem:[#allocation5 + $0xe4] sm:$0xf0] }
 0x4d9   :  { %2594 = vmatpush.bf16.msra.mxu3 %v3767_v26 }
 0x4e3   :  { %v2314_v63 = vpop.f32.mrf.mxu1 }
 0x4e4   :  { %v2315_v34 = vadd.f32 %v2314_v63, %v2225_v33  ;;  %v3771_v33 = vor.u32 %v4035_v46, %v3770_v25  ;;  %v4023_v63 = vld [vmem:[#allocation5 + $0xb4] sm:$0xf0]  ;;  %v4026_v46 = vld [vmem:[#allocation5 + $0xd4] sm:$0xf] }
 0x4e6   :  { %2353 = vmatmul.bf16.gmra.mxu1 %v3683_v31  ;;  %v2394_v39 = vpack.c.bf16 %v2315_v34, %v2315_v34  ;;  %2574 = vmatpush.bf16.msra.mxu2 %v3771_v33  ;;  %v3702_v31 = vld [vmem:[#allocation5 + $0xb0] sm:$0xf]  ;;  %v3723_v33 = vor.u32 %v4026_v46, %v3720_v47  ;;  %v4048_v47 = vld [vmem:[#allocation7 + $0x84] sm:$0xf] }
 0x4e7   :  { %v3703_v34 = vor.u32 %v4023_v63, %v3702_v31  ;;  %v4046_v31 = vld [vmem:[#allocation7 + $0x74] sm:$0xf] }
 0x4e8   :  { %v2536_v40 = vunpack.c.l.b16 %v2394_v39 }
 0x4e9   :  { %2279 = vmatmul.bf16.gmra.mxu0 %v3703_v34  ;;  %v3812_v34 = vld [vmem:[#allocation7 + $0x78] sm:$0xf0] }
 0x4eb   :  { %v2316_v15 = vpop.f32.mrf.mxu1 }
 0x4ec   :  { %v2317_v0 = vadd.f32 %v2316_v15, %v2227_v7  ;;  %v3763_v7 = vor.u32 %v4033_v14, %v3762_v35  ;;  %v4022_v15 = vld [vmem:[#allocation5 + $0xb4] sm:$0xf] }
 0x4ed   :  { %v3707_v24 = vor.u32 %v4022_v15, %v3704_v55  ;;  %v4045_v15 = vld [vmem:[#allocation7 + $0x64] sm:$0xf0] }
 0x4ee   :  { %v2395_v48 = vpack.c.bf16 %v2317_v0, %v2317_v0  ;;  %2575 = vmatpush.bf16.msra.mxu2 %v3763_v7  ;;  %v2242_v0 = vpop.f32.mrf.mxu0  ;;  %v3727_v7 = vor.u32 %v4029_v56, %v3726_v51 }
 0x4f0   :  { %v2537_v17 = vunpack.c.l.b16 %v2395_v48 }
 0x4f2   :  { %v5012_v37 = vpack.c.b16 %v2537_v17, %v2536_v40  ;;  %v3712_v40 = vld [vmem:[#allocation5 + $0xc8] sm:$0xf0] }
 0x4f3   :  { %v2319_v38 = vpop.f32.mrf.mxu1  ;;  %v3715_v12 = vor.u32 %v4024_v6, %v3712_v40  ;;  %v3736_v6 = vld [vmem:[#allocation5 + $0xf8] sm:$0xf0] }
 0x4f4   :  { %v2320_v54 = vadd.f32 %v2319_v38, %v2230_v5 }
 0x4f6   :  { %2358 = vmatmul.bf16.gmra.mxu1 %v3691_v30  ;;  %v2396_v59 = vpack.c.bf16 %v2320_v54, %v2320_v54  ;;  %v5018_v41 = vpop.f32.mrf.mxu0  ;;  %v3790_v54 = vld [vmem:[#allocation7 + $0x50] sm:$0xf] }
 0x4f8   :  { %v2538_v32 = vunpack.c.l.b16 %v2396_v59 }
 0x4f9   :  { %2284 = vmatmul.bf16.gmra.mxu0 %v3711_v42 }
 0x4fb   :  { %v2321_v52 = vpop.f32.mrf.mxu1 }
 0x4fc   :  { %v2322_v49 = vadd.f32 %v2321_v52, %v2232_v9  ;;  %v4042_v52 = vld [vmem:[#allocation7 + $0x54] sm:$0xf] }
 0x4fe   :  { %v2397_v11 = vpack.c.bf16 %v2322_v49, %v2322_v49  ;;  %v2247_v38 = vpop.f32.mrf.mxu0  ;;  %v3792_v49 = vld [vmem:[#allocation7 + $0x58] sm:$0xf0] }
 0x4ff   :  { %v3795_v10 = vor.u32 %v4042_v52, %v3792_v49 }
 0x500   :  { %v2539_v13 = vunpack.c.l.b16 %v2397_v11  ;;  %v4040_v11 = vld [vmem:[#allocation7 + $0x44] sm:$0xf] }
 0x502   :  { %v5014_v53 = vpack.c.b16 %v2539_v13, %v2538_v32 }
 0x503   :  { %v2324_v50 = vpop.f32.mrf.mxu1 }
 0x504   :  { %v2325_v29 = vadd.f32 %v2324_v50, %v2235_v36  ;;  %v4043_v36 = vld [vmem:[#allocation7 + $0x54] sm:$0xf0] }
 0x505   :  { %v3791_v59 = vor.u32 %v4043_v36, %v3790_v54  ;;  %v4027_v50 = vld [vmem:[#allocation5 + $0xd4] sm:$0xf0] }
 0x506   :  { %2363 = vmatmul.bf16.gmra.mxu1 %v3699_v60  ;;  %v2398_v20 = vpack.c.bf16 %v2325_v29, %v2325_v29  ;;  %v5022_v13 = vpop.f32.mrf.mxu0  ;;  %v3718_v60 = vld [vmem:[#allocation5 + $0xd0] sm:$0xf]  ;;  %v4028_v29 = vld [vmem:[#allocation5 + $0xe4] sm:$0xf] }
 0x507   :  { %v3719_v25 = vor.u32 %v4027_v50, %v3718_v60 }
 0x508   :  { %v2462_v19 = vunpack.c.l.b16 %v2398_v20  ;;  %v3810_v20 = vld [vmem:[#allocation7 + $0x70] sm:$0xf] }
 0x509   :  { %2289 = vmatmul.bf16.gmra.mxu0 %v3719_v25 }
 0x50b   :  { %v2326_v61 = vpop.f32.mrf.mxu1 }
 0x50c   :  { %v2327_v5 = vadd.f32 %v2326_v61, %v2237_v45  ;;  %v3784_v45 = vld [vmem:[#allocation7 + $0x48] sm:$0xf0] }
 0x50d   :  { %v3787_v21 = vor.u32 %v4040_v11, %v3784_v45  ;;  %v4051_v11 = vld [vmem:[#allocation7 + $0x94] sm:$0xf0]  ;;  %v4050_v45 = vld [vmem:[#allocation7 + $0x94] sm:$0xf] }
 0x50e   :  { %v2399_v9 = vpack.c.bf16 %v2327_v5, %v2327_v5  ;;  %v2252_v35 = vpop.f32.mrf.mxu0  ;;  %v4047_v5 = vld [vmem:[#allocation7 + $0x74] sm:$0xf0] }
 0x50f   :  { %v3811_v63 = vor.u32 %v4047_v5, %v3810_v20 }
 0x510   :  { %v2463_v22 = vunpack.c.l.b16 %v2399_v9  ;;  %v3802_v9 = vld [vmem:[#allocation7 + $0x60] sm:$0xf] }
 0x512   :  { %v2466_v39 = vpack.c.b16 %v2463_v22, %v2462_v19  ;;  %v3815_v22 = vor.u32 %v4046_v31, %v3812_v34 }
 0x513   :  { %v2329_v8 = vpop.f32.mrf.mxu1 }
 0x514   :  { %3756 = vmatmul.msk.bf16.vlgmr.msrb.gmra.mxu2 %vm924_vm0, %v2466_v39  ;;  %3758 = vmatmul.msk.bf16.vlgmr.msrb.gmra.mxu3 %vm924_vm0, %v2466_v39  ;;  %v2330_v57 = vadd.f32 %v2329_v8, %v2240_v43  ;;  %v3728_v43 = vld [vmem:[#allocation5 + $0xe8] sm:$0xf0]  ;;  %v4044_v39 = vld [vmem:[#allocation7 + $0x64] sm:$0xf] }
 0x515   :  { %2648 = vmatpush.bf16.msrb.mxu2 %v3791_v59  ;;  %2667 = vmatpush.bf16.msrb.mxu3 %v3795_v10  ;;  %v3731_v26 = vor.u32 %v4028_v29, %v3728_v43  ;;  %v3830_v10 = vld [vmem:[#allocation7 + $0x90] sm:$0xf] }
 0x516   :  { %2368 = vmatmul.bf16.gmra.mxu1 %v3707_v24  ;;  %v2400_v16 = vpack.c.bf16 %v2330_v57, %v2330_v57  ;;  %v5028_v2 = vpop.f32.mrf.mxu0  ;;  %v3803_v24 = vor.u32 %v4045_v15, %v3802_v9 }
 0x518   :  { %v2464_v17 = vunpack.c.l.b16 %v2400_v16 }
 0x519   :  { %2649 = vmatpush.bf16.msrb.mxu2 %v3783_v18  ;;  %2668 = vmatpush.bf16.msrb.mxu3 %v3787_v21  ;;  %v3831_v18 = vor.u32 %v4051_v11, %v3830_v10  ;;  %v3832_v21 = vld [vmem:[#allocation7 + $0x98] sm:$0xf0] }
 0x51a   :  { %2294 = vmatmul.bf16.gmra.mxu0 %v3727_v7  ;;  %v3835_v46 = vor.u32 %v4050_v45, %v3832_v21 }
 0x51b   :  { %v2331_v4 = vpop.f32.mrf.mxu1 }
 0x51c   :  { %v2332_v48 = vadd.f32 %v2331_v4, %v2242_v0  ;;  %v3804_v0 = vld [vmem:[#allocation7 + $0x68] sm:$0xf0] }
 0x51d   :  { %v3807_v8 = vor.u32 %v4044_v39, %v3804_v0  ;;  %v3850_v0 = vld [vmem:[#allocation7 + $0xb0] sm:$0xf] }
 0x51e   :  { %v2401_v28 = vpack.c.bf16 %v2332_v48, %v2332_v48  ;;  %v3734_v48 = vld [vmem:[#allocation5 + $0xf0] sm:$0xf] }
 0x51f   :  { %v3735_v58 = vor.u32 %v4031_v3, %v3734_v48 }
 0x520   :  { %v2465_v23 = vunpack.c.l.b16 %v2401_v28  ;;  %v4030_v28 = vld [vmem:[#allocation5 + $0xf4] sm:$0xf] }
 0x522   :  { %v2467_v1 = vpack.c.b16 %v2465_v23, %v2464_v17  ;;  %v3739_v17 = vor.u32 %v4030_v28, %v3736_v6  ;;  %v3842_v28 = vld [vmem:[#allocation7 + $0xa0] sm:$0xf]  ;;  %v4053_v6 = vld [vmem:[#allocation7 + $0xa4] sm:$0xf0] }
 0x523   :  { %v2334_v30 = vpop.f32.mrf.mxu1 }
 0x524   :  { %3757 = vmatmul.msk.bf16.gmra.mxu2 %vm924_vm0, %v2467_v1  ;;  %3759 = vmatmul.msk.bf16.gmra.mxu3 %vm924_vm0, %v2467_v1  ;;  %v2335_v55 = vadd.f32 %v2334_v30, %v5018_v41 }
 0x526   :  { %2373 = vmatmul.bf16.gmra.mxu1 %v3715_v12 }
 0x52a   :  { %2299 = vmatmul.bf16.gmra.mxu0 %v3735_v58 }
 0x52b   :  { %v2336_v32 = vpop.f32.mrf.mxu1 }
 0x52c   :  { %v2337_v19 = vadd.f32 %v2336_v32, %v2247_v38  ;;  %v3822_v32 = vld [vmem:[#allocation7 + $0x80] sm:$0xf] }
 0x52e   :  { %v2403_v57 = vpack.c.bf16 %v2337_v19, %v2337_v19 }
 0x530   :  { %v2611_v41 = vunpack.c.l.b16 %v2403_v57  ;;  %v3852_v57 = vld [vmem:[#allocation7 + $0xb8] sm:$0xf0] }
 0x533   :  { %v2339_v62 = vpop.f32.mrf.mxu1 }
 0x534   :  { %3776 = vmatmul.msk.bf16.vlgmr.msra.gmra.mxu2 %vm924_vm0, %v5012_v37  ;;  %3778 = vmatmul.msk.bf16.vlgmr.msra.gmra.mxu3 %vm924_vm0, %v5012_v37  ;;  %v2257_v37 = vpop.f32.mrf.mxu0  ;;  %v2340_v12 = vadd.f32 %v2339_v62, %v5022_v13  ;;  %v4049_v13 = vld [vmem:[#allocation7 + $0x84] sm:$0xf0] }
 0x535   :  { %2730 = vmatpush.bf16.msra.mxu2 %v3811_v63  ;;  %2749 = vmatpush.bf16.msra.mxu3 %v3815_v22  ;;  %v3823_v62 = vor.u32 %v4049_v13, %v3822_v32 }
 0x536   :  { %2378 = vmatmul.bf16.gmra.mxu1 %v3723_v33  ;;  %v2404_v38 = vpack.c.bf16 %v2340_v12, %v2340_v12  ;;  %v3824_v33 = vld [vmem:[#allocation7 + $0x88] sm:$0xf0] }
 0x538   :  { %v2612_v59 = vunpack.c.l.b16 %v2404_v38 }
 0x539   :  { %2731 = vmatpush.bf16.msra.mxu2 %v3803_v24  ;;  %2750 = vmatpush.bf16.msra.mxu3 %v3807_v8  ;;  %v4055_v24 = vld [vmem:[#allocation7 + $0xb4] sm:$0xf0]  ;;  %v4054_v8 = vld [vmem:[#allocation7 + $0xb4] sm:$0xf] }
 0x53b   :  { %v2341_v14 = vpop.f32.mrf.mxu1 }
 0x53c   :  { %v2260_v16 = vpop.f32.mrf.mxu0  ;;  %v2342_v30 = vadd.f32 %v2341_v14, %v2252_v35  ;;  %v3827_v35 = vor.u32 %v4048_v47, %v3824_v33  ;;  %v4059_v47 = vld [vmem:[#allocation7 + $0xd4] sm:$0xf0]  ;;  %v4058_v33 = vld [vmem:[#allocation7 + $0xd4] sm:$0xf] }
 0x53e   :  { %v2405_v54 = vpack.c.bf16 %v2342_v30, %v2342_v30 }
 0x540   :  { %v2613_v49 = vunpack.c.l.b16 %v2405_v54 }
 0x542   :  { %v2615_v44 = vpack.c.b16 %v2613_v49, %v2612_v59 }
 0x543   :  { %v2344_v61 = vpop.f32.mrf.mxu1 }
 0x544   :  { %3777 = vmatmul.msk.bf16.gmra.mxu2 %vm924_vm0, %v5014_v53  ;;  %3779 = vmatmul.msk.bf16.gmra.mxu3 %vm924_vm0, %v5014_v53  ;;  %v2402_v53 = vpack.c.bf16 %v2335_v55, %v2335_v55  ;;  %v2262_v1 = vpop.f32.mrf.mxu0  ;;  %v2345_v60 = vadd.f32 %v2344_v61, %v5028_v2 }
 0x546   :  { %2383 = vmatmul.bf16.gmra.mxu1 %v3731_v26  ;;  %v2610_v42 = vunpack.c.l.b16 %v2402_v53  ;;  %v2406_v14 = vpack.c.bf16 %v2345_v60, %v2345_v60  ;;  %v3851_v53 = vor.u32 %v4055_v24, %v3850_v0 }
 0x548   :  { %v2614_v40 = vpack.c.b16 %v2611_v41, %v2610_v42  ;;  %v2692_v7 = vunpack.c.l.b16 %v2406_v14 }
 0x54b   :  { %v2346_v4 = vpop.f32.mrf.mxu1 }
 0x54c   :  { %v2265_v52 = vpop.f32.mrf.mxu0  ;;  %v2347_v50 = vadd.f32 %v2346_v4, %v2257_v37  ;;  %v3855_v4 = vor.u32 %v4054_v8, %v3852_v57 }
 0x54e   :  { %v2407_v51 = vpack.c.bf16 %v2347_v50, %v2347_v50 }
 0x550   :  { %v2693_v29 = vunpack.c.l.b16 %v2407_v51 }
 0x552   :  { %v2696_v26 = vpack.c.b16 %v2693_v29, %v2692_v7 }
 0x553   :  { %v2349_v23 = vpop.f32.mrf.mxu1 }
 0x554   :  { %3796 = vmatmul.msk.bf16.vlgmr.msrb.gmra.mxu2 %vm924_vm0, %v2614_v40  ;;  %3798 = vmatmul.msk.bf16.vlgmr.msrb.gmra.mxu3 %vm924_vm0, %v2614_v40  ;;  %v2267_v25 = vpop.f32.mrf.mxu0  ;;  %v2350_v2 = vadd.f32 %v2349_v23, %v2260_v16  ;;  %v4052_v40 = vld [vmem:[#allocation7 + $0xa4] sm:$0xf]  ;;  %v3844_v23 = vld [vmem:[#allocation7 + $0xa8] sm:$0xf0] }
 0x555   :  { %2812 = vmatpush.bf16.msrb.mxu2 %v3831_v18  ;;  %2831 = vmatpush.bf16.msrb.mxu3 %v3835_v46  ;;  %v3870_v46 = vld [vmem:[#allocation7 + $0xd0] sm:$0xf] }
 0x556   :  { %2388 = vmatmul.bf16.gmra.mxu1 %v3739_v17  ;;  %v2408_v37 = vpack.c.bf16 %v2350_v2, %v2350_v2  ;;  %v3843_v17 = vor.u32 %v4053_v6, %v3842_v28 }
 0x558   :  { %v2694_v34 = vunpack.c.l.b16 %v2408_v37  ;;  %v4057_v37 = vld [vmem:[#allocation7 + $0xc4] sm:$0xf0] }
 0x559   :  { %2813 = vmatpush.bf16.msrb.mxu2 %v3823_v62  ;;  %2832 = vmatpush.bf16.msrb.mxu3 %v3827_v35  ;;  %v3871_v62 = vor.u32 %v4059_v47, %v3870_v46  ;;  %v3872_v35 = vld [vmem:[#allocation7 + $0xd8] sm:$0xf0] }
 0x55b   :  { %v2351_v36 = vpop.f32.mrf.mxu1 }
 0x55c   :  { %v2270_v43 = vpop.f32.mrf.mxu0  ;;  %v2352_v61 = vadd.f32 %v2351_v36, %v2262_v1  ;;  %v3847_v1 = vor.u32 %v4052_v40, %v3844_v23 }
 0x55e   :  { %v2409_v5 = vpack.c.bf16 %v2352_v61, %v2352_v61  ;;  %v3862_v61 = vld [vmem:[#allocation7 + $0xc0] sm:$0xf] }
 0x560   :  { %v2695_v9 = vunpack.c.l.b16 %v2409_v5  ;;  %v4056_v5 = vld [vmem:[#allocation7 + $0xc4] sm:$0xf] }
 0x562   :  { %v2697_v15 = vpack.c.b16 %v2695_v9, %v2694_v34 }
 0x563   :  { %v2354_v27 = vpop.f32.mrf.mxu1 }
 0x564   :  { %3797 = vmatmul.msk.bf16.gmra.mxu2 %vm924_vm0, %v2615_v44  ;;  %3799 = vmatmul.msk.bf16.gmra.mxu3 %vm924_vm0, %v2615_v44  ;;  %v2272_v31 = vpop.f32.mrf.mxu0  ;;  %v2355_v22 = vadd.f32 %v2354_v27, %v2265_v52 }
 0x566   :  { %v2410_v16 = vpack.c.bf16 %v2355_v22, %v2355_v22 }
 0x568   :  { %v2774_v3 = vunpack.c.l.b16 %v2410_v16 }
 0x56b   :  { %v2356_v56 = vpop.f32.mrf.mxu1 }
 0x56c   :  { %v2275_v55 = vpop.f32.mrf.mxu0  ;;  %v2357_v39 = vadd.f32 %v2356_v56, %v2267_v25  ;;  %v3875_v56 = vor.u32 %v4058_v33, %v3872_v35  ;;  %v3884_v33 = vld [vmem:[#allocation7 + $0xe8] sm:$0xf0] }
 0x56e   :  { %v2411_v48 = vpack.c.bf16 %v2357_v39, %v2357_v39 }
 0x570   :  { %v2775_v58 = vunpack.c.l.b16 %v2411_v48 }
 0x572   :  { %v2778_v12 = vpack.c.b16 %v2775_v58, %v2774_v3 }
 0x573   :  { %v2359_v20 = vpop.f32.mrf.mxu1 }
 0x574   :  { %3816 = vmatmul.msk.bf16.vlgmr.msra.gmra.mxu2 %vm924_vm0, %v2696_v26  ;;  %3818 = vmatmul.msk.bf16.vlgmr.msra.gmra.mxu3 %vm924_vm0, %v2696_v26  ;;  %v2277_v42 = vpop.f32.mrf.mxu0  ;;  %v2360_v30 = vadd.f32 %v2359_v20, %v2270_v43 }
 0x575   :  { %2894 = vmatpush.bf16.msra.mxu2 %v3851_v53  ;;  %2913 = vmatpush.bf16.msra.mxu3 %v3855_v4 }
 0x576   :  { %v2412_v49 = vpack.c.bf16 %v2360_v30, %v2360_v30 }
 0x578   :  { %v2776_v27 = vunpack.c.l.b16 %v2412_v49 }
 0x579   :  { %2895 = vmatpush.bf16.msra.mxu2 %v3843_v17  ;;  %2914 = vmatpush.bf16.msra.mxu3 %v3847_v1 }
 0x57b   :  { %v2361_v63 = vpop.f32.mrf.mxu1 }
 0x57c   :  { %v2362_v38 = vadd.f32 %v2361_v63, %v2272_v31  ;;  %v2280_v52 = vpop.f32.mrf.mxu0  ;;  %v3863_v31 = vor.u32 %v4057_v37, %v3862_v61  ;;  %v3864_v63 = vld [vmem:[#allocation7 + $0xc8] sm:$0xf0] }
 0x57d   :  { %v3867_v34 = vor.u32 %v4056_v5, %v3864_v63 }
 0x57e   :  { %v2413_v44 = vpack.c.bf16 %v2362_v38, %v2362_v38  ;;  %v3890_v38 = vld [vmem:[#allocation7 + $0xf0] sm:$0xf] }
 0x580   :  { %v2777_v10 = vunpack.c.l.b16 %v2413_v44 }
 0x582   :  { %v2779_v18 = vpack.c.b16 %v2777_v10, %v2776_v27 }
 0x583   :  { %v2364_v19 = vpop.f32.mrf.mxu1 }
 0x584   :  { %3817 = vmatmul.msk.bf16.gmra.mxu2 %vm924_vm0, %v2697_v15  ;;  %3819 = vmatmul.msk.bf16.gmra.mxu3 %vm924_vm0, %v2697_v15  ;;  %v2282_v21 = vpop.f32.mrf.mxu0  ;;  %v2365_v13 = vadd.f32 %v2364_v19, %v2275_v55 }
 0x586   :  { %v2414_v14 = vpack.c.bf16 %v2365_v13, %v2365_v13  ;;  %v3882_v13 = vld [vmem:[#allocation7 + $0xe0] sm:$0xf] }
 0x588   :  { %v2856_v43 = vunpack.c.l.b16 %v2414_v14 }
 0x58b   :  { %v2366_v41 = vpop.f32.mrf.mxu1 }
 0x58c   :  { %v2367_v60 = vadd.f32 %v2366_v41, %v2277_v42  ;;  %v2285_v7 = vpop.f32.mrf.mxu0 }
 0x58e   :  { %v2415_v51 = vpack.c.bf16 %v2367_v60, %v2367_v60  ;;  %v4061_v60 = vld [vmem:[#allocation7 + $0xe4] sm:$0xf0] }
 0x58f   :  { %v3883_v47 = vor.u32 %v4061_v60, %v3882_v13 }
 0x590   :  { %v2857_v26 = vunpack.c.l.b16 %v2415_v51 }
 0x592   :  { %v2860_v9 = vpack.c.b16 %v2857_v26, %v2856_v43 }
 0x593   :  { %v2369_v59 = vpop.f32.mrf.mxu1 }
 0x594   :  { %3836 = vmatmul.msk.bf16.vlgmr.msrb.gmra.mxu2 %vm924_vm0, %v2778_v12  ;;  %3838 = vmatmul.msk.bf16.vlgmr.msrb.gmra.mxu3 %vm924_vm0, %v2778_v12  ;;  %v2370_v15 = vadd.f32 %v2369_v59, %v2280_v52  ;;  %v2287_v19 = vpop.f32.mrf.mxu0  ;;  %v3892_v59 = vld [vmem:[#allocation7 + $0xf8] sm:$0xf0] }
 0x595   :  { %2976 = vmatpush.bf16.msrb.mxu2 %v3871_v62  ;;  %2995 = vmatpush.bf16.msrb.mxu3 %v3875_v56 }
 0x596   :  { %v2416_v53 = vpack.c.bf16 %v2370_v15, %v2370_v15 }
 0x597   :  { %v2503_v54 = vpop.f32.mrf.mxu2  ;;  %v2522_v36 = vpop.f32.mrf.mxu3 }
 0x598   :  { %v2858_v4 = vunpack.c.l.b16 %v2416_v53 }
 0x599   :  { %2977 = vmatpush.bf16.msrb.mxu2 %v3863_v31  ;;  %2996 = vmatpush.bf16.msrb.mxu3 %v3867_v34 }
 0x59b   :  { %v2371_v32 = vpop.f32.mrf.mxu1 }
 0x59c   :  { %v2372_v55 = vadd.f32 %v2371_v32, %v2282_v21  ;;  %v2290_v41 = vpop.f32.mrf.mxu0 }
 0x59e   :  { %v2417_v57 = vpack.c.bf16 %v2372_v55, %v2372_v55 }
 0x59f   :  { %v2505_v11 = vpop.f32.mrf.mxu2  ;;  %v2524_v45 = vpop.f32.mrf.mxu3 }
 0x5a0   :  { %v2859_v16 = vunpack.c.l.b16 %v2417_v57 }
 0x5a2   :  { %v2861_v6 = vpack.c.b16 %v2859_v16, %v2858_v4 }
 0x5a3   :  { %v2374_v29 = vpop.f32.mrf.mxu1 }
 0x5a4   :  { %3837 = vmatmul.msk.bf16.gmra.mxu2 %vm924_vm0, %v2779_v18  ;;  %3839 = vmatmul.msk.bf16.gmra.mxu3 %vm924_vm0, %v2779_v18  ;;  %v2375_v40 = vadd.f32 %v2374_v29, %v2285_v7  ;;  %v2292_v27 = vpop.f32.mrf.mxu0 }
 0x5a6   :  { %v2418_v49 = vpack.c.bf16 %v2375_v40, %v2375_v40 }
 0x5a7   :  { %v2508_v50 = vpop.f32.mrf.mxu2  ;;  %v2527_v25 = vpop.f32.mrf.mxu3 }
 0x5ab   :  { %v2376_v22 = vpop.f32.mrf.mxu1 }
 0x5ac   :  { %v2377_v17 = vadd.f32 %v2376_v22, %v2287_v19  ;;  %v2295_v14 = vpop.f32.mrf.mxu0 }
 0x5ae   :  { %v2419_v44 = vpack.c.bf16 %v2377_v17, %v2377_v17 }
 0x5af   :  { %v2510_v20 = vpop.f32.mrf.mxu2  ;;  %v2529_v2 = vpop.f32.mrf.mxu3 }
 0x5b0   :  { %v2939_v18 = vunpack.c.l.b16 %v2419_v44 }
 0x5b3   :  { %v2379_v28 = vpop.f32.mrf.mxu1 }
 0x5b4   :  { %3856 = vmatmul.msk.bf16.vlgmr.msra.gmra.mxu2 %vm924_vm0, %v2860_v9  ;;  %3858 = vmatmul.msk.bf16.vlgmr.msra.gmra.mxu3 %vm924_vm0, %v2860_v9  ;;  %v2380_v56 = vadd.f32 %v2379_v28, %v2290_v41  ;;  %v2297_v31 = vpop.f32.mrf.mxu0 }
 0x5b7   :  { %v2577_v39 = vpop.f32.mrf.mxu2  ;;  %v2596_v0 = vpop.f32.mrf.mxu3 }
 0x5b8   :  { %v2578_v24 = vadd.f32 %v2577_v39, %v2503_v54  ;;  %v2597_v8 = vadd.f32 %v2596_v0, %v2522_v36  ;;  %v4063_v54 = vld [vmem:[#allocation7 + $0xf4] sm:$0xf0]  ;;  %v4062_v36 = vld [vmem:[#allocation7 + $0xf4] sm:$0xf] }
 0x5b9   :  { %v3891_v52 = vor.u32 %v4063_v54, %v3890_v38 }
 0x5bb   :  { %v2381_v10 = vpop.f32.mrf.mxu1  ;;  %3058 = vmatpush.bf16.msra.mxu2 %v3891_v52 }
 0x5bc   :  { %v2382_v7 = vadd.f32 %v2381_v10, %v2292_v27  ;;  %v2300_v57 = vpop.f32.mrf.mxu0 }
 0x5bf   :  { %v2579_v48 = vpop.f32.mrf.mxu2  ;;  %v2598_v3 = vpop.f32.mrf.mxu3  ;;  %3059 = vmatpush.bf16.msra.mxu2 %v3883_v47 }
 0x5c0   :  { %v2580_v58 = vadd.f32 %v2579_v48, %v2505_v11  ;;  %v2599_v42 = vadd.f32 %v2598_v3, %v2524_v45  ;;  %v3895_v11 = vor.u32 %v4062_v36, %v3892_v59  ;;  %v2938_v45 = vunpack.c.l.b16 %v2418_v49 }
 0x5c2   :  { %3077 = vmatpush.bf16.msra.mxu3 %v3895_v11  ;;  %v2942_v35 = vpack.c.b16 %v2939_v18, %v2938_v45 }
 0x5c3   :  { %v2384_v51 = vpop.f32.mrf.mxu1 }
 0x5c4   :  { %3857 = vmatmul.msk.bf16.gmra.mxu2 %vm924_vm0, %v2861_v6  ;;  %3859 = vmatmul.msk.bf16.gmra.mxu3 %vm924_vm0, %v2861_v6  ;;  %v2385_v22 = vadd.f32 %v2384_v51, %v2295_v14  ;;  %v2302_v17 = vpop.f32.mrf.mxu0 }
 0x5c6   :  { %v2422_v16 = vpack.c.bf16 %v2385_v22, %v2385_v22 }
 0x5c7   :  { %v2582_v23 = vpop.f32.mrf.mxu2  ;;  %v2601_v1 = vpop.f32.mrf.mxu3 }
 0x5c8   :  { %v2583_v12 = vadd.f32 %v2582_v23, %v2508_v50  ;;  %v2602_v30 = vadd.f32 %v2601_v1, %v2527_v25  ;;  %v4060_v50 = vld [vmem:[#allocation7 + $0xe4] sm:$0xf]  ;;  %v3020_v3 = vunpack.c.l.b16 %v2422_v16 }
 0x5c9   :  { %v3887_v62 = vor.u32 %v4060_v50, %v3884_v33 }
 0x5cb   :  { %3078 = vmatpush.bf16.msra.mxu3 %v3887_v62  ;;  %v2386_v63 = vpop.f32.mrf.mxu1 }
 0x5cc   :  { %v2387_v39 = vadd.f32 %v2386_v63, %v2297_v31 }
 0x5ce   :  { %v2423_v48 = vpack.c.bf16 %v2387_v39, %v2387_v39 }
 0x5cf   :  { %v2584_v21 = vpop.f32.mrf.mxu2  ;;  %v2603_v32 = vpop.f32.mrf.mxu3 }
 0x5d0   :  { %v2585_v25 = vadd.f32 %v2584_v21, %v2510_v20  ;;  %v2604_v46 = vadd.f32 %v2603_v32, %v2529_v2  ;;  %v2420_v20 = vpack.c.bf16 %v2380_v56, %v2380_v56  ;;  %v2421_v2 = vpack.c.bf16 %v2382_v7, %v2382_v7 }
 0x5d1   :  { %v3021_v41 = vunpack.c.l.b16 %v2423_v48 }
 0x5d2   :  { %v2940_v37 = vunpack.c.l.b16 %v2420_v20  ;;  %v2941_v5 = vunpack.c.l.b16 %v2421_v2 }
 0x5d3   :  { %v2389_v4 = vpop.f32.mrf.mxu1  ;;  %v3024_v40 = vpack.c.b16 %v3021_v41, %v3020_v3  ;;  %v3098_v3 = vld [vmem:[%s5072_s5] sm:$0x3]  ;;  %s4317_s5 = smov [#allocation8]  }
 0x5d4   :  { %3876 = vmatmul.msk.bf16.vlgmr.msrb.gmra.mxu2 %vm924_vm0, %v2942_v35  ;;  %3878 = vmatmul.msk.bf16.vlgmr.msrb.gmra.mxu3 %vm924_vm0, %v2942_v35  ;;  %v2943_v19 = vpack.c.b16 %v2941_v5, %v2940_v37  ;;  %v2390_v1 = vadd.f32 %v2389_v4, %v2300_v57  ;;  %s3124_s15 = sshll.u32 %s4317_s5, 4  ;;  %s3125_s15 = int_to_ptr.vmem [resolvable:$true] %s3124_s15 }
 0x5d6   :  { %v2424_v52 = vpack.c.bf16 %v2390_v1, %v2390_v1 }
 0x5d7   :  { %v2651_v29 = vpop.f32.mrf.mxu2  ;;  %v2670_v43 = vpop.f32.mrf.mxu3 }
 0x5d8   :  { %v2680_v26 = vadd.f32 %v2651_v29, %v2578_v24  ;;  %v2681_v61 = vadd.f32 %v2670_v43, %v2597_v8  ;;  %v3022_v49 = vunpack.c.l.b16 %v2424_v52 }
 0x5db   :  { %v2391_v23 = vpop.f32.mrf.mxu1 }
 0x5df   :  { %v2653_v34 = vpop.f32.mrf.mxu2  ;;  %v2672_v9 = vpop.f32.mrf.mxu3 }
 0x5e0   :  { %v2682_v15 = vadd.f32 %v2653_v34, %v2580_v58  ;;  %v2683_v55 = vadd.f32 %v2672_v9, %v2599_v42 }
 0x5e4   :  { %3877 = vmatmul.msk.bf16.gmra.mxu2 %vm924_vm0, %v2943_v19  ;;  %3879 = vmatmul.msk.bf16.gmra.mxu3 %vm924_vm0, %v2943_v19 }
 0x5e7   :  { %v2656_v0 = vpop.f32.mrf.mxu2  ;;  %v2675_v24 = vpop.f32.mrf.mxu3 }
 0x5e8   :  { %v2684_v8 = vadd.f32 %v2656_v0, %v2583_v12  ;;  %v2685_v53 = vadd.f32 %v2675_v24, %v2602_v30  ;;  %v2392_v12 = vadd.f32 %v2391_v23, %v2302_v17 }
 0x5ea   :  { %v2425_v59 = vpack.c.bf16 %v2392_v12, %v2392_v12 }
 0x5ec   :  { %v3023_v44 = vunpack.c.l.b16 %v2425_v59 }
 0x5ee   :  { %v3025_v18 = vpack.c.b16 %v3023_v44, %v3022_v49 }
 0x5ef   :  { %v2658_v28 = vpop.f32.mrf.mxu2  ;;  %v2677_v58 = vpop.f32.mrf.mxu3 }
 0x5f0   :  { %v2686_v42 = vadd.f32 %v2658_v28, %v2585_v25  ;;  %v2687_v6 = vadd.f32 %v2677_v58, %v2604_v46 }
 0x5f4   :  { %3896 = vmatmul.msk.bf16.vlgmr.msra.gmra.mxu2 %vm924_vm0, %v3024_v40  ;;  %3898 = vmatmul.msk.bf16.vlgmr.msra.gmra.mxu3 %vm924_vm0, %v3024_v40  ;;  %v3101_v40 = vperm.slane %v3098_v3, 1 }
 0x5f7   :  { %v2733_v30 = vpop.f32.mrf.mxu2  ;;  %v2752_v38 = vpop.f32.mrf.mxu3 }
 0x5f8   :  { %v2762_v54 = vadd.f32 %v2733_v30, %v2680_v26  ;;  %v2763_v36 = vadd.f32 %v2752_v38, %v2681_v61 }
 0x5ff   :  { %v2735_v27 = vpop.f32.mrf.mxu2  ;;  %v2754_v10 = vpop.f32.mrf.mxu3 }
 0x600   :  { %v2764_v11 = vadd.f32 %v2735_v27, %v2682_v15  ;;  %v2765_v45 = vadd.f32 %v2754_v10, %v2683_v55 }
 0x604   :  { %3897 = vmatmul.msk.bf16.gmra.mxu2 %vm924_vm0, %v3025_v18  ;;  %3899 = vmatmul.msk.bf16.gmra.mxu3 %vm924_vm0, %v3025_v18 }
 0x607   :  { %v2738_v21 = vpop.f32.mrf.mxu2  ;;  %v2757_v32 = vpop.f32.mrf.mxu3 }
 0x608   :  { %v2766_v13 = vadd.f32 %v2738_v21, %v2684_v8  ;;  %v2767_v60 = vadd.f32 %v2757_v32, %v2685_v53 }
 0x60f   :  { %v2740_v50 = vpop.f32.mrf.mxu2  ;;  %v2759_v25 = vpop.f32.mrf.mxu3 }
 0x610   :  { %v2768_v46 = vadd.f32 %v2740_v50, %v2686_v42  ;;  %v2769_v47 = vadd.f32 %v2759_v25, %v2687_v6  ;;  %v3100_v6 = vperm.slane %v3098_v3, 0 }
 0x617   :  { %v2815_v33 = vpop.f32.mrf.mxu2  ;;  %v2834_v62 = vpop.f32.mrf.mxu3 }
 0x618   :  { %v2844_v35 = vadd.f32 %v2815_v33, %v2762_v54  ;;  %v2845_v14 = vadd.f32 %v2834_v62, %v2763_v36 }
 0x61f   :  { %v2817_v51 = vpop.f32.mrf.mxu2  ;;  %v2836_v56 = vpop.f32.mrf.mxu3 }
 0x620   :  { %v2846_v7 = vadd.f32 %v2817_v51, %v2764_v11  ;;  %v2847_v29 = vadd.f32 %v2836_v56, %v2765_v45 }
 0x627   :  { %v2820_v43 = vpop.f32.mrf.mxu2  ;;  %v2839_v26 = vpop.f32.mrf.mxu3 }
 0x628   :  { %v2848_v61 = vadd.f32 %v2820_v43, %v2766_v13  ;;  %v2849_v20 = vadd.f32 %v2839_v26, %v2767_v60 }
 0x62f   :  { %v2822_v2 = vpop.f32.mrf.mxu2  ;;  %v2841_v37 = vpop.f32.mrf.mxu3 }
 0x630   :  { %v2850_v5 = vadd.f32 %v2822_v2, %v2768_v46  ;;  %v2851_v31 = vadd.f32 %v2841_v37, %v2769_v47 }
 0x637   :  { %v2897_v63 = vpop.f32.mrf.mxu2  ;;  %v2916_v34 = vpop.f32.mrf.mxu3 }
 0x638   :  { %v2926_v41 = vadd.f32 %v2897_v63, %v2844_v35  ;;  %v2927_v28 = vadd.f32 %v2916_v34, %v2845_v14 }
 0x63f   :  { %v2899_v9 = vpop.f32.mrf.mxu2  ;;  %v2918_v15 = vpop.f32.mrf.mxu3 }
 0x640   :  { %v2928_v54 = vadd.f32 %v2899_v9, %v2846_v7  ;;  %v2929_v36 = vadd.f32 %v2918_v15, %v2847_v29 }
 0x647   :  { %v2902_v55 = vpop.f32.mrf.mxu2  ;;  %v2921_v19 = vpop.f32.mrf.mxu3 }
 0x648   :  { %v2930_v18 = vadd.f32 %v2902_v55, %v2848_v61  ;;  %v2931_v21 = vadd.f32 %v2921_v19, %v2849_v20 }
 0x64f   :  { %v2904_v22 = vpop.f32.mrf.mxu2  ;;  %v2923_v39 = vpop.f32.mrf.mxu3 }
 0x650   :  { %v2932_v62 = vadd.f32 %v2904_v22, %v2850_v5  ;;  %v2933_v35 = vadd.f32 %v2923_v39, %v2851_v31 }
 0x657   :  { %v2979_v0 = vpop.f32.mrf.mxu2  ;;  %v2998_v24 = vpop.f32.mrf.mxu3 }
 0x658   :  { %v3008_v58 = vadd.f32 %v2979_v0, %v2926_v41  ;;  %v3009_v42 = vadd.f32 %v2998_v24, %v2927_v28 }
 0x65f   :  { %v2981_v8 = vpop.f32.mrf.mxu2  ;;  %v3000_v53 = vpop.f32.mrf.mxu3 }
 0x660   :  { %v3010_v52 = vadd.f32 %v2981_v8, %v2928_v54  ;;  %v3011_v59 = vadd.f32 %v3000_v53, %v2929_v36 }
 0x667   :  { %v2984_v57 = vpop.f32.mrf.mxu2  ;;  %v3003_v4 = vpop.f32.mrf.mxu3 }
 0x668   :  { %v3012_v32 = vadd.f32 %v2984_v57, %v2930_v18  ;;  %v3013_v13 = vadd.f32 %v3003_v4, %v2931_v21 }
 0x66f   :  { %v2986_v16 = vpop.f32.mrf.mxu2  ;;  %v3005_v48 = vpop.f32.mrf.mxu3 }
 0x670   :  { %v3014_v14 = vadd.f32 %v2986_v16, %v2932_v62  ;;  %v3015_v51 = vadd.f32 %v3005_v48, %v2933_v35 }
 0x677   :  { %v3061_v17 = vpop.f32.mrf.mxu2  ;;  %v3080_v23 = vpop.f32.mrf.mxu3 }
 0x678   :  { %v3090_v1 = vadd.f32 %v3061_v17, %v3008_v58  ;;  %v3091_v12 = vadd.f32 %v3080_v23, %v3009_v42 }
 0x67a   :  { %v3104_v30 = vadd.f32 %v3100_v6, %v3090_v1  ;;  %v3105_v38 = vadd.f32 %v3101_v40, %v3091_v12 }
 0x67c   :  { %3112 = vst [vmem:[#allocation8] sm:$0xff] %v3104_v30 }
 0x67d   :  { %3113 = vst [vmem:[#allocation8 + $0x8] sm:$0xff] %v3105_v38 }
 0x67f   :  { %v3063_v49 = vpop.f32.mrf.mxu2  ;;  %v3082_v44 = vpop.f32.mrf.mxu3 }
 0x680   :  { %v3092_v27 = vadd.f32 %v3063_v49, %v3010_v52  ;;  %v3093_v10 = vadd.f32 %v3082_v44, %v3011_v59 }
 0x682   :  { %v3106_v11 = vadd.f32 %v3100_v6, %v3092_v27  ;;  %v3107_v45 = vadd.f32 %v3101_v40, %v3093_v10 }
 0x684   :  { %3114 = vst [vmem:[#allocation8 + $0x10] sm:$0xff] %v3106_v11 }
 0x685   :  { %3115 = vst [vmem:[#allocation8 + $0x18] sm:$0xff] %v3107_v45 }
 0x687   :  { %v3066_v60 = vpop.f32.mrf.mxu2  ;;  %v3085_v50 = vpop.f32.mrf.mxu3 }
 0x688   :  { %v3094_v25 = vadd.f32 %v3066_v60, %v3012_v32  ;;  %v3095_v46 = vadd.f32 %v3085_v50, %v3013_v13 }
 0x68a   :  { %v3108_v47 = vadd.f32 %v3100_v6, %v3094_v25  ;;  %v3109_v33 = vadd.f32 %v3101_v40, %v3095_v46 }
 0x68c   :  { %3116 = vst [vmem:[#allocation8 + $0x20] sm:$0xff] %v3108_v47 }
 0x68d   :  { %3117 = vst [vmem:[#allocation8 + $0x28] sm:$0xff] %v3109_v33 }
 0x68f   :  { %v3068_v56 = vpop.f32.mrf.mxu2  ;;  %v3087_v7 = vpop.f32.mrf.mxu3 }
 0x690   :  { %v3096_v29 = vadd.f32 %v3068_v56, %v3014_v14  ;;  %v3097_v43 = vadd.f32 %v3087_v7, %v3015_v51 }
 0x692   :  { %v3110_v26 = vadd.f32 %v3100_v6, %v3096_v29  ;;  %v3111_v61 = vadd.f32 %v3101_v40, %v3097_v43 }
 0x694   :  { %3118 = vst [vmem:[#allocation8 + $0x30] sm:$0xff] %v3110_v26 }
 0x695   :  { %3119 = vst [vmem:[#allocation8 + $0x38] sm:$0xff] %v3111_v61 }
 0x696   :  { %3132 = dma.vmem_to_hbm [thread:$0]  %s3125_s15, 1024, %s3127_s18, [#allocation4], %s4318_s19, %s4318_s19, %s4319_s20  }
 0x697   :  { %4305 = dma.done.wait [#allocation4], 1024  }
 0x698   :  { %4306 = vsyncadd [#allocation4], 4294966272 }
 0x699   :  { %3137 = vsyncpa [#allocation3], 1 }
 0x69a   :  { %3138 = vsyncpa [#allocation6], 1 }
 0x69b   :  { %3139 = vsyncpa [#allocation4], 1 }

</bundles_post_ra>
